<compile_context>
chip_gen: v6e
topology: v6e:2x2x1
jax: 0.10.0
libtpu: 0.0.40
codegen_flags: <defaults>
</compile_context>

<pallas_src>
import functools

import jax
import jax.numpy as jnp
from jax.experimental import pallas as pl
from jax.experimental.pallas import tpu as pltpu


# ----------------------------------------------------------------------------
# Fused Pallas kernel: conv1+ReLU -> conv2+ReLU -> flatten -> fc1+ReLU -> fc2
# ----------------------------------------------------------------------------
def fused_forward_kernel(xpatch_ref, w1_ref, b1_ref, w2_ref, b2_ref,
                         wf1_ref, bf1_ref, wf2_ref, bf2_ref,
                         o_ref, h1p_ref, patches2_ref, flat_ref, *, B, H, W):
    """Whole BotActionNetworkCNN forward for the full batch in one kernel.

    xpatch_ref:   (B*H*W, 27)        conv1 im2col patches (tap-major, ch-minor)
    w1_ref:       (27, 32)           conv1 weight, rows in (dy, dx, cin) order
    b1_ref:       (1, 32)
    w2_ref:       (288, 64)          conv2 weight, rows in (dy, dx, cin) order
    b2_ref:       (1, 64)
    wf1_ref:      (H*W*64, 128)      fc1 weight with the torch NCHW-flatten
                                     permutation folded in (rows = (h, w, c))
    bf1_ref:      (1, 128)
    wf2_ref:      (128, 128)         fc2 weight zero-padded to 128 lanes
    bf2_ref:      (1, 128)
    o_ref:        (B, 128)           padded logits; wrapper slices real outputs
    h1p_ref:      (B, H+2, W+2, 32)  scratch: zero-padded conv1 output
    patches2_ref: (B*H*W, 288)       scratch: conv2 im2col patches
    flat_ref:     (B, H*W*64)        scratch: flattened conv2 output
    """
    Hp, Wp = H + 2, W + 2
    M2 = B * H * W
    C1, C2 = 32, 64
    P = H * W

    # ---- conv1 + bias + ReLU: one im2col matmul -----------------------------
    h1 = jnp.dot(xpatch_ref[...], w1_ref[...],
                 preferred_element_type=jnp.float32)
    h1 = jnp.maximum(h1 + b1_ref[...], 0.0)                    # (B*H*W, 32)

    # ---- zero-padded conv1 buffer (border = conv2's SAME padding) -----------
    h1p_ref[...] = jnp.zeros_like(h1p_ref)
    h1p_ref[:, 1:H + 1, 1:W + 1, :] = h1.reshape(B, H, W, C1)
    h1p = h1p_ref[...]                                         # (B, Hp, Wp, 32)

    # ---- conv2 + bias + ReLU: pack 9 shifted views, one (M2,288)@(288,64) ---
    for t in range(9):
        dy, dx = divmod(t, 3)
        patches2_ref[:, t * C1:(t + 1) * C1] = (
            h1p[:, dy:dy + H, dx:dx + W, :].reshape(M2, C1))
    h2 = jnp.dot(patches2_ref[...], w2_ref[...],
                 preferred_element_type=jnp.float32)
    h2 = jnp.maximum(h2 + b2_ref[...], 0.0)                    # (B*H*W, 64)

    # ---- flatten (b, h, w, c) -> (b, (h*W+w)*64 + c) via lane-slice stores --
    # The torch (c, h, w) flatten order is already folded into wf1, so this is
    # a plain (h, w, c)-major flatten done with Mosaic-safe static stores.
    h2_3d = h2.reshape(B, P, C2)
    for pos in range(P):
        flat_ref[:, pos * C2:(pos + 1) * C2] = (
            h2_3d[:, pos:pos + 1, :].reshape(B, C2))

    # ---- fc1 + ReLU (+ dropout = identity in eval) + fc2 (lane-padded) ------
    h3 = jnp.dot(flat_ref[...], wf1_ref[...],
                 preferred_element_type=jnp.float32)
    h3 = jnp.maximum(h3 + bf1_ref[...], 0.0)                   # (B, 128)
    o_ref[...] = jnp.dot(h3, wf2_ref[...],
                         preferred_element_type=jnp.float32) + bf2_ref[...]


# ----------------------------------------------------------------------------
# pallas_call wrapper (grid-less -> single invocation, full blocks in VMEM)
# ----------------------------------------------------------------------------
def _full_spec(shape):
    return pl.BlockSpec(shape, lambda: (0,) * len(shape))


def fused_forward(x_patches, prepped, *, B, H, W):
    Hp, Wp = H + 2, W + 2
    dflat = H * W * 64
    n_pad = prepped["wf2"].shape[1]          # 128 (lane-dense padded fc2 out)

    args = (x_patches, prepped["w1"], prepped["b1"], prepped["w2"],
            prepped["b2"], prepped["wf1"], prepped["bf1"], prepped["wf2"],
            prepped["bf2"])

    flops = 2 * (B * H * W * (27 * 32 + 288 * 64)
                 + B * dflat * 128 + B * 128 * n_pad)
    bytes_accessed = 4 * (sum(int(a.size) for a in args) + B * n_pad)

    kern = functools.partial(fused_forward_kernel, B=B, H=H, W=W)
    return pl.pallas_call(
        kern,
        out_shape=jax.ShapeDtypeStruct((B, n_pad), jnp.float32),
        in_specs=[_full_spec(a.shape) for a in args],
        out_specs=_full_spec((B, n_pad)),
        scratch_shapes=[
            pltpu.VMEM((B, Hp, Wp, 32), jnp.float32),    # padded conv1 output
            pltpu.VMEM((B * H * W, 288), jnp.float32),   # conv2 im2col patches
            pltpu.VMEM((B, dflat), jnp.float32),         # flattened activations
        ],
        cost_estimate=pl.CostEstimate(flops=flops, transcendentals=0,
                                      bytes_accessed=bytes_accessed),
    )(*args)


# ----------------------------------------------------------------------------
# One-time parameter preparation (runs once, OUTSIDE the jitted forward)
# ----------------------------------------------------------------------------
def prepare_params(params, d):
    """Repack weights once: tap-major convs, flatten-folded fc1, padded fc2."""
    H = W = d
    out_dim = params["wf2"].shape[1]
    n_pad = 128 - out_dim
    wf1 = params["wf1"].reshape(64, H, W, 128).transpose(1, 2, 0, 3)
    return {
        "w1": params["w1"].reshape(9 * 3, 32),               # (27, 32)
        "b1": params["b1"],                                   # (1, 32)
        "w2": params["w2"].reshape(9 * 32, 64),               # (288, 64)
        "b2": params["b2"],                                   # (1, 64)
        "wf1": wf1.reshape(H * W * 64, 128),                  # (4096, 128)
        "bf1": params["bf1"],                                 # (1, 128)
        "wf2": jnp.pad(params["wf2"], ((0, 0), (0, n_pad))),  # (128, 128)
        "bf2": jnp.pad(params["bf2"], ((0, 0), (0, n_pad))),  # (1, 128)
    }


def bot_action_network_cnn_forward(prepped, x_nchw, *, output_size):
    B, _, H, W = x_nchw.shape
    # Per-call ops touch only the tiny raw input: NCHW->NHWC, pad-by-1, and the
    # (B*H*W, 27) conv1 im2col patches (~13 KB). All weight repacking is done
    # once in prepare_params.
    x = jnp.transpose(x_nchw, (0, 2, 3, 1))
    xp = jnp.pad(x, ((0, 0), (1, 1), (1, 1), (0, 0)))
    taps = [xp[:, dy:dy + H, dx:dx + W, :]
            for dy in range(3) for dx in range(3)]
    x_patches = jnp.concatenate(taps, axis=-1).reshape(B * H * W, 27)

    out_padded = fused_forward(x_patches, prepped, B=B, H=H, W=W)  # (B, 128)
    return out_padded[:, :output_size]


# ----------------------------------------------------------------------------
# Parameter init (deterministic synthetic, PyTorch-like uniform fan_in scaling)
# ----------------------------------------------------------------------------
def init_params(key, d, output_size):
    ks = jax.random.split(key, 8)

    def u(k, shape, fan_in):
        bound = 1.0 / jnp.sqrt(fan_in)
        return jax.random.uniform(k, shape, jnp.float32, -bound, bound)

    p = {}
    p["w1"] = u(ks[0], (3, 3, 3, 32), 3 * 9)          # conv1 HWIO
    p["b1"] = u(ks[1], (1, 32), 3 * 9)
    p["w2"] = u(ks[2], (3, 3, 32, 64), 32 * 9)        # conv2 HWIO
    p["b2"] = u(ks[3], (1, 64), 32 * 9)
    p["wf1"] = u(ks[4], (64 * d * d, 128), 64 * d * d)  # rows in (c, h, w) order
    p["bf1"] = u(ks[5], (1, 128), 64 * d * d)
    p["wf2"] = u(ks[6], (128, output_size), 128)
    p["bf2"] = u(ks[7], (1, output_size), 128)
    return p


# ----------------------------------------------------------------------------
# Pure-JAX reference (original layout / raw weights) for the correctness check
# ----------------------------------------------------------------------------
def reference_forward(params, x_nchw):
    B = x_nchw.shape[0]
    x = jnp.transpose(x_nchw, (0, 2, 3, 1))
    dn = ("NHWC", "HWIO", "NHWC")
    h = jax.lax.conv_general_dilated(x, params["w1"], (1, 1), "SAME",
                                     dimension_numbers=dn) + params["b1"][0]
    h = jnp.maximum(h, 0.0)
    h = jax.lax.conv_general_dilated(h, params["w2"], (1, 1), "SAME",
                                     dimension_numbers=dn) + params["b2"][0]
    h = jnp.maximum(h, 0.0)
    flat = jnp.transpose(h, (0, 3, 1, 2)).reshape(B, -1)   # torch NCHW flatten
    h = jnp.maximum(flat @ params["wf1"] + params["bf1"], 0.0)
    return h @ params["wf2"] + params["bf2"]


# ----------------------------------------------------------------------------
if __name__ == "__main__":
    d = 8                 # spatial size (input is d x d)
    output_size = 6
    B = 2

    key = jax.random.PRNGKey(0)
    k_x, k_p = jax.random.split(key)
    x = jax.random.normal(k_x, (B, 3, d, d), jnp.float32)     # NCHW input
    params = init_params(k_p, d, output_size)

    prepped = prepare_params(params, d)                       # one-time prep

    fwd = jax.jit(functools.partial(bot_action_network_cnn_forward,
                                    output_size=output_size))
    out = jax.block_until_ready(fwd(prepped, x))

    ref = jax.block_until_ready(reference_forward(params, x))
    assert out.shape == (B, output_size)
    assert jnp.allclose(out, ref, rtol=1e-4, atol=1e-4), "mismatch vs reference"

    print("KERNEL_OK")
</pallas_src>

<mosaic_0001>
module attributes {stable_mosaic.version = 11 : i64} {
  func.func @fused_forward_kernel(%arg0: memref<128x27xf32, #tpu.memory_space<vmem>>, %arg1: memref<27x32xf32, #tpu.memory_space<vmem>>, %arg2: memref<1x32xf32, #tpu.memory_space<vmem>>, %arg3: memref<288x64xf32, #tpu.memory_space<vmem>>, %arg4: memref<1x64xf32, #tpu.memory_space<vmem>>, %arg5: memref<4096x128xf32, #tpu.memory_space<vmem>>, %arg6: memref<1x128xf32, #tpu.memory_space<vmem>>, %arg7: memref<128x128xf32, #tpu.memory_space<vmem>>, %arg8: memref<1x128xf32, #tpu.memory_space<vmem>>, %arg9: memref<2x128xf32, #tpu.memory_space<vmem>>, %arg10: memref<2x10x10x32xf32, #tpu.memory_space<vmem>>, %arg11: memref<128x288xf32, #tpu.memory_space<vmem>>, %arg12: memref<2x4096xf32, #tpu.memory_space<vmem>>) attributes {dimension_semantics = [], scalar_prefetch = 0 : i64, scratch_operands = 3 : i64, tpu.core_type = #tpu.core_type<tc>} {
    %c0 = arith.constant 0 : index
    %c0_0 = arith.constant 0 : index
    %0 = vector.load %arg0[%c0, %c0_0] : memref<128x27xf32, #tpu.memory_space<vmem>>, vector<128x27xf32>
    %c0_1 = arith.constant 0 : index
    %c0_2 = arith.constant 0 : index
    %1 = vector.load %arg1[%c0_1, %c0_2] : memref<27x32xf32, #tpu.memory_space<vmem>>, vector<27x32xf32>
    %cst = arith.constant dense<0.000000e+00> : vector<128x32xf32>
    %2 = tpu.matmul %0, %1, %cst {dimension_numbers = #tpu.dot_dimension_numbers<[1], [0], [0], [1], [0, 0, 1, 1], [], []>} : vector<128x27xf32>, vector<27x32xf32>, vector<128x32xf32> -> vector<128x32xf32>
    %c0_3 = arith.constant 0 : index
    %c0_4 = arith.constant 0 : index
    %3 = vector.load %arg2[%c0_3, %c0_4] : memref<1x32xf32, #tpu.memory_space<vmem>>, vector<1x32xf32>
    %4 = vector.broadcast %3 : vector<1x32xf32> to vector<128x32xf32>
    %5 = arith.addf %2, %4 : vector<128x32xf32>
    %cst_5 = arith.constant 0.000000e+00 : f32
    %6 = vector.broadcast %cst_5 : f32 to vector<128x32xf32>
    %7 = arith.maximumf %5, %6 : vector<128x32xf32>
    %cst_6 = arith.constant 0.000000e+00 : f32
    %8 = vector.broadcast %cst_6 : f32 to vector<2x10x10x32xf32>
    %c0_7 = arith.constant 0 : index
    %c0_8 = arith.constant 0 : index
    %c0_9 = arith.constant 0 : index
    %c0_10 = arith.constant 0 : index
    %9 = vector.load %arg10[%c0_7, %c0_8, %c0_9, %c0_10] : memref<2x10x10x32xf32, #tpu.memory_space<vmem>>, vector<2x10x10x32xf32>
    tpu.vector_store %arg10[%c0_7, %c0_8, %c0_9, %c0_10], %8 {strides = array<i32>} : memref<2x10x10x32xf32, #tpu.memory_space<vmem>>, vector<2x10x10x32xf32>,
    %10 = vector.shape_cast %7 : vector<128x32xf32> to vector<2x8x8x32xf32>
    %c0_11 = arith.constant 0 : index
    %c1 = arith.constant 1 : index
    %c1_12 = arith.constant 1 : index
    %c0_13 = arith.constant 0 : index
    %11 = vector.load %arg10[%c0_11, %c1, %c1_12, %c0_13] : memref<2x10x10x32xf32, #tpu.memory_space<vmem>>, vector<2x8x8x32xf32>
    tpu.vector_store %arg10[%c0_11, %c1, %c1_12, %c0_13], %10 {strides = array<i32>} : memref<2x10x10x32xf32, #tpu.memory_space<vmem>>, vector<2x8x8x32xf32>,
    %c0_14 = arith.constant 0 : index
    %c0_15 = arith.constant 0 : index
    %c0_16 = arith.constant 0 : index
    %c0_17 = arith.constant 0 : index
    %12 = vector.load %arg10[%c0_14, %c0_15, %c0_16, %c0_17] : memref<2x10x10x32xf32, #tpu.memory_space<vmem>>, vector<2x10x10x32xf32>
    %13 = vector.extract_strided_slice %12 {offsets = [0, 0, 0, 0], sizes = [2, 8, 8, 32], strides = [1, 1, 1, 1]} : vector<2x10x10x32xf32> to vector<2x8x8x32xf32>
    %14 = vector.shape_cast %13 : vector<2x8x8x32xf32> to vector<128x32xf32>
    %c0_18 = arith.constant 0 : index
    %c0_19 = arith.constant 0 : index
    %15 = vector.load %arg11[%c0_18, %c0_19] : memref<128x288xf32, #tpu.memory_space<vmem>>, vector<128x32xf32>
    tpu.vector_store %arg11[%c0_18, %c0_19], %14 {strides = array<i32>} : memref<128x288xf32, #tpu.memory_space<vmem>>, vector<128x32xf32>,
    %16 = vector.extract_strided_slice %12 {offsets = [0, 0, 1, 0], sizes = [2, 8, 8, 32], strides = [1, 1, 1, 1]} : vector<2x10x10x32xf32> to vector<2x8x8x32xf32>
    %17 = vector.shape_cast %16 : vector<2x8x8x32xf32> to vector<128x32xf32>
    %c0_20 = arith.constant 0 : index
    %c32 = arith.constant 32 : index
    %18 = vector.load %arg11[%c0_20, %c32] : memref<128x288xf32, #tpu.memory_space<vmem>>, vector<128x32xf32>
    tpu.vector_store %arg11[%c0_20, %c32], %17 {strides = array<i32>} : memref<128x288xf32, #tpu.memory_space<vmem>>, vector<128x32xf32>,
    %19 = vector.extract_strided_slice %12 {offsets = [0, 0, 2, 0], sizes = [2, 8, 8, 32], strides = [1, 1, 1, 1]} : vector<2x10x10x32xf32> to vector<2x8x8x32xf32>
    %20 = vector.shape_cast %19 : vector<2x8x8x32xf32> to vector<128x32xf32>
    %c0_21 = arith.constant 0 : index
    %c64 = arith.constant 64 : index
    %21 = vector.load %arg11[%c0_21, %c64] : memref<128x288xf32, #tpu.memory_space<vmem>>, vector<128x32xf32>
    tpu.vector_store %arg11[%c0_21, %c64], %20 {strides = array<i32>} : memref<128x288xf32, #tpu.memory_space<vmem>>, vector<128x32xf32>,
    %22 = vector.extract_strided_slice %12 {offsets = [0, 1, 0, 0], sizes = [2, 8, 8, 32], strides = [1, 1, 1, 1]} : vector<2x10x10x32xf32> to vector<2x8x8x32xf32>
    %23 = vector.shape_cast %22 : vector<2x8x8x32xf32> to vector<128x32xf32>
    %c0_22 = arith.constant 0 : index
    %c96 = arith.constant 96 : index
    %24 = vector.load %arg11[%c0_22, %c96] : memref<128x288xf32, #tpu.memory_space<vmem>>, vector<128x32xf32>
    tpu.vector_store %arg11[%c0_22, %c96], %23 {strides = array<i32>} : memref<128x288xf32, #tpu.memory_space<vmem>>, vector<128x32xf32>,
    %25 = vector.extract_strided_slice %12 {offsets = [0, 1, 1, 0], sizes = [2, 8, 8, 32], strides = [1, 1, 1, 1]} : vector<2x10x10x32xf32> to vector<2x8x8x32xf32>
    %26 = vector.shape_cast %25 : vector<2x8x8x32xf32> to vector<128x32xf32>
    %c0_23 = arith.constant 0 : index
    %c128 = arith.constant 128 : index
    %27 = vector.load %arg11[%c0_23, %c128] : memref<128x288xf32, #tpu.memory_space<vmem>>, vector<128x32xf32>
    tpu.vector_store %arg11[%c0_23, %c128], %26 {strides = array<i32>} : memref<128x288xf32, #tpu.memory_space<vmem>>, vector<128x32xf32>,
    %28 = vector.extract_strided_slice %12 {offsets = [0, 1, 2, 0], sizes = [2, 8, 8, 32], strides = [1, 1, 1, 1]} : vector<2x10x10x32xf32> to vector<2x8x8x32xf32>
    %29 = vector.shape_cast %28 : vector<2x8x8x32xf32> to vector<128x32xf32>
    %c0_24 = arith.constant 0 : index
    %c160 = arith.constant 160 : index
    %30 = vector.load %arg11[%c0_24, %c160] : memref<128x288xf32, #tpu.memory_space<vmem>>, vector<128x32xf32>
    tpu.vector_store %arg11[%c0_24, %c160], %29 {strides = array<i32>} : memref<128x288xf32, #tpu.memory_space<vmem>>, vector<128x32xf32>,
    %31 = vector.extract_strided_slice %12 {offsets = [0, 2, 0, 0], sizes = [2, 8, 8, 32], strides = [1, 1, 1, 1]} : vector<2x10x10x32xf32> to vector<2x8x8x32xf32>
    %32 = vector.shape_cast %31 : vector<2x8x8x32xf32> to vector<128x32xf32>
    %c0_25 = arith.constant 0 : index
    %c192 = arith.constant 192 : index
    %33 = vector.load %arg11[%c0_25, %c192] : memref<128x288xf32, #tpu.memory_space<vmem>>, vector<128x32xf32>
    tpu.vector_store %arg11[%c0_25, %c192], %32 {strides = array<i32>} : memref<128x288xf32, #tpu.memory_space<vmem>>, vector<128x32xf32>,
    %34 = vector.extract_strided_slice %12 {offsets = [0, 2, 1, 0], sizes = [2, 8, 8, 32], strides = [1, 1, 1, 1]} : vector<2x10x10x32xf32> to vector<2x8x8x32xf32>
    %35 = vector.shape_cast %34 : vector<2x8x8x32xf32> to vector<128x32xf32>
    %c0_26 = arith.constant 0 : index
    %c224 = arith.constant 224 : index
    %36 = vector.load %arg11[%c0_26, %c224] : memref<128x288xf32, #tpu.memory_space<vmem>>, vector<128x32xf32>
    tpu.vector_store %arg11[%c0_26, %c224], %35 {strides = array<i32>} : memref<128x288xf32, #tpu.memory_space<vmem>>, vector<128x32xf32>,
    %37 = vector.extract_strided_slice %12 {offsets = [0, 2, 2, 0], sizes = [2, 8, 8, 32], strides = [1, 1, 1, 1]} : vector<2x10x10x32xf32> to vector<2x8x8x32xf32>
    %38 = vector.shape_cast %37 : vector<2x8x8x32xf32> to vector<128x32xf32>
    %c0_27 = arith.constant 0 : index
    %c256 = arith.constant 256 : index
    %39 = vector.load %arg11[%c0_27, %c256] : memref<128x288xf32, #tpu.memory_space<vmem>>, vector<128x32xf32>
    tpu.vector_store %arg11[%c0_27, %c256], %38 {strides = array<i32>} : memref<128x288xf32, #tpu.memory_space<vmem>>, vector<128x32xf32>,
    %c0_28 = arith.constant 0 : index
    %c0_29 = arith.constant 0 : index
    %40 = vector.load %arg11[%c0_28, %c0_29] : memref<128x288xf32, #tpu.memory_space<vmem>>, vector<128x288xf32>
    %c0_30 = arith.constant 0 : index
    %c0_31 = arith.constant 0 : index
    %41 = vector.load %arg3[%c0_30, %c0_31] : memref<288x64xf32, #tpu.memory_space<vmem>>, vector<288x64xf32>
    %cst_32 = arith.constant dense<0.000000e+00> : vector<128x64xf32>
    %42 = tpu.matmul %40, %41, %cst_32 {dimension_numbers = #tpu.dot_dimension_numbers<[1], [0], [0], [1], [0, 0, 1, 1], [], []>} : vector<128x288xf32>, vector<288x64xf32>, vector<128x64xf32> -> vector<128x64xf32>
    %c0_33 = arith.constant 0 : index
    %c0_34 = arith.constant 0 : index
    %43 = vector.load %arg4[%c0_33, %c0_34] : memref<1x64xf32, #tpu.memory_space<vmem>>, vector<1x64xf32>
    %44 = vector.broadcast %43 : vector<1x64xf32> to vector<128x64xf32>
    %45 = arith.addf %42, %44 : vector<128x64xf32>
    %cst_35 = arith.constant 0.000000e+00 : f32
    %46 = vector.broadcast %cst_35 : f32 to vector<128x64xf32>
    %47 = arith.maximumf %45, %46 : vector<128x64xf32>
    %48 = vector.shape_cast %47 : vector<128x64xf32> to vector<2x64x64xf32>
    %49 = vector.extract_strided_slice %48 {offsets = [0, 0, 0], sizes = [2, 1, 64], strides = [1, 1, 1]} : vector<2x64x64xf32> to vector<2x1x64xf32>
    %50 = vector.shape_cast %49 : vector<2x1x64xf32> to vector<2x64xf32>
    %c0_36 = arith.constant 0 : index
    %c0_37 = arith.constant 0 : index
    %51 = vector.load %arg12[%c0_36, %c0_37] : memref<2x4096xf32, #tpu.memory_space<vmem>>, vector<2x64xf32>
    tpu.vector_store %arg12[%c0_36, %c0_37], %50 {strides = array<i32>} : memref<2x4096xf32, #tpu.memory_space<vmem>>, vector<2x64xf32>,
    %52 = vector.extract_strided_slice %48 {offsets = [0, 1, 0], sizes = [2, 1, 64], strides = [1, 1, 1]} : vector<2x64x64xf32> to vector<2x1x64xf32>
    %53 = vector.shape_cast %52 : vector<2x1x64xf32> to vector<2x64xf32>
    %c0_38 = arith.constant 0 : index
    %c64_39 = arith.constant 64 : index
    %54 = vector.load %arg12[%c0_38, %c64_39] : memref<2x4096xf32, #tpu.memory_space<vmem>>, vector<2x64xf32>
    tpu.vector_store %arg12[%c0_38, %c64_39], %53 {strides = array<i32>} : memref<2x4096xf32, #tpu.memory_space<vmem>>, vector<2x64xf32>,
    %55 = vector.extract_strided_slice %48 {offsets = [0, 2, 0], sizes = [2, 1, 64], strides = [1, 1, 1]} : vector<2x64x64xf32> to vector<2x1x64xf32>
    %56 = vector.shape_cast %55 : vector<2x1x64xf32> to vector<2x64xf32>
    %c0_40 = arith.constant 0 : index
    %c128_41 = arith.constant 128 : index
    %57 = vector.load %arg12[%c0_40, %c128_41] : memref<2x4096xf32, #tpu.memory_space<vmem>>, vector<2x64xf32>
    tpu.vector_store %arg12[%c0_40, %c128_41], %56 {strides = array<i32>} : memref<2x4096xf32, #tpu.memory_space<vmem>>, vector<2x64xf32>,
    %58 = vector.extract_strided_slice %48 {offsets = [0, 3, 0], sizes = [2, 1, 64], strides = [1, 1, 1]} : vector<2x64x64xf32> to vector<2x1x64xf32>
    %59 = vector.shape_cast %58 : vector<2x1x64xf32> to vector<2x64xf32>
    %c0_42 = arith.constant 0 : index
    %c192_43 = arith.constant 192 : index
    %60 = vector.load %arg12[%c0_42, %c192_43] : memref<2x4096xf32, #tpu.memory_space<vmem>>, vector<2x64xf32>
    tpu.vector_store %arg12[%c0_42, %c192_43], %59 {strides = array<i32>} : memref<2x4096xf32, #tpu.memory_space<vmem>>, vector<2x64xf32>,
    %61 = vector.extract_strided_slice %48 {offsets = [0, 4, 0], sizes = [2, 1, 64], strides = [1, 1, 1]} : vector<2x64x64xf32> to vector<2x1x64xf32>
    %62 = vector.shape_cast %61 : vector<2x1x64xf32> to vector<2x64xf32>
    %c0_44 = arith.constant 0 : index
    %c256_45 = arith.constant 256 : index
    %63 = vector.load %arg12[%c0_44, %c256_45] : memref<2x4096xf32, #tpu.memory_space<vmem>>, vector<2x64xf32>
    tpu.vector_store %arg12[%c0_44, %c256_45], %62 {strides = array<i32>} : memref<2x4096xf32, #tpu.memory_space<vmem>>, vector<2x64xf32>,
    %64 = vector.extract_strided_slice %48 {offsets = [0, 5, 0], sizes = [2, 1, 64], strides = [1, 1, 1]} : vector<2x64x64xf32> to vector<2x1x64xf32>
    %65 = vector.shape_cast %64 : vector<2x1x64xf32> to vector<2x64xf32>
    %c0_46 = arith.constant 0 : index
    %c320 = arith.constant 320 : index
    %66 = vector.load %arg12[%c0_46, %c320] : memref<2x4096xf32, #tpu.memory_space<vmem>>, vector<2x64xf32>
    tpu.vector_store %arg12[%c0_46, %c320], %65 {strides = array<i32>} : memref<2x4096xf32, #tpu.memory_space<vmem>>, vector<2x64xf32>,
    %67 = vector.extract_strided_slice %48 {offsets = [0, 6, 0], sizes = [2, 1, 64], strides = [1, 1, 1]} : vector<2x64x64xf32> to vector<2x1x64xf32>
    %68 = vector.shape_cast %67 : vector<2x1x64xf32> to vector<2x64xf32>
    %c0_47 = arith.constant 0 : index
    %c384 = arith.constant 384 : index
    %69 = vector.load %arg12[%c0_47, %c384] : memref<2x4096xf32, #tpu.memory_space<vmem>>, vector<2x64xf32>
    tpu.vector_store %arg12[%c0_47, %c384], %68 {strides = array<i32>} : memref<2x4096xf32, #tpu.memory_space<vmem>>, vector<2x64xf32>,
    %70 = vector.extract_strided_slice %48 {offsets = [0, 7, 0], sizes = [2, 1, 64], strides = [1, 1, 1]} : vector<2x64x64xf32> to vector<2x1x64xf32>
    %71 = vector.shape_cast %70 : vector<2x1x64xf32> to vector<2x64xf32>
    %c0_48 = arith.constant 0 : index
    %c448 = arith.constant 448 : index
    %72 = vector.load %arg12[%c0_48, %c448] : memref<2x4096xf32, #tpu.memory_space<vmem>>, vector<2x64xf32>
    tpu.vector_store %arg12[%c0_48, %c448], %71 {strides = array<i32>} : memref<2x4096xf32, #tpu.memory_space<vmem>>, vector<2x64xf32>,
    %73 = vector.extract_strided_slice %48 {offsets = [0, 8, 0], sizes = [2, 1, 64], strides = [1, 1, 1]} : vector<2x64x64xf32> to vector<2x1x64xf32>
    %74 = vector.shape_cast %73 : vector<2x1x64xf32> to vector<2x64xf32>
    %c0_49 = arith.constant 0 : index
    %c512 = arith.constant 512 : index
    %75 = vector.load %arg12[%c0_49, %c512] : memref<2x4096xf32, #tpu.memory_space<vmem>>, vector<2x64xf32>
    tpu.vector_store %arg12[%c0_49, %c512], %74 {strides = array<i32>} : memref<2x4096xf32, #tpu.memory_space<vmem>>, vector<2x64xf32>,
    %76 = vector.extract_strided_slice %48 {offsets = [0, 9, 0], sizes = [2, 1, 64], strides = [1, 1, 1]} : vector<2x64x64xf32> to vector<2x1x64xf32>
    %77 = vector.shape_cast %76 : vector<2x1x64xf32> to vector<2x64xf32>
    %c0_50 = arith.constant 0 : index
    %c576 = arith.constant 576 : index
    %78 = vector.load %arg12[%c0_50, %c576] : memref<2x4096xf32, #tpu.memory_space<vmem>>, vector<2x64xf32>
    tpu.vector_store %arg12[%c0_50, %c576], %77 {strides = array<i32>} : memref<2x4096xf32, #tpu.memory_space<vmem>>, vector<2x64xf32>,
    %79 = vector.extract_strided_slice %48 {offsets = [0, 10, 0], sizes = [2, 1, 64], strides = [1, 1, 1]} : vector<2x64x64xf32> to vector<2x1x64xf32>
    %80 = vector.shape_cast %79 : vector<2x1x64xf32> to vector<2x64xf32>
    %c0_51 = arith.constant 0 : index
    %c640 = arith.constant 640 : index
    %81 = vector.load %arg12[%c0_51, %c640] : memref<2x4096xf32, #tpu.memory_space<vmem>>, vector<2x64xf32>
    tpu.vector_store %arg12[%c0_51, %c640], %80 {strides = array<i32>} : memref<2x4096xf32, #tpu.memory_space<vmem>>, vector<2x64xf32>,
    %82 = vector.extract_strided_slice %48 {offsets = [0, 11, 0], sizes = [2, 1, 64], strides = [1, 1, 1]} : vector<2x64x64xf32> to vector<2x1x64xf32>
    %83 = vector.shape_cast %82 : vector<2x1x64xf32> to vector<2x64xf32>
    %c0_52 = arith.constant 0 : index
    %c704 = arith.constant 704 : index
    %84 = vector.load %arg12[%c0_52, %c704] : memref<2x4096xf32, #tpu.memory_space<vmem>>, vector<2x64xf32>
    tpu.vector_store %arg12[%c0_52, %c704], %83 {strides = array<i32>} : memref<2x4096xf32, #tpu.memory_space<vmem>>, vector<2x64xf32>,
    %85 = vector.extract_strided_slice %48 {offsets = [0, 12, 0], sizes = [2, 1, 64], strides = [1, 1, 1]} : vector<2x64x64xf32> to vector<2x1x64xf32>
    %86 = vector.shape_cast %85 : vector<2x1x64xf32> to vector<2x64xf32>
    %c0_53 = arith.constant 0 : index
    %c768 = arith.constant 768 : index
    %87 = vector.load %arg12[%c0_53, %c768] : memref<2x4096xf32, #tpu.memory_space<vmem>>, vector<2x64xf32>
    tpu.vector_store %arg12[%c0_53, %c768], %86 {strides = array<i32>} : memref<2x4096xf32, #tpu.memory_space<vmem>>, vector<2x64xf32>,
    %88 = vector.extract_strided_slice %48 {offsets = [0, 13, 0], sizes = [2, 1, 64], strides = [1, 1, 1]} : vector<2x64x64xf32> to vector<2x1x64xf32>
    %89 = vector.shape_cast %88 : vector<2x1x64xf32> to vector<2x64xf32>
    %c0_54 = arith.constant 0 : index
    %c832 = arith.constant 832 : index
    %90 = vector.load %arg12[%c0_54, %c832] : memref<2x4096xf32, #tpu.memory_space<vmem>>, vector<2x64xf32>
    tpu.vector_store %arg12[%c0_54, %c832], %89 {strides = array<i32>} : memref<2x4096xf32, #tpu.memory_space<vmem>>, vector<2x64xf32>,
    %91 = vector.extract_strided_slice %48 {offsets = [0, 14, 0], sizes = [2, 1, 64], strides = [1, 1, 1]} : vector<2x64x64xf32> to vector<2x1x64xf32>
    %92 = vector.shape_cast %91 : vector<2x1x64xf32> to vector<2x64xf32>
    %c0_55 = arith.constant 0 : index
    %c896 = arith.constant 896 : index
    %93 = vector.load %arg12[%c0_55, %c896] : memref<2x4096xf32, #tpu.memory_space<vmem>>, vector<2x64xf32>
    tpu.vector_store %arg12[%c0_55, %c896], %92 {strides = array<i32>} : memref<2x4096xf32, #tpu.memory_space<vmem>>, vector<2x64xf32>,
    %94 = vector.extract_strided_slice %48 {offsets = [0, 15, 0], sizes = [2, 1, 64], strides = [1, 1, 1]} : vector<2x64x64xf32> to vector<2x1x64xf32>
    %95 = vector.shape_cast %94 : vector<2x1x64xf32> to vector<2x64xf32>
    %c0_56 = arith.constant 0 : index
    %c960 = arith.constant 960 : index
    %96 = vector.load %arg12[%c0_56, %c960] : memref<2x4096xf32, #tpu.memory_space<vmem>>, vector<2x64xf32>
    tpu.vector_store %arg12[%c0_56, %c960], %95 {strides = array<i32>} : memref<2x4096xf32, #tpu.memory_space<vmem>>, vector<2x64xf32>,
    %97 = vector.extract_strided_slice %48 {offsets = [0, 16, 0], sizes = [2, 1, 64], strides = [1, 1, 1]} : vector<2x64x64xf32> to vector<2x1x64xf32>
    %98 = vector.shape_cast %97 : vector<2x1x64xf32> to vector<2x64xf32>
    %c0_57 = arith.constant 0 : index
    %c1024 = arith.constant 1024 : index
    %99 = vector.load %arg12[%c0_57, %c1024] : memref<2x4096xf32, #tpu.memory_space<vmem>>, vector<2x64xf32>
    tpu.vector_store %arg12[%c0_57, %c1024], %98 {strides = array<i32>} : memref<2x4096xf32, #tpu.memory_space<vmem>>, vector<2x64xf32>,
    %100 = vector.extract_strided_slice %48 {offsets = [0, 17, 0], sizes = [2, 1, 64], strides = [1, 1, 1]} : vector<2x64x64xf32> to vector<2x1x64xf32>
    %101 = vector.shape_cast %100 : vector<2x1x64xf32> to vector<2x64xf32>
    %c0_58 = arith.constant 0 : index
    %c1088 = arith.constant 1088 : index
    %102 = vector.load %arg12[%c0_58, %c1088] : memref<2x4096xf32, #tpu.memory_space<vmem>>, vector<2x64xf32>
    tpu.vector_store %arg12[%c0_58, %c1088], %101 {strides = array<i32>} : memref<2x4096xf32, #tpu.memory_space<vmem>>, vector<2x64xf32>,
    %103 = vector.extract_strided_slice %48 {offsets = [0, 18, 0], sizes = [2, 1, 64], strides = [1, 1, 1]} : vector<2x64x64xf32> to vector<2x1x64xf32>
    %104 = vector.shape_cast %103 : vector<2x1x64xf32> to vector<2x64xf32>
    %c0_59 = arith.constant 0 : index
    %c1152 = arith.constant 1152 : index
    %105 = vector.load %arg12[%c0_59, %c1152] : memref<2x4096xf32, #tpu.memory_space<vmem>>, vector<2x64xf32>
    tpu.vector_store %arg12[%c0_59, %c1152], %104 {strides = array<i32>} : memref<2x4096xf32, #tpu.memory_space<vmem>>, vector<2x64xf32>,
    %106 = vector.extract_strided_slice %48 {offsets = [0, 19, 0], sizes = [2, 1, 64], strides = [1, 1, 1]} : vector<2x64x64xf32> to vector<2x1x64xf32>
    %107 = vector.shape_cast %106 : vector<2x1x64xf32> to vector<2x64xf32>
    %c0_60 = arith.constant 0 : index
    %c1216 = arith.constant 1216 : index
    %108 = vector.load %arg12[%c0_60, %c1216] : memref<2x4096xf32, #tpu.memory_space<vmem>>, vector<2x64xf32>
    tpu.vector_store %arg12[%c0_60, %c1216], %107 {strides = array<i32>} : memref<2x4096xf32, #tpu.memory_space<vmem>>, vector<2x64xf32>,
    %109 = vector.extract_strided_slice %48 {offsets = [0, 20, 0], sizes = [2, 1, 64], strides = [1, 1, 1]} : vector<2x64x64xf32> to vector<2x1x64xf32>
    %110 = vector.shape_cast %109 : vector<2x1x64xf32> to vector<2x64xf32>
    %c0_61 = arith.constant 0 : index
    %c1280 = arith.constant 1280 : index
    %111 = vector.load %arg12[%c0_61, %c1280] : memref<2x4096xf32, #tpu.memory_space<vmem>>, vector<2x64xf32>
    tpu.vector_store %arg12[%c0_61, %c1280], %110 {strides = array<i32>} : memref<2x4096xf32, #tpu.memory_space<vmem>>, vector<2x64xf32>,
    %112 = vector.extract_strided_slice %48 {offsets = [0, 21, 0], sizes = [2, 1, 64], strides = [1, 1, 1]} : vector<2x64x64xf32> to vector<2x1x64xf32>
    %113 = vector.shape_cast %112 : vector<2x1x64xf32> to vector<2x64xf32>
    %c0_62 = arith.constant 0 : index
    %c1344 = arith.constant 1344 : index
    %114 = vector.load %arg12[%c0_62, %c1344] : memref<2x4096xf32, #tpu.memory_space<vmem>>, vector<2x64xf32>
    tpu.vector_store %arg12[%c0_62, %c1344], %113 {strides = array<i32>} : memref<2x4096xf32, #tpu.memory_space<vmem>>, vector<2x64xf32>,
    %115 = vector.extract_strided_slice %48 {offsets = [0, 22, 0], sizes = [2, 1, 64], strides = [1, 1, 1]} : vector<2x64x64xf32> to vector<2x1x64xf32>
    %116 = vector.shape_cast %115 : vector<2x1x64xf32> to vector<2x64xf32>
    %c0_63 = arith.constant 0 : index
    %c1408 = arith.constant 1408 : index
    %117 = vector.load %arg12[%c0_63, %c1408] : memref<2x4096xf32, #tpu.memory_space<vmem>>, vector<2x64xf32>
    tpu.vector_store %arg12[%c0_63, %c1408], %116 {strides = array<i32>} : memref<2x4096xf32, #tpu.memory_space<vmem>>, vector<2x64xf32>,
    %118 = vector.extract_strided_slice %48 {offsets = [0, 23, 0], sizes = [2, 1, 64], strides = [1, 1, 1]} : vector<2x64x64xf32> to vector<2x1x64xf32>
    %119 = vector.shape_cast %118 : vector<2x1x64xf32> to vector<2x64xf32>
    %c0_64 = arith.constant 0 : index
    %c1472 = arith.constant 1472 : index
    %120 = vector.load %arg12[%c0_64, %c1472] : memref<2x4096xf32, #tpu.memory_space<vmem>>, vector<2x64xf32>
    tpu.vector_store %arg12[%c0_64, %c1472], %119 {strides = array<i32>} : memref<2x4096xf32, #tpu.memory_space<vmem>>, vector<2x64xf32>,
    %121 = vector.extract_strided_slice %48 {offsets = [0, 24, 0], sizes = [2, 1, 64], strides = [1, 1, 1]} : vector<2x64x64xf32> to vector<2x1x64xf32>
    %122 = vector.shape_cast %121 : vector<2x1x64xf32> to vector<2x64xf32>
    %c0_65 = arith.constant 0 : index
    %c1536 = arith.constant 1536 : index
    %123 = vector.load %arg12[%c0_65, %c1536] : memref<2x4096xf32, #tpu.memory_space<vmem>>, vector<2x64xf32>
    tpu.vector_store %arg12[%c0_65, %c1536], %122 {strides = array<i32>} : memref<2x4096xf32, #tpu.memory_space<vmem>>, vector<2x64xf32>,
    %124 = vector.extract_strided_slice %48 {offsets = [0, 25, 0], sizes = [2, 1, 64], strides = [1, 1, 1]} : vector<2x64x64xf32> to vector<2x1x64xf32>
    %125 = vector.shape_cast %124 : vector<2x1x64xf32> to vector<2x64xf32>
    %c0_66 = arith.constant 0 : index
    %c1600 = arith.constant 1600 : index
    %126 = vector.load %arg12[%c0_66, %c1600] : memref<2x4096xf32, #tpu.memory_space<vmem>>, vector<2x64xf32>
    tpu.vector_store %arg12[%c0_66, %c1600], %125 {strides = array<i32>} : memref<2x4096xf32, #tpu.memory_space<vmem>>, vector<2x64xf32>,
    %127 = vector.extract_strided_slice %48 {offsets = [0, 26, 0], sizes = [2, 1, 64], strides = [1, 1, 1]} : vector<2x64x64xf32> to vector<2x1x64xf32>
    %128 = vector.shape_cast %127 : vector<2x1x64xf32> to vector<2x64xf32>
    %c0_67 = arith.constant 0 : index
    %c1664 = arith.constant 1664 : index
    %129 = vector.load %arg12[%c0_67, %c1664] : memref<2x4096xf32, #tpu.memory_space<vmem>>, vector<2x64xf32>
    tpu.vector_store %arg12[%c0_67, %c1664], %128 {strides = array<i32>} : memref<2x4096xf32, #tpu.memory_space<vmem>>, vector<2x64xf32>,
    %130 = vector.extract_strided_slice %48 {offsets = [0, 27, 0], sizes = [2, 1, 64], strides = [1, 1, 1]} : vector<2x64x64xf32> to vector<2x1x64xf32>
    %131 = vector.shape_cast %130 : vector<2x1x64xf32> to vector<2x64xf32>
    %c0_68 = arith.constant 0 : index
    %c1728 = arith.constant 1728 : index
    %132 = vector.load %arg12[%c0_68, %c1728] : memref<2x4096xf32, #tpu.memory_space<vmem>>, vector<2x64xf32>
    tpu.vector_store %arg12[%c0_68, %c1728], %131 {strides = array<i32>} : memref<2x4096xf32, #tpu.memory_space<vmem>>, vector<2x64xf32>,
    %133 = vector.extract_strided_slice %48 {offsets = [0, 28, 0], sizes = [2, 1, 64], strides = [1, 1, 1]} : vector<2x64x64xf32> to vector<2x1x64xf32>
    %134 = vector.shape_cast %133 : vector<2x1x64xf32> to vector<2x64xf32>
    %c0_69 = arith.constant 0 : index
    %c1792 = arith.constant 1792 : index
    %135 = vector.load %arg12[%c0_69, %c1792] : memref<2x4096xf32, #tpu.memory_space<vmem>>, vector<2x64xf32>
    tpu.vector_store %arg12[%c0_69, %c1792], %134 {strides = array<i32>} : memref<2x4096xf32, #tpu.memory_space<vmem>>, vector<2x64xf32>,
    %136 = vector.extract_strided_slice %48 {offsets = [0, 29, 0], sizes = [2, 1, 64], strides = [1, 1, 1]} : vector<2x64x64xf32> to vector<2x1x64xf32>
    %137 = vector.shape_cast %136 : vector<2x1x64xf32> to vector<2x64xf32>
    %c0_70 = arith.constant 0 : index
    %c1856 = arith.constant 1856 : index
    %138 = vector.load %arg12[%c0_70, %c1856] : memref<2x4096xf32, #tpu.memory_space<vmem>>, vector<2x64xf32>
    tpu.vector_store %arg12[%c0_70, %c1856], %137 {strides = array<i32>} : memref<2x4096xf32, #tpu.memory_space<vmem>>, vector<2x64xf32>,
    %139 = vector.extract_strided_slice %48 {offsets = [0, 30, 0], sizes = [2, 1, 64], strides = [1, 1, 1]} : vector<2x64x64xf32> to vector<2x1x64xf32>
    %140 = vector.shape_cast %139 : vector<2x1x64xf32> to vector<2x64xf32>
    %c0_71 = arith.constant 0 : index
    %c1920 = arith.constant 1920 : index
    %141 = vector.load %arg12[%c0_71, %c1920] : memref<2x4096xf32, #tpu.memory_space<vmem>>, vector<2x64xf32>
    tpu.vector_store %arg12[%c0_71, %c1920], %140 {strides = array<i32>} : memref<2x4096xf32, #tpu.memory_space<vmem>>, vector<2x64xf32>,
    %142 = vector.extract_strided_slice %48 {offsets = [0, 31, 0], sizes = [2, 1, 64], strides = [1, 1, 1]} : vector<2x64x64xf32> to vector<2x1x64xf32>
    %143 = vector.shape_cast %142 : vector<2x1x64xf32> to vector<2x64xf32>
    %c0_72 = arith.constant 0 : index
    %c1984 = arith.constant 1984 : index
    %144 = vector.load %arg12[%c0_72, %c1984] : memref<2x4096xf32, #tpu.memory_space<vmem>>, vector<2x64xf32>
    tpu.vector_store %arg12[%c0_72, %c1984], %143 {strides = array<i32>} : memref<2x4096xf32, #tpu.memory_space<vmem>>, vector<2x64xf32>,
    %145 = vector.extract_strided_slice %48 {offsets = [0, 32, 0], sizes = [2, 1, 64], strides = [1, 1, 1]} : vector<2x64x64xf32> to vector<2x1x64xf32>
    %146 = vector.shape_cast %145 : vector<2x1x64xf32> to vector<2x64xf32>
    %c0_73 = arith.constant 0 : index
    %c2048 = arith.constant 2048 : index
    %147 = vector.load %arg12[%c0_73, %c2048] : memref<2x4096xf32, #tpu.memory_space<vmem>>, vector<2x64xf32>
    tpu.vector_store %arg12[%c0_73, %c2048], %146 {strides = array<i32>} : memref<2x4096xf32, #tpu.memory_space<vmem>>, vector<2x64xf32>,
    %148 = vector.extract_strided_slice %48 {offsets = [0, 33, 0], sizes = [2, 1, 64], strides = [1, 1, 1]} : vector<2x64x64xf32> to vector<2x1x64xf32>
    %149 = vector.shape_cast %148 : vector<2x1x64xf32> to vector<2x64xf32>
    %c0_74 = arith.constant 0 : index
    %c2112 = arith.constant 2112 : index
    %150 = vector.load %arg12[%c0_74, %c2112] : memref<2x4096xf32, #tpu.memory_space<vmem>>, vector<2x64xf32>
    tpu.vector_store %arg12[%c0_74, %c2112], %149 {strides = array<i32>} : memref<2x4096xf32, #tpu.memory_space<vmem>>, vector<2x64xf32>,
    %151 = vector.extract_strided_slice %48 {offsets = [0, 34, 0], sizes = [2, 1, 64], strides = [1, 1, 1]} : vector<2x64x64xf32> to vector<2x1x64xf32>
    %152 = vector.shape_cast %151 : vector<2x1x64xf32> to vector<2x64xf32>
    %c0_75 = arith.constant 0 : index
    %c2176 = arith.constant 2176 : index
    %153 = vector.load %arg12[%c0_75, %c2176] : memref<2x4096xf32, #tpu.memory_space<vmem>>, vector<2x64xf32>
    tpu.vector_store %arg12[%c0_75, %c2176], %152 {strides = array<i32>} : memref<2x4096xf32, #tpu.memory_space<vmem>>, vector<2x64xf32>,
    %154 = vector.extract_strided_slice %48 {offsets = [0, 35, 0], sizes = [2, 1, 64], strides = [1, 1, 1]} : vector<2x64x64xf32> to vector<2x1x64xf32>
    %155 = vector.shape_cast %154 : vector<2x1x64xf32> to vector<2x64xf32>
    %c0_76 = arith.constant 0 : index
    %c2240 = arith.constant 2240 : index
    %156 = vector.load %arg12[%c0_76, %c2240] : memref<2x4096xf32, #tpu.memory_space<vmem>>, vector<2x64xf32>
    tpu.vector_store %arg12[%c0_76, %c2240], %155 {strides = array<i32>} : memref<2x4096xf32, #tpu.memory_space<vmem>>, vector<2x64xf32>,
    %157 = vector.extract_strided_slice %48 {offsets = [0, 36, 0], sizes = [2, 1, 64], strides = [1, 1, 1]} : vector<2x64x64xf32> to vector<2x1x64xf32>
    %158 = vector.shape_cast %157 : vector<2x1x64xf32> to vector<2x64xf32>
    %c0_77 = arith.constant 0 : index
    %c2304 = arith.constant 2304 : index
    %159 = vector.load %arg12[%c0_77, %c2304] : memref<2x4096xf32, #tpu.memory_space<vmem>>, vector<2x64xf32>
    tpu.vector_store %arg12[%c0_77, %c2304], %158 {strides = array<i32>} : memref<2x4096xf32, #tpu.memory_space<vmem>>, vector<2x64xf32>,
    %160 = vector.extract_strided_slice %48 {offsets = [0, 37, 0], sizes = [2, 1, 64], strides = [1, 1, 1]} : vector<2x64x64xf32> to vector<2x1x64xf32>
    %161 = vector.shape_cast %160 : vector<2x1x64xf32> to vector<2x64xf32>
    %c0_78 = arith.constant 0 : index
    %c2368 = arith.constant 2368 : index
    %162 = vector.load %arg12[%c0_78, %c2368] : memref<2x4096xf32, #tpu.memory_space<vmem>>, vector<2x64xf32>
    tpu.vector_store %arg12[%c0_78, %c2368], %161 {strides = array<i32>} : memref<2x4096xf32, #tpu.memory_space<vmem>>, vector<2x64xf32>,
    %163 = vector.extract_strided_slice %48 {offsets = [0, 38, 0], sizes = [2, 1, 64], strides = [1, 1, 1]} : vector<2x64x64xf32> to vector<2x1x64xf32>
    %164 = vector.shape_cast %163 : vector<2x1x64xf32> to vector<2x64xf32>
    %c0_79 = arith.constant 0 : index
    %c2432 = arith.constant 2432 : index
    %165 = vector.load %arg12[%c0_79, %c2432] : memref<2x4096xf32, #tpu.memory_space<vmem>>, vector<2x64xf32>
    tpu.vector_store %arg12[%c0_79, %c2432], %164 {strides = array<i32>} : memref<2x4096xf32, #tpu.memory_space<vmem>>, vector<2x64xf32>,
    %166 = vector.extract_strided_slice %48 {offsets = [0, 39, 0], sizes = [2, 1, 64], strides = [1, 1, 1]} : vector<2x64x64xf32> to vector<2x1x64xf32>
    %167 = vector.shape_cast %166 : vector<2x1x64xf32> to vector<2x64xf32>
    %c0_80 = arith.constant 0 : index
    %c2496 = arith.constant 2496 : index
    %168 = vector.load %arg12[%c0_80, %c2496] : memref<2x4096xf32, #tpu.memory_space<vmem>>, vector<2x64xf32>
    tpu.vector_store %arg12[%c0_80, %c2496], %167 {strides = array<i32>} : memref<2x4096xf32, #tpu.memory_space<vmem>>, vector<2x64xf32>,
    %169 = vector.extract_strided_slice %48 {offsets = [0, 40, 0], sizes = [2, 1, 64], strides = [1, 1, 1]} : vector<2x64x64xf32> to vector<2x1x64xf32>
    %170 = vector.shape_cast %169 : vector<2x1x64xf32> to vector<2x64xf32>
    %c0_81 = arith.constant 0 : index
    %c2560 = arith.constant 2560 : index
    %171 = vector.load %arg12[%c0_81, %c2560] : memref<2x4096xf32, #tpu.memory_space<vmem>>, vector<2x64xf32>
    tpu.vector_store %arg12[%c0_81, %c2560], %170 {strides = array<i32>} : memref<2x4096xf32, #tpu.memory_space<vmem>>, vector<2x64xf32>,
    %172 = vector.extract_strided_slice %48 {offsets = [0, 41, 0], sizes = [2, 1, 64], strides = [1, 1, 1]} : vector<2x64x64xf32> to vector<2x1x64xf32>
    %173 = vector.shape_cast %172 : vector<2x1x64xf32> to vector<2x64xf32>
    %c0_82 = arith.constant 0 : index
    %c2624 = arith.constant 2624 : index
    %174 = vector.load %arg12[%c0_82, %c2624] : memref<2x4096xf32, #tpu.memory_space<vmem>>, vector<2x64xf32>
    tpu.vector_store %arg12[%c0_82, %c2624], %173 {strides = array<i32>} : memref<2x4096xf32, #tpu.memory_space<vmem>>, vector<2x64xf32>,
    %175 = vector.extract_strided_slice %48 {offsets = [0, 42, 0], sizes = [2, 1, 64], strides = [1, 1, 1]} : vector<2x64x64xf32> to vector<2x1x64xf32>
    %176 = vector.shape_cast %175 : vector<2x1x64xf32> to vector<2x64xf32>
    %c0_83 = arith.constant 0 : index
    %c2688 = arith.constant 2688 : index
    %177 = vector.load %arg12[%c0_83, %c2688] : memref<2x4096xf32, #tpu.memory_space<vmem>>, vector<2x64xf32>
    tpu.vector_store %arg12[%c0_83, %c2688], %176 {strides = array<i32>} : memref<2x4096xf32, #tpu.memory_space<vmem>>, vector<2x64xf32>,
    %178 = vector.extract_strided_slice %48 {offsets = [0, 43, 0], sizes = [2, 1, 64], strides = [1, 1, 1]} : vector<2x64x64xf32> to vector<2x1x64xf32>
    %179 = vector.shape_cast %178 : vector<2x1x64xf32> to vector<2x64xf32>
    %c0_84 = arith.constant 0 : index
    %c2752 = arith.constant 2752 : index
    %180 = vector.load %arg12[%c0_84, %c2752] : memref<2x4096xf32, #tpu.memory_space<vmem>>, vector<2x64xf32>
    tpu.vector_store %arg12[%c0_84, %c2752], %179 {strides = array<i32>} : memref<2x4096xf32, #tpu.memory_space<vmem>>, vector<2x64xf32>,
    %181 = vector.extract_strided_slice %48 {offsets = [0, 44, 0], sizes = [2, 1, 64], strides = [1, 1, 1]} : vector<2x64x64xf32> to vector<2x1x64xf32>
    %182 = vector.shape_cast %181 : vector<2x1x64xf32> to vector<2x64xf32>
    %c0_85 = arith.constant 0 : index
    %c2816 = arith.constant 2816 : index
    %183 = vector.load %arg12[%c0_85, %c2816] : memref<2x4096xf32, #tpu.memory_space<vmem>>, vector<2x64xf32>
    tpu.vector_store %arg12[%c0_85, %c2816], %182 {strides = array<i32>} : memref<2x4096xf32, #tpu.memory_space<vmem>>, vector<2x64xf32>,
    %184 = vector.extract_strided_slice %48 {offsets = [0, 45, 0], sizes = [2, 1, 64], strides = [1, 1, 1]} : vector<2x64x64xf32> to vector<2x1x64xf32>
    %185 = vector.shape_cast %184 : vector<2x1x64xf32> to vector<2x64xf32>
    %c0_86 = arith.constant 0 : index
    %c2880 = arith.constant 2880 : index
    %186 = vector.load %arg12[%c0_86, %c2880] : memref<2x4096xf32, #tpu.memory_space<vmem>>, vector<2x64xf32>
    tpu.vector_store %arg12[%c0_86, %c2880], %185 {strides = array<i32>} : memref<2x4096xf32, #tpu.memory_space<vmem>>, vector<2x64xf32>,
    %187 = vector.extract_strided_slice %48 {offsets = [0, 46, 0], sizes = [2, 1, 64], strides = [1, 1, 1]} : vector<2x64x64xf32> to vector<2x1x64xf32>
    %188 = vector.shape_cast %187 : vector<2x1x64xf32> to vector<2x64xf32>
    %c0_87 = arith.constant 0 : index
    %c2944 = arith.constant 2944 : index
    %189 = vector.load %arg12[%c0_87, %c2944] : memref<2x4096xf32, #tpu.memory_space<vmem>>, vector<2x64xf32>
    tpu.vector_store %arg12[%c0_87, %c2944], %188 {strides = array<i32>} : memref<2x4096xf32, #tpu.memory_space<vmem>>, vector<2x64xf32>,
    %190 = vector.extract_strided_slice %48 {offsets = [0, 47, 0], sizes = [2, 1, 64], strides = [1, 1, 1]} : vector<2x64x64xf32> to vector<2x1x64xf32>
    %191 = vector.shape_cast %190 : vector<2x1x64xf32> to vector<2x64xf32>
    %c0_88 = arith.constant 0 : index
    %c3008 = arith.constant 3008 : index
    %192 = vector.load %arg12[%c0_88, %c3008] : memref<2x4096xf32, #tpu.memory_space<vmem>>, vector<2x64xf32>
    tpu.vector_store %arg12[%c0_88, %c3008], %191 {strides = array<i32>} : memref<2x4096xf32, #tpu.memory_space<vmem>>, vector<2x64xf32>,
    %193 = vector.extract_strided_slice %48 {offsets = [0, 48, 0], sizes = [2, 1, 64], strides = [1, 1, 1]} : vector<2x64x64xf32> to vector<2x1x64xf32>
    %194 = vector.shape_cast %193 : vector<2x1x64xf32> to vector<2x64xf32>
    %c0_89 = arith.constant 0 : index
    %c3072 = arith.constant 3072 : index
    %195 = vector.load %arg12[%c0_89, %c3072] : memref<2x4096xf32, #tpu.memory_space<vmem>>, vector<2x64xf32>
    tpu.vector_store %arg12[%c0_89, %c3072], %194 {strides = array<i32>} : memref<2x4096xf32, #tpu.memory_space<vmem>>, vector<2x64xf32>,
    %196 = vector.extract_strided_slice %48 {offsets = [0, 49, 0], sizes = [2, 1, 64], strides = [1, 1, 1]} : vector<2x64x64xf32> to vector<2x1x64xf32>
    %197 = vector.shape_cast %196 : vector<2x1x64xf32> to vector<2x64xf32>
    %c0_90 = arith.constant 0 : index
    %c3136 = arith.constant 3136 : index
    %198 = vector.load %arg12[%c0_90, %c3136] : memref<2x4096xf32, #tpu.memory_space<vmem>>, vector<2x64xf32>
    tpu.vector_store %arg12[%c0_90, %c3136], %197 {strides = array<i32>} : memref<2x4096xf32, #tpu.memory_space<vmem>>, vector<2x64xf32>,
    %199 = vector.extract_strided_slice %48 {offsets = [0, 50, 0], sizes = [2, 1, 64], strides = [1, 1, 1]} : vector<2x64x64xf32> to vector<2x1x64xf32>
    %200 = vector.shape_cast %199 : vector<2x1x64xf32> to vector<2x64xf32>
    %c0_91 = arith.constant 0 : index
    %c3200 = arith.constant 3200 : index
    %201 = vector.load %arg12[%c0_91, %c3200] : memref<2x4096xf32, #tpu.memory_space<vmem>>, vector<2x64xf32>
    tpu.vector_store %arg12[%c0_91, %c3200], %200 {strides = array<i32>} : memref<2x4096xf32, #tpu.memory_space<vmem>>, vector<2x64xf32>,
    %202 = vector.extract_strided_slice %48 {offsets = [0, 51, 0], sizes = [2, 1, 64], strides = [1, 1, 1]} : vector<2x64x64xf32> to vector<2x1x64xf32>
    %203 = vector.shape_cast %202 : vector<2x1x64xf32> to vector<2x64xf32>
    %c0_92 = arith.constant 0 : index
    %c3264 = arith.constant 3264 : index
    %204 = vector.load %arg12[%c0_92, %c3264] : memref<2x4096xf32, #tpu.memory_space<vmem>>, vector<2x64xf32>
    tpu.vector_store %arg12[%c0_92, %c3264], %203 {strides = array<i32>} : memref<2x4096xf32, #tpu.memory_space<vmem>>, vector<2x64xf32>,
    %205 = vector.extract_strided_slice %48 {offsets = [0, 52, 0], sizes = [2, 1, 64], strides = [1, 1, 1]} : vector<2x64x64xf32> to vector<2x1x64xf32>
    %206 = vector.shape_cast %205 : vector<2x1x64xf32> to vector<2x64xf32>
    %c0_93 = arith.constant 0 : index
    %c3328 = arith.constant 3328 : index
    %207 = vector.load %arg12[%c0_93, %c3328] : memref<2x4096xf32, #tpu.memory_space<vmem>>, vector<2x64xf32>
    tpu.vector_store %arg12[%c0_93, %c3328], %206 {strides = array<i32>} : memref<2x4096xf32, #tpu.memory_space<vmem>>, vector<2x64xf32>,
    %208 = vector.extract_strided_slice %48 {offsets = [0, 53, 0], sizes = [2, 1, 64], strides = [1, 1, 1]} : vector<2x64x64xf32> to vector<2x1x64xf32>
    %209 = vector.shape_cast %208 : vector<2x1x64xf32> to vector<2x64xf32>
    %c0_94 = arith.constant 0 : index
    %c3392 = arith.constant 3392 : index
    %210 = vector.load %arg12[%c0_94, %c3392] : memref<2x4096xf32, #tpu.memory_space<vmem>>, vector<2x64xf32>
    tpu.vector_store %arg12[%c0_94, %c3392], %209 {strides = array<i32>} : memref<2x4096xf32, #tpu.memory_space<vmem>>, vector<2x64xf32>,
    %211 = vector.extract_strided_slice %48 {offsets = [0, 54, 0], sizes = [2, 1, 64], strides = [1, 1, 1]} : vector<2x64x64xf32> to vector<2x1x64xf32>
    %212 = vector.shape_cast %211 : vector<2x1x64xf32> to vector<2x64xf32>
    %c0_95 = arith.constant 0 : index
    %c3456 = arith.constant 3456 : index
    %213 = vector.load %arg12[%c0_95, %c3456] : memref<2x4096xf32, #tpu.memory_space<vmem>>, vector<2x64xf32>
    tpu.vector_store %arg12[%c0_95, %c3456], %212 {strides = array<i32>} : memref<2x4096xf32, #tpu.memory_space<vmem>>, vector<2x64xf32>,
    %214 = vector.extract_strided_slice %48 {offsets = [0, 55, 0], sizes = [2, 1, 64], strides = [1, 1, 1]} : vector<2x64x64xf32> to vector<2x1x64xf32>
    %215 = vector.shape_cast %214 : vector<2x1x64xf32> to vector<2x64xf32>
    %c0_96 = arith.constant 0 : index
    %c3520 = arith.constant 3520 : index
    %216 = vector.load %arg12[%c0_96, %c3520] : memref<2x4096xf32, #tpu.memory_space<vmem>>, vector<2x64xf32>
    tpu.vector_store %arg12[%c0_96, %c3520], %215 {strides = array<i32>} : memref<2x4096xf32, #tpu.memory_space<vmem>>, vector<2x64xf32>,
    %217 = vector.extract_strided_slice %48 {offsets = [0, 56, 0], sizes = [2, 1, 64], strides = [1, 1, 1]} : vector<2x64x64xf32> to vector<2x1x64xf32>
    %218 = vector.shape_cast %217 : vector<2x1x64xf32> to vector<2x64xf32>
    %c0_97 = arith.constant 0 : index
    %c3584 = arith.constant 3584 : index
    %219 = vector.load %arg12[%c0_97, %c3584] : memref<2x4096xf32, #tpu.memory_space<vmem>>, vector<2x64xf32>
    tpu.vector_store %arg12[%c0_97, %c3584], %218 {strides = array<i32>} : memref<2x4096xf32, #tpu.memory_space<vmem>>, vector<2x64xf32>,
    %220 = vector.extract_strided_slice %48 {offsets = [0, 57, 0], sizes = [2, 1, 64], strides = [1, 1, 1]} : vector<2x64x64xf32> to vector<2x1x64xf32>
    %221 = vector.shape_cast %220 : vector<2x1x64xf32> to vector<2x64xf32>
    %c0_98 = arith.constant 0 : index
    %c3648 = arith.constant 3648 : index
    %222 = vector.load %arg12[%c0_98, %c3648] : memref<2x4096xf32, #tpu.memory_space<vmem>>, vector<2x64xf32>
    tpu.vector_store %arg12[%c0_98, %c3648], %221 {strides = array<i32>} : memref<2x4096xf32, #tpu.memory_space<vmem>>, vector<2x64xf32>,
    %223 = vector.extract_strided_slice %48 {offsets = [0, 58, 0], sizes = [2, 1, 64], strides = [1, 1, 1]} : vector<2x64x64xf32> to vector<2x1x64xf32>
    %224 = vector.shape_cast %223 : vector<2x1x64xf32> to vector<2x64xf32>
    %c0_99 = arith.constant 0 : index
    %c3712 = arith.constant 3712 : index
    %225 = vector.load %arg12[%c0_99, %c3712] : memref<2x4096xf32, #tpu.memory_space<vmem>>, vector<2x64xf32>
    tpu.vector_store %arg12[%c0_99, %c3712], %224 {strides = array<i32>} : memref<2x4096xf32, #tpu.memory_space<vmem>>, vector<2x64xf32>,
    %226 = vector.extract_strided_slice %48 {offsets = [0, 59, 0], sizes = [2, 1, 64], strides = [1, 1, 1]} : vector<2x64x64xf32> to vector<2x1x64xf32>
    %227 = vector.shape_cast %226 : vector<2x1x64xf32> to vector<2x64xf32>
    %c0_100 = arith.constant 0 : index
    %c3776 = arith.constant 3776 : index
    %228 = vector.load %arg12[%c0_100, %c3776] : memref<2x4096xf32, #tpu.memory_space<vmem>>, vector<2x64xf32>
    tpu.vector_store %arg12[%c0_100, %c3776], %227 {strides = array<i32>} : memref<2x4096xf32, #tpu.memory_space<vmem>>, vector<2x64xf32>,
    %229 = vector.extract_strided_slice %48 {offsets = [0, 60, 0], sizes = [2, 1, 64], strides = [1, 1, 1]} : vector<2x64x64xf32> to vector<2x1x64xf32>
    %230 = vector.shape_cast %229 : vector<2x1x64xf32> to vector<2x64xf32>
    %c0_101 = arith.constant 0 : index
    %c3840 = arith.constant 3840 : index
    %231 = vector.load %arg12[%c0_101, %c3840] : memref<2x4096xf32, #tpu.memory_space<vmem>>, vector<2x64xf32>
    tpu.vector_store %arg12[%c0_101, %c3840], %230 {strides = array<i32>} : memref<2x4096xf32, #tpu.memory_space<vmem>>, vector<2x64xf32>,
    %232 = vector.extract_strided_slice %48 {offsets = [0, 61, 0], sizes = [2, 1, 64], strides = [1, 1, 1]} : vector<2x64x64xf32> to vector<2x1x64xf32>
    %233 = vector.shape_cast %232 : vector<2x1x64xf32> to vector<2x64xf32>
    %c0_102 = arith.constant 0 : index
    %c3904 = arith.constant 3904 : index
    %234 = vector.load %arg12[%c0_102, %c3904] : memref<2x4096xf32, #tpu.memory_space<vmem>>, vector<2x64xf32>
    tpu.vector_store %arg12[%c0_102, %c3904], %233 {strides = array<i32>} : memref<2x4096xf32, #tpu.memory_space<vmem>>, vector<2x64xf32>,
    %235 = vector.extract_strided_slice %48 {offsets = [0, 62, 0], sizes = [2, 1, 64], strides = [1, 1, 1]} : vector<2x64x64xf32> to vector<2x1x64xf32>
    %236 = vector.shape_cast %235 : vector<2x1x64xf32> to vector<2x64xf32>
    %c0_103 = arith.constant 0 : index
    %c3968 = arith.constant 3968 : index
    %237 = vector.load %arg12[%c0_103, %c3968] : memref<2x4096xf32, #tpu.memory_space<vmem>>, vector<2x64xf32>
    tpu.vector_store %arg12[%c0_103, %c3968], %236 {strides = array<i32>} : memref<2x4096xf32, #tpu.memory_space<vmem>>, vector<2x64xf32>,
    %238 = vector.extract_strided_slice %48 {offsets = [0, 63, 0], sizes = [2, 1, 64], strides = [1, 1, 1]} : vector<2x64x64xf32> to vector<2x1x64xf32>
    %239 = vector.shape_cast %238 : vector<2x1x64xf32> to vector<2x64xf32>
    %c0_104 = arith.constant 0 : index
    %c4032 = arith.constant 4032 : index
    %240 = vector.load %arg12[%c0_104, %c4032] : memref<2x4096xf32, #tpu.memory_space<vmem>>, vector<2x64xf32>
    tpu.vector_store %arg12[%c0_104, %c4032], %239 {strides = array<i32>} : memref<2x4096xf32, #tpu.memory_space<vmem>>, vector<2x64xf32>,
    %c0_105 = arith.constant 0 : index
    %c0_106 = arith.constant 0 : index
    %241 = vector.load %arg12[%c0_105, %c0_106] : memref<2x4096xf32, #tpu.memory_space<vmem>>, vector<2x4096xf32>
    %c0_107 = arith.constant 0 : index
    %c0_108 = arith.constant 0 : index
    %242 = vector.load %arg5[%c0_107, %c0_108] : memref<4096x128xf32, #tpu.memory_space<vmem>>, vector<4096x128xf32>
    %cst_109 = arith.constant dense<0.000000e+00> : vector<2x128xf32>
    %243 = tpu.matmul %241, %242, %cst_109 {dimension_numbers = #tpu.dot_dimension_numbers<[1], [0], [0], [1], [0, 0, 1, 1], [], []>} : vector<2x4096xf32>, vector<4096x128xf32>, vector<2x128xf32> -> vector<2x128xf32>
    %c0_110 = arith.constant 0 : index
    %c0_111 = arith.constant 0 : index
    %244 = vector.load %arg6[%c0_110, %c0_111] : memref<1x128xf32, #tpu.memory_space<vmem>>, vector<1x128xf32>
    %245 = vector.broadcast %244 : vector<1x128xf32> to vector<2x128xf32>
    %246 = arith.addf %243, %245 : vector<2x128xf32>
    %cst_112 = arith.constant 0.000000e+00 : f32
    %247 = vector.broadcast %cst_112 : f32 to vector<2x128xf32>
    %248 = arith.maximumf %246, %247 : vector<2x128xf32>
    %c0_113 = arith.constant 0 : index
    %c0_114 = arith.constant 0 : index
    %249 = vector.load %arg7[%c0_113, %c0_114] : memref<128x128xf32, #tpu.memory_space<vmem>>, vector<128x128xf32>
    %cst_115 = arith.constant dense<0.000000e+00> : vector<2x128xf32>
    %250 = tpu.matmul %248, %249, %cst_115 {dimension_numbers = #tpu.dot_dimension_numbers<[1], [0], [0], [1], [0, 0, 1, 1], [], []>} : vector<2x128xf32>, vector<128x128xf32>, vector<2x128xf32> -> vector<2x128xf32>
    %c0_116 = arith.constant 0 : index
    %c0_117 = arith.constant 0 : index
    %251 = vector.load %arg8[%c0_116, %c0_117] : memref<1x128xf32, #tpu.memory_space<vmem>>, vector<1x128xf32>
    %252 = vector.broadcast %251 : vector<1x128xf32> to vector<2x128xf32>
    %253 = arith.addf %250, %252 : vector<2x128xf32>
    %c0_118 = arith.constant 0 : index
    %c0_119 = arith.constant 0 : index
    %254 = vector.load %arg9[%c0_118, %c0_119] : memref<2x128xf32, #tpu.memory_space<vmem>>, vector<2x128xf32>
    tpu.vector_store %arg9[%c0_118, %c0_119], %253 {strides = array<i32>} : memref<2x128xf32, #tpu.memory_space<vmem>>, vector<2x128xf32>,
    return
  }
}

</mosaic_0001>

<bundles_post_ra>
// kernel: bot_action_network_cnn_forward.1
= control target key start
LH: loop header
LB: loop body
LE: loop exit
PB: predicated region body
PF: predicated region fallthrough
CT: control target
= control target key end

     0   :  { %14 = vsyncpa [#allocation6], 0  ;;  %s7164_s0 = inlined_call_operand.vmem [shape: f32[128,27], index: 0, kind: input, shape index: {}]   ;;  %s7165_s1 = inlined_call_operand.hbm [shape: f32[27,32], index: 1, kind: input, shape index: {}]   ;;  %s7166_s2 = inlined_call_operand.hbm [shape: f32[1,32], index: 2, kind: input, shape index: {}]   ;;  %s7167_s3 = inlined_call_operand.vmem [shape: f32[288,64], index: 3, kind: input, shape index: {}]   ;;  %s7168_s4 = inlined_call_operand.hbm [shape: f32[1,64], index: 4, kind: input, shape index: {}]   ;;  %s7169_s5 = inlined_call_operand.hbm [shape: f32[4096,128], index: 5, kind: input, shape index: {}]   ;;  %s7170_s6 = inlined_call_operand.hbm [shape: f32[1,128], index: 6, kind: input, shape index: {}]   ;;  %s7171_s7 = inlined_call_operand.hbm [shape: f32[128,128], index: 7, kind: input, shape index: {}]   ;;  %s7172_s8 = inlined_call_operand.hbm [shape: f32[1,128], index: 8, kind: input, shape index: {}]   ;;  %s7173_s9 = inlined_call_operand.hbm [shape: f32[2,128], index: 9, kind: output, shape index: {}]  }
   0x1   :  { %15 = vsyncpa [#allocation9], 0 }
   0x2   :  { %16 = vsyncpa [#allocation12], 0 }
   0x3   :  { %17 = vsyncpa [#allocation15], 0 }
   0x4   :  { %18 = vsyncpa [#allocation7], 0  ;;  %s5432_s30 = smov [#allocation8]  }
   0x5   :  { %s39_s10 = sshll.u32 %s5432_s30, 4  ;;  %s40_s10 = int_to_ptr.vmem [resolvable:$true] %s39_s10 }
   0x6   :  { %s5270_s11 = scalar_lea.vmem %s40_s10, 16  ;;  %s5274_s12 = scalar_lea.vmem %s40_s10, 32 }
   0x7   :  { %p5271_p0 = scmp.ne.s32.totalorder %s40_s10, %s5270_s11  ;;  %p5275_p1 = scmp.lt.s32.totalorder %s40_s10, %s40_s10 }
   0x8   :  { %p5276_p2 = scmp.lt.s32.totalorder %s5274_s12, %s5270_s11 }
   0xa   :  { %p5277_p3 = por %p5276_p2, %p5275_p1 }
   0xc   :  { %p5278_p4 = pnand %p5277_p3, %p5271_p0 }
   0xe   :  { %5281 = shalt.err (!%p5278_p4)
}
   0xf   :  { %42 = dma.hbm_to_vmem [thread:$0]  %s7166_s2, 16, %s40_s10, [#allocation9]  }
  0x10   :  { %s5433_s15 = smov [#allocation11]   ;;  %s5434_s17 = smov [#allocation14]  }
  0x11   :  { %s60_s16 = sshll.u32 %s5433_s15, 4  ;;  %s82_s18 = sshll.u32 %s5434_s17, 4  ;;  %s61_s16 = int_to_ptr.vmem [resolvable:$true] %s60_s16  ;;  %s83_s18 = int_to_ptr.vmem [resolvable:$true] %s82_s18 }
  0x12   :  { %s5290_s19 = scalar_lea.vmem %s61_s16, 65536  ;;  %p5295_p6 = scmp.lt.s32.totalorder %s61_s16, %s61_s16 }
  0x13   :  { %p5291_p5 = scmp.ne.s32.totalorder %s61_s16, %s5290_s19  ;;  %p5296_p7 = scmp.lt.s32.totalorder %s5290_s19, %s5290_s19 }
  0x15   :  { %p5297_p8 = por %p5296_p7, %p5295_p6 }
  0x17   :  { %p5298_p9 = pnand %p5297_p8, %p5291_p5 }
  0x19   :  { %5301 = shalt.err (!%p5298_p9)
}
  0x1a   :  { %s5435_s20 = smov 128   ;;  %s5436_s21 = smov 8  }
  0x1b   :  { %66 = dma.hbm_to_vmem [thread:$0]  %s7169_s5, 65536, %s61_s16, [#allocation12], %s5435_s20, %s5435_s20, %s5436_s21  }
  0x1c   :  { %s5310_s2 = scalar_lea.vmem %s83_s18, 2048  ;;  %p5315_p11 = scmp.lt.s32.totalorder %s83_s18, %s83_s18 }
  0x1d   :  { %p5311_p10 = scmp.ne.s32.totalorder %s83_s18, %s5310_s2  ;;  %p5316_p12 = scmp.lt.s32.totalorder %s5310_s2, %s5310_s2 }
  0x1f   :  { %p5317_p13 = por %p5316_p12, %p5315_p11 }
  0x21   :  { %p5318_p0 = pnand %p5317_p13, %p5311_p10 }
  0x23   :  { %5321 = shalt.err (!%p5318_p0)
}
  0x24   :  { %88 = dma.hbm_to_vmem [thread:$0]  %s7171_s7, 2048, %s83_s18, [#allocation15], %s5435_s20, %s5435_s20, %s5436_s21  }
  0x25   :  { %s5437_s26 = smov [#allocation5]   ;;  %s5438_s28 = smov [#allocation10]  }
  0x26   :  { %s26_s27 = sshll.u32 %s5437_s26, 4  ;;  %s51_s29 = sshll.u32 %s5438_s28, 4  ;;  %s27_s27 = int_to_ptr.vmem [resolvable:$true] %s26_s27  ;;  %s52_s29 = int_to_ptr.vmem [resolvable:$true] %s51_s29 }
  0x27   :  { %s5330_s30 = scalar_lea.vmem %s27_s27, 512  ;;  %p5335_p2 = scmp.lt.s32.totalorder %s27_s27, %s27_s27 }
  0x28   :  { %p5331_p1 = scmp.ne.s32.totalorder %s27_s27, %s5330_s30  ;;  %p5336_p3 = scmp.lt.s32.totalorder %s5330_s30, %s5330_s30 }
  0x2a   :  { %p5337_p4 = por %p5336_p3, %p5335_p2 }
  0x2c   :  { %p5338_p5 = pnand %p5337_p4, %p5331_p1 }
  0x2e   :  { %5341 = shalt.err (!%p5338_p5)
}
  0x2f   :  { %32 = dma.hbm_to_vmem [thread:$0]  %s7165_s1, 512, %s27_s27, [#allocation6], %s5435_s20, %s5435_s20, %s5436_s21  }
  0x30   :  { %s5350_s11 = scalar_lea.vmem %s52_s29, 16  ;;  %s5354_s7 = scalar_lea.vmem %s52_s29, 32 }
  0x31   :  { %p5351_p6 = scmp.ne.s32.totalorder %s52_s29, %s5350_s11  ;;  %p5355_p7 = scmp.lt.s32.totalorder %s52_s29, %s52_s29 }
  0x32   :  { %p5356_p8 = scmp.lt.s32.totalorder %s5354_s7, %s5350_s11 }
  0x34   :  { %p5357_p9 = por %p5356_p8, %p5355_p7 }
  0x36   :  { %p5358_p10 = pnand %p5357_p9, %p5351_p6 }
  0x38   :  { %5361 = shalt.err (!%p5358_p10)
}
  0x39   :  { %54 = dma.hbm_to_vmem [thread:$0]  %s7168_s4, 16, %s52_s29, [#allocation9]  }
  0x3a   :  { %s5439_s14 = smov [#allocation13]   ;;  %s5440_s16 = smov [#allocation16]  }
  0x3b   :  { %s73_s15 = sshll.u32 %s5439_s14, 4  ;;  %s95_s17 = sshll.u32 %s5440_s16, 4  ;;  %s74_s15 = int_to_ptr.vmem [resolvable:$true] %s73_s15  ;;  %s96_s17 = int_to_ptr.vmem [resolvable:$true] %s95_s17 }
  0x3c   :  { %s5370_s18 = scalar_lea.vmem %s74_s15, 16  ;;  %s5374_s1 = scalar_lea.vmem %s74_s15, 32 }
  0x3d   :  { %p5371_p11 = scmp.ne.s32.totalorder %s74_s15, %s5370_s18  ;;  %p5375_p12 = scmp.lt.s32.totalorder %s74_s15, %s74_s15 }
  0x3e   :  { %p5376_p13 = scmp.lt.s32.totalorder %s5374_s1, %s5370_s18 }
  0x40   :  { %p5377_p0 = por %p5376_p13, %p5375_p12 }
  0x42   :  { %p5378_p1 = pnand %p5377_p0, %p5371_p11 }
  0x44   :  { %5381 = shalt.err (!%p5378_p1)
}
  0x45   :  { %76 = dma.hbm_to_vmem [thread:$0]  %s7170_s6, 16, %s74_s15, [#allocation12]  }
  0x46   :  { %s5390_s21 = scalar_lea.vmem %s96_s17, 16  ;;  %s5394_s4 = scalar_lea.vmem %s96_s17, 32 }
  0x47   :  { %p5391_p2 = scmp.ne.s32.totalorder %s96_s17, %s5390_s21  ;;  %p5395_p3 = scmp.lt.s32.totalorder %s96_s17, %s96_s17 }
  0x48   :  { %p5396_p4 = scmp.lt.s32.totalorder %s5394_s4, %s5390_s21 }
  0x4a   :  { %p5397_p5 = por %p5396_p4, %p5395_p3 }
  0x4c   :  { %p5398_p6 = pnand %p5397_p5, %p5391_p2 }
  0x4e   :  { %5401 = shalt.err (!%p5398_p6)
}
  0x4f   :  { %98 = dma.hbm_to_vmem [thread:$0]  %s7172_s8, 16, %s96_s17, [#allocation15]  }
  0x50   :  { %5422 = dma.done.wait [#allocation6], 512  }
  0x51   :  { %5423 = vsyncadd [#allocation6], 4294966784 }
  0x52   :  { %5424 = dma.done.wait [#allocation9], 32  }
  0x53   :  { %5425 = vsyncadd [#allocation9], 4294967264 }
  0x54   :  { %5426 = dma.done.wait [#allocation12], 65552  }
  0x55   :  { %5427 = vsyncadd [#allocation12], 4294901744 }
  0x56   :  { %5428 = dma.done.wait [#allocation15], 2064  }
  0x57   :  { %5429 = vsyncadd [#allocation15], 4294965232  ;;  %vm361_vm0 = vcmask 261120   ;;  %v7174_v0 = vmov 0.0   ;;  %vm196_vm1 = vcmask 1042432   ;;  %vm147_vm2 = vcmask 220160  }
  0x58   :  { %381 = vst.msk [vmem:[#allocation2 + $0x90] sm:$0xff] %vm361_vm0, %v7174_v0  ;;  %362 = vst.msk [vmem:[#allocation2] sm:$0xff] %vm361_vm0, %v7174_v0  ;;  %v139_v1 = vld [vmem:[#allocation5 + $0x18] sm:$0x7]  ;;  %v138_v2 = vld [vmem:[#allocation5 + $0x10] sm:$0xff]  ;;  %s5442_s27 = smov 64  }
  0x59   :  { %365 = vst.msk [vmem:[#allocation2 + $0x10] sm:$0xff] %vm361_vm0, %v7174_v0  ;;  %367 = vst.msk [vmem:[#allocation2 + $0x20] sm:$0xff] %vm361_vm0, %v7174_v0  ;;  %5140 = vmatprep.subr.msk.mxu0 %vm196_vm1, %v139_v1  ;;  %v120_v3 = vld [vmem:[%s7164_s0] sm:$0xff]  ;;  %v137_v4 = vld [vmem:[#allocation5 + $0x8] sm:$0xff]  ;;  %vm363_vm3 = vcmask 254976   ;;  %vm508_vm4 = vcmask 1046528  }
  0x5a   :  { %369 = vst.msk [vmem:[#allocation2 + $0x30] sm:$0xff] %vm361_vm0, %v7174_v0  ;;  %371 = vst.msk [vmem:[#allocation2 + $0x40] sm:$0xff] %vm361_vm0, %v7174_v0  ;;  %5141 = vmatpush3.msk.msra.mxu0 %vm196_vm1, %v139_v1  ;;  %5148 = vmatprep.mubr.msk.f32.mxu0 %vm147_vm2, %v120_v3  ;;  %v136_v5 = vld [vmem:[#allocation5] sm:$0xff]  ;;  %v121_v6 = vld [vmem:[%s7164_s0 + $0x8] sm:$0xff]  ;;  %vm622_vm5 = vcmask 1045504   ;;  %s5444_s26 = smov 96  }
  0x5b   :  { %373 = vst.msk [vmem:[#allocation2 + $0x50] sm:$0xff] %vm361_vm0, %v7174_v0  ;;  %375 = vst.msk [vmem:[#allocation2 + $0x60] sm:$0xff] %vm361_vm0, %v7174_v0  ;;  %5142 = vmatprep.subr.mxu0 %v138_v2  ;;  %v122_v8 = vld [vmem:[%s7164_s0 + $0x10] sm:$0xff]  ;;  %v123_v9 = vld [vmem:[%s7164_s0 + $0x18] sm:$0xff]  ;;  %vm605_vm6 = vcmask 523520   ;;  %vm719_vm7 = vcmask 785920  }
  0x5c   :  { %377 = vst.msk [vmem:[#allocation2 + $0x70] sm:$0xff] %vm361_vm0, %v7174_v0  ;;  %379 = vst.msk [vmem:[#allocation2 + $0x80] sm:$0xff] %vm361_vm0, %v7174_v0  ;;  %5143 = vmatpush3.msra.mxu0 %v138_v2  ;;  %v124_v10 = vld [vmem:[%s7164_s0 + $0x20] sm:$0xff]  ;;  %v125_v11 = vld [vmem:[%s7164_s0 + $0x28] sm:$0xff]  ;;  %vm786_vm8 = vcmask 1048320   ;;  %vm1555_vm9 = vcmask 1041409  }
  0x5d   :  { %383 = vst.msk [vmem:[#allocation2 + $0xa0] sm:$0xff] %vm361_vm0, %v7174_v0  ;;  %385 = vst.msk [vmem:[#allocation2 + $0xb0] sm:$0xff] %vm361_vm0, %v7174_v0  ;;  %5144 = vmatprep.subr.mxu0 %v137_v4  ;;  %v126_v12 = vld [vmem:[%s7164_s0 + $0x30] sm:$0xff]  ;;  %v127_v13 = vld [vmem:[%s7164_s0 + $0x38] sm:$0xff]  ;;  %vm1557_vm10 = vcmask 1043459   ;;  %vm1559_vm11 = vcmask 1045509  }
  0x5e   :  { %387 = vst.msk [vmem:[#allocation2 + $0xc0] sm:$0xff] %vm361_vm0, %v7174_v0  ;;  %389 = vst.msk [vmem:[#allocation2 + $0xd0] sm:$0xff] %vm361_vm0, %v7174_v0  ;;  %5145 = vmatpush3.msra.mxu0 %v137_v4  ;;  %v128_v14 = vld [vmem:[%s7164_s0 + $0x40] sm:$0xff]  ;;  %v129_v15 = vld [vmem:[%s7164_s0 + $0x48] sm:$0xff]  ;;  %vm1561_vm12 = vcmask 1047559   ;;  %vm1564_vm13 = vcmask 517120  }
  0x5f   :  { %391 = vst.msk [vmem:[#allocation2 + $0xe0] sm:$0xff] %vm361_vm0, %v7174_v0  ;;  %393 = vst.msk [vmem:[#allocation2 + $0xf0] sm:$0xff] %vm361_vm0, %v7174_v0  ;;  %v5566_v7 = vld [vmem:[#allocation2 + $0x90] sm:$0xff]  ;;  %5146 = vmatprep.subr.mxu0 %v136_v5  ;;  %v131_v17 = vld [vmem:[%s7164_s0 + $0x58] sm:$0xff]  ;;  %vm1576_vm14 = vcmask 1041920   ;;  %vm5446_vm15 = vmmov 0  }
  0x60   :  { %395 = vst.msk [vmem:[#allocation2 + $0x100] sm:$0xff] %vm361_vm0, %v7174_v0  ;;  %397 = vst.msk [vmem:[#allocation2 + $0x110] sm:$0xff] %vm361_vm0, %v7174_v0  ;;  %929 = vrot.lane.b32.xlu0 %v5566_v7, %s5442_s27  ;;  %5147 = vmatpush3.msra.mxu0 %v136_v5  ;;  %v130_v16 = vld [vmem:[%s7164_s0 + $0x50] sm:$0xff]  ;;  %v132_v18 = vld [vmem:[%s7164_s0 + $0x60] sm:$0xff]  ;;  %v981_v34 = vrot.slane %v5566_v7, 1  ;;  %v1051_v37 = vrot.slane %v5566_v7, 2 }
  0x61   :  { %399 = vst.msk [vmem:[#allocation2 + $0x120] sm:$0xff] %vm361_vm0, %v7174_v0  ;;  %401 = vst.msk [vmem:[#allocation2 + $0x130] sm:$0xff] %vm361_vm0, %v7174_v0  ;;  %5149 = vmatmul.mubr.msk.f32.vlgmr.msra.gmra.mxu0 %vm147_vm2, %v121_v6  ;;  %v133_v19 = vld [vmem:[%s7164_s0 + $0x68] sm:$0xff]  ;;  %v134_v20 = vld [vmem:[%s7164_s0 + $0x70] sm:$0xff] }
  0x62   :  { %5151 = vmatprep.mubr.msk.f32.mxu0 %vm147_vm2, %v122_v8  ;;  %v135_v21 = vld [vmem:[%s7164_s0 + $0x78] sm:$0xff]  ;;  %368 = vst.msk [vmem:[#allocation2 + $0x28] sm:$0x3] %vm363_vm3, %v7174_v0  ;;  %364 = vst.msk [vmem:[#allocation2 + $0x8] sm:$0x3] %vm363_vm3, %v7174_v0  ;;  %v420_v22 = vld [vmem:[#allocation2] sm:$0xff] }
  0x63   :  { %366 = vst.msk [vmem:[#allocation2 + $0x18] sm:$0x3] %vm363_vm3, %v7174_v0  ;;  %370 = vst.msk [vmem:[#allocation2 + $0x38] sm:$0x3] %vm363_vm3, %v7174_v0  ;;  %v509_v24 = vrot.slane %v420_v22, 1  ;;  %v623_v26 = vrot.slane %v420_v22, 2 }
  0x64   :  { %372 = vst.msk [vmem:[#allocation2 + $0x48] sm:$0x3] %vm363_vm3, %v7174_v0  ;;  %374 = vst.msk [vmem:[#allocation2 + $0x58] sm:$0x3] %vm363_vm3, %v7174_v0  ;;  %s5443_s0 = smov 32   ;;  %v5672_v30 = vld [vmem:[#allocation2 + $0xa0] sm:$0xff] }
  0x65   :  { %5152 = vmatmul.mubr.msk.f32.gmra.mxu0 %vm147_vm2, %v123_v9  ;;  %376 = vst.msk [vmem:[#allocation2 + $0x68] sm:$0x3] %vm363_vm3, %v7174_v0  ;;  %378 = vst.msk [vmem:[#allocation2 + $0x78] sm:$0x3] %vm363_vm3, %v7174_v0  ;;  %v533_v32 = vrot.slane %v5672_v30, 1  ;;  %v1172_v42 = vld [vmem:[%s7167_s3 + $0x118] sm:$0xff] }
  0x66   :  { %5154 = vmatprep.mubr.msk.f32.mxu0 %vm147_vm2, %v124_v10  ;;  %380 = vst.msk [vmem:[#allocation2 + $0x88] sm:$0x3] %vm363_vm3, %v7174_v0  ;;  %382 = vst.msk [vmem:[#allocation2 + $0x98] sm:$0x3] %vm363_vm3, %v7174_v0  ;;  %5172 = vmatprep.subr.mxu0 %v1172_v42  ;;  %v1171_v43 = vld [vmem:[%s7167_s3 + $0x110] sm:$0xff]  ;;  %v1170_v44 = vld [vmem:[%s7167_s3 + $0x108] sm:$0xff] }
  0x67   :  { %384 = vst.msk [vmem:[#allocation2 + $0xa8] sm:$0x3] %vm363_vm3, %v7174_v0  ;;  %386 = vst.msk [vmem:[#allocation2 + $0xb8] sm:$0x3] %vm363_vm3, %v7174_v0  ;;  %5173 = vmatpush3.msra.mxu0 %v1172_v42  ;;  %v1169_v45 = vld [vmem:[%s7167_s3 + $0x100] sm:$0xff]  ;;  %v1168_v49 = vld [vmem:[%s7167_s3 + $0xf8] sm:$0xff] }
  0x68   :  { %388 = vst.msk [vmem:[#allocation2 + $0xc8] sm:$0x3] %vm363_vm3, %v7174_v0  ;;  %390 = vst.msk [vmem:[#allocation2 + $0xd8] sm:$0x3] %vm363_vm3, %v7174_v0  ;;  %5174 = vmatprep.subr.mxu0 %v1171_v43  ;;  %v1152_v50 = vld [vmem:[%s7167_s3 + $0x78] sm:$0xff]  ;;  %v1167_v51 = vld [vmem:[%s7167_s3 + $0xf0] sm:$0xff]  ;;  %4463 = vmatprep.subr.mxu1 %v1168_v49 }
  0x69   :  { %5155 = vmatmul.mubr.msk.f32.gmra.mxu0 %vm147_vm2, %v125_v11  ;;  %392 = vst.msk [vmem:[#allocation2 + $0xe8] sm:$0x3] %vm363_vm3, %v7174_v0  ;;  %394 = vst.msk [vmem:[#allocation2 + $0xf8] sm:$0x3] %vm363_vm3, %v7174_v0  ;;  %v421_v23 = vld [vmem:[#allocation2 + $0x8] sm:$0x3]  ;;  %4464 = vmatpush3.msra.mxu1 %v1152_v50 }
  0x6a   :  { %5157 = vmatprep.mubr.msk.f32.mxu0 %vm147_vm2, %v126_v12  ;;  %396 = vst.msk [vmem:[#allocation2 + $0x108] sm:$0x3] %vm363_vm3, %v7174_v0  ;;  %398 = vst.msk [vmem:[#allocation2 + $0x118] sm:$0x3] %vm363_vm3, %v7174_v0  ;;  %v510_v25 = vrot.slane %v421_v23, 1  ;;  %v624_v27 = vrot.slane %v421_v23, 2  ;;  %5175 = vmatpush3.msra.mxu0 %v1171_v43 }
  0x6b   :  { %400 = vst.msk [vmem:[#allocation2 + $0x128] sm:$0x3] %vm363_vm3, %v7174_v0  ;;  %402 = vst.msk [vmem:[#allocation2 + $0x138] sm:$0x3] %vm363_vm3, %v7174_v0  ;;  %5176 = vmatprep.subr.mxu0 %v1170_v44  ;;  %4465 = vmatprep.subr.mxu1 %v1167_v51  ;;  %v1151_v53 = vld [vmem:[%s7167_s3 + $0x70] sm:$0xff]  ;;  %v1166_v54 = vld [vmem:[%s7167_s3 + $0xe8] sm:$0xff] }
  0x6c   :  { %460 = vst.msk [vmem:[#allocation3] sm:$0xff] %vm361_vm0, %v420_v22  ;;  %v511_v28 = vsel %vm508_vm4, %v509_v24, %v510_v25  ;;  %v625_v29 = vsel %vm622_vm5, %v623_v26, %v624_v27  ;;  %468 = vst.msk [vmem:[#allocation3 + $0xc0] sm:$0xff] %vm361_vm0, %v5672_v30  ;;  %5177 = vmatpush3.msra.mxu0 %v1170_v44  ;;  %4466 = vmatpush3.msra.mxu1 %v1151_v53  ;;  %v1150_v55 = vld [vmem:[%s7167_s3 + $0x68] sm:$0xff]  ;;  %v5723_v56 = vld [vmem:[#allocation8] ss:$0 sm:$0xff] }
  0x6d   :  { %5158 = vmatmul.mubr.msk.f32.gmra.mxu0 %vm147_vm2, %v127_v13  ;;  %557 = vrot.lane.b32.xlu0 %v511_v28, %s5443_s0  ;;  %v439_v36 = vld [vmem:[#allocation2 + $0x98] sm:$0x3]  ;;  %v1165_v57 = vld [vmem:[%s7167_s3 + $0xe0] sm:$0xff]  ;;  %v1163_v3 = vld [vmem:[%s7167_s3 + $0xd0] sm:$0xff] }
  0x6e   :  { %5160 = vmatprep.mubr.msk.f32.mxu0 %vm147_vm2, %v128_v14  ;;  %671 = vrot.lane.b32.xlu1 %v625_v29, %s5442_s27  ;;  %v5674_v31 = vld [vmem:[#allocation2 + $0xa8] sm:$0x3]  ;;  %v982_v38 = vrot.slane %v439_v36, 1  ;;  %v1052_v40 = vrot.slane %v439_v36, 2  ;;  %v1149_v59 = vld [vmem:[%s7167_s3 + $0x60] sm:$0xff]  ;;  %v1164_v61 = vld [vmem:[%s7167_s3 + $0xd8] sm:$0xff] }
  0x6f   :  { %v534_v33 = vrot.slane %v5674_v31, 1  ;;  %5178 = vmatprep.subr.mxu0 %v1169_v45  ;;  %4467 = vmatprep.subr.mxu1 %v1166_v54  ;;  %v1148_v63 = vld [vmem:[%s7167_s3 + $0x58] sm:$0xff]  ;;  %v1147_v5 = vld [vmem:[%s7167_s3 + $0x50] sm:$0xff]  ;;  %v1162_v8 = vld [vmem:[%s7167_s3 + $0xc8] sm:$0xff] }
  0x70   :  { %v983_v39 = vsel %vm508_vm4, %v981_v34, %v982_v38  ;;  %v1053_v41 = vsel %vm622_vm5, %v1051_v37, %v1052_v40  ;;  %5179 = vmatpush3.msra.mxu0 %v1169_v45  ;;  %4468 = vmatpush3.msra.mxu1 %v1150_v55  ;;  %v1146_v12 = vld [vmem:[%s7167_s3 + $0x48] sm:$0xff]  ;;  %v1161_v14 = vld [vmem:[%s7167_s3 + $0xc0] sm:$0xff]  ;;  %v1159_v26 = vld [vmem:[%s7167_s3 + $0xb0] sm:$0xff] }
  0x71   :  { %5161 = vmatmul.mubr.msk.f32.gmra.mxu0 %vm147_vm2, %v129_v15  ;;  %v535_v35 = vsel %vm508_vm4, %v533_v32, %v534_v33  ;;  %1001 = vrot.lane.b32.xlu0 %v983_v39, %s5444_s26  ;;  %1080 = vst.msk [vmem:[#allocation3 + $0xb8] sm:$0xff] %vm361_vm0, %v1053_v41  ;;  %v1145_v15 = vld [vmem:[%s7167_s3 + $0x40] sm:$0xff]  ;;  %v1143_v33 = vld [vmem:[%s7167_s3 + $0x30] sm:$0xff]  ;;  %v1158_v34 = vld [vmem:[%s7167_s3 + $0xa8] sm:$0xff] }
  0x72   :  { %5163 = vmatprep.mubr.msk.f32.mxu0 %vm147_vm2, %v130_v16  ;;  %573 = vrot.lane.b32.xlu1 %v535_v35, %s5443_s0  ;;  %v1142_v44 = vld [vmem:[%s7167_s3 + $0x28] sm:$0xff]  ;;  %v2481_v0 = vld [vmem:[#allocation11 + $0x18] sm:$0xff] }
  0x73   :  { %4469 = vmatprep.subr.mxu1 %v1165_v57  ;;  %v1157_v57 = vld [vmem:[%s7167_s3 + $0xa0] sm:$0xff] }
  0x74   :  { %4470 = vmatpush3.msra.mxu1 %v1149_v59  ;;  %v1156_v59 = vld [vmem:[%s7167_s3 + $0x98] sm:$0xff] }
  0x75   :  { %5164 = vmatmul.mubr.msk.f32.gmra.mxu0 %vm147_vm2, %v131_v17  ;;  %4471 = vmatprep.subr.mxu1 %v1164_v61 }
  0x76   :  { %5166 = vmatprep.mubr.msk.f32.mxu0 %vm147_vm2, %v132_v18  ;;  %4472 = vmatpush3.msra.mxu1 %v1148_v63  ;;  %v1160_v18 = vld [vmem:[%s7167_s3 + $0xb8] sm:$0xff] }
  0x77   :  { %4473 = vmatprep.subr.mxu1 %v1163_v3 }
  0x78   :  { %4474 = vmatpush3.msra.mxu1 %v1147_v5 }
  0x79   :  { %5167 = vmatmul.mubr.msk.f32.gmra.mxu0 %vm147_vm2, %v133_v19  ;;  %4475 = vmatprep.subr.mxu1 %v1162_v8  ;;  %v1140_v8 = vld [vmem:[%s7167_s3 + $0x18] sm:$0xff] }
  0x7a   :  { %5169 = vmatprep.mubr.msk.f32.mxu0 %vm147_vm2, %v134_v20  ;;  %4476 = vmatpush3.msra.mxu1 %v1146_v12  ;;  %v1144_v20 = vld [vmem:[%s7167_s3 + $0x38] sm:$0xff] }
  0x7b   :  { %4477 = vmatprep.subr.mxu1 %v1161_v14 }
  0x7c   :  { %4478 = vmatpush3.msra.mxu1 %v1145_v15 }
  0x7d   :  { %5170 = vmatmul.mubr.msk.f32.gmra.mxu0 %vm147_vm2, %v135_v21  ;;  %4479 = vmatprep.subr.mxu1 %v1160_v18 }
  0x7e   :  { %4480 = vmatpush3.msra.mxu1 %v1144_v20 }
  0x7f   :  { %4481 = vmatprep.subr.mxu1 %v1159_v26 }
  0x80   :  { %4482 = vmatpush3.msra.mxu1 %v1143_v33 }
  0x81   :  { %4483 = vmatprep.subr.mxu1 %v1158_v34 }
  0x82   :  { %4484 = vmatpush3.msra.mxu1 %v1142_v44  ;;  %v1153_v44 = vld [vmem:[%s7167_s3 + $0x80] sm:$0xff] }
  0x83   :  { %4485 = vmatprep.subr.mxu1 %v1157_v57 }
  0xd2   :  { %v5700_v46 = vpop.permute.xlu0 %929 }
  0xdf   :  { %v558_v47 = vpop.permute.xlu0 %557 }
  0xe0   :  { %606 = vst.msk [vmem:[#allocation3] sm:$0xff] %vm605_vm6, %v558_v47  ;;  %v672_v48 = vpop.permute.xlu1 %671 }
  0xe1   :  { %720 = vst.msk [vmem:[#allocation3] sm:$0xff] %vm719_vm7, %v672_v48 }
  0xe4   :  { %v574_v52 = vpop.permute.xlu1 %573 }
  0xe5   :  { %614 = vst.msk [vmem:[#allocation3 + $0xc0] sm:$0xff] %vm605_vm6, %v574_v52 }
 0x121   :  { %v5150_v58 = vpop.f32.mrf.mxu0 }
 0x122   :  { %v272_v60 = vadd.f32 %v5150_v58, %v5723_v56  ;;  %v1141_v58 = vld [vmem:[%s7167_s3 + $0x20] sm:$0xff] }
 0x123   :  { %v266_v62 = vpop.f32.mrf.mxu0  ;;  %4486 = vmatpush3.msra.mxu1 %v1141_v58 }
 0x124   :  { %v346_v1 = vmax.f32 %v272_v60, 0.0  ;;  %v267_v2 = vadd.f32 %v5723_v56, %v266_v62  ;;  %4487 = vmatprep.subr.mxu1 %v1156_v59 }
 0x125   :  { %v5153_v4 = vpop.f32.mrf.mxu0  ;;  %4488 = vmatpush3.msra.mxu1 %v1140_v8 }
 0x126   :  { %405 = vst.msk [vmem:[#allocation2 + $0x21] sm:$0xff] %vm361_vm0, %v346_v1  ;;  %v345_v6 = vmax.f32 %v267_v2, 0.0  ;;  %v282_v7 = vadd.f32 %v5153_v4, %v5723_v56 }
 0x127   :  { %v276_v9 = vpop.f32.mrf.mxu0 }
 0x128   :  { %404 = vst.msk [vmem:[#allocation2 + $0x11] sm:$0xff] %vm361_vm0, %v345_v6  ;;  %v348_v10 = vmax.f32 %v282_v7, 0.0  ;;  %v277_v11 = vadd.f32 %v5723_v56, %v276_v9  ;;  %v1155_v9 = vld [vmem:[%s7167_s3 + $0x90] sm:$0xff] }
 0x129   :  { %v5156_v13 = vpop.f32.mrf.mxu0  ;;  %4489 = vmatprep.subr.mxu1 %v1155_v9 }
 0x12a   :  { %407 = vst.msk [vmem:[#allocation2 + $0x41] sm:$0xff] %vm361_vm0, %v348_v10  ;;  %v347_v16 = vmax.f32 %v277_v11, 0.0  ;;  %v292_v17 = vadd.f32 %v5156_v13, %v5723_v56 }
 0x12b   :  { %v286_v19 = vpop.f32.mrf.mxu0 }
 0x12c   :  { %406 = vst.msk [vmem:[#allocation2 + $0x31] sm:$0xff] %vm361_vm0, %v347_v16  ;;  %v350_v21 = vmax.f32 %v292_v17, 0.0  ;;  %v287_v22 = vadd.f32 %v5723_v56, %v286_v19  ;;  %v1139_v17 = vld [vmem:[%s7167_s3 + $0x10] sm:$0xff] }
 0x12d   :  { %v424_v23 = vld [vmem:[#allocation2 + $0x20] sm:$0xff]  ;;  %v425_v24 = vld [vmem:[#allocation2 + $0x28] sm:$0x3]  ;;  %v5159_v25 = vpop.f32.mrf.mxu0  ;;  %4490 = vmatpush3.msra.mxu1 %v1139_v17 }
 0x12e   :  { %915 = vrot.lane.b32.xlu1 %v424_v23, %s5442_s27  ;;  %462 = vst.msk [vmem:[#allocation3 + $0x30] sm:$0xff] %vm361_vm0, %v424_v23  ;;  %v515_v27 = vrot.slane %v424_v23, 1  ;;  %v516_v28 = vrot.slane %v425_v24, 1  ;;  %v629_v29 = vrot.slane %v424_v23, 2  ;;  %v630_v32 = vrot.slane %v425_v24, 2  ;;  %409 = vst.msk [vmem:[#allocation2 + $0x61] sm:$0xff] %vm361_vm0, %v350_v21 }
 0x12f   :  { %v5783_v35 = vld [vmem:[#allocation2 + $0x10] sm:$0xff]  ;;  %v5785_v36 = vld [vmem:[#allocation2 + $0x18] sm:$0x3]  ;;  %v349_v37 = vmax.f32 %v287_v22, 0.0  ;;  %v302_v38 = vadd.f32 %v5159_v25, %v5723_v56  ;;  %v296_v39 = vpop.f32.mrf.mxu0 }
 0x130   :  { %v5789_v40 = vsel %vm508_vm4, %v515_v27, %v516_v28  ;;  %v5792_v41 = vsel %vm622_vm5, %v629_v29, %v630_v32  ;;  %461 = vst.msk [vmem:[#allocation3 + $0x18] sm:$0xff] %vm361_vm0, %v5783_v35  ;;  %v626_v42 = vrot.slane %v5783_v35, 2  ;;  %v627_v43 = vrot.slane %v5785_v36, 2  ;;  %v1154_v27 = vld [vmem:[%s7167_s3 + $0x88] sm:$0xff] }
 0x131   :  { %987 = vrot.lane.b32.xlu0 %v5789_v40, %s5444_s26  ;;  %828 = vst.msk [vmem:[#allocation3 + $0x20] sm:$0xff] %vm361_vm0, %v5789_v40  ;;  %1073 = vst.msk [vmem:[#allocation3 + $0x10] sm:$0xff] %vm361_vm0, %v5792_v41  ;;  %v5807_v45 = vld [vmem:[#allocation2 + $0x40] sm:$0xff]  ;;  %v429_v47 = vld [vmem:[#allocation2 + $0x48] sm:$0x3]  ;;  %v512_v48 = vrot.slane %v5783_v35, 1  ;;  %v297_v51 = vadd.f32 %v5723_v56, %v296_v39  ;;  %v5162_v52 = vpop.f32.mrf.mxu0  ;;  %4491 = vmatprep.subr.mxu1 %v1154_v27 }
 0x132   :  { %408 = vst.msk [vmem:[#allocation2 + $0x51] sm:$0xff] %vm361_vm0, %v349_v37  ;;  %v513_v49 = vrot.slane %v5785_v36, 1  ;;  %v352_v50 = vmax.f32 %v302_v38, 0.0  ;;  %740 = vrot.lane.b32.xlu1 %v424_v23, %s5444_s26  ;;  %v636_v53 = vrot.slane %v429_v47, 2  ;;  %v635_v54 = vrot.slane %v5807_v45, 2  ;;  %464 = vst.msk [vmem:[#allocation3 + $0x60] sm:$0xff] %vm361_vm0, %v5807_v45 }
 0x133   :  { %v521_v55 = vrot.slane %v5807_v45, 1  ;;  %v5827_v60 = vld [vmem:[#allocation2 + $0x30] sm:$0xff]  ;;  %v427_v61 = vld [vmem:[#allocation2 + $0x38] sm:$0x3]  ;;  %v522_v62 = vrot.slane %v429_v47, 1  ;;  %v351_v1 = vmax.f32 %v297_v51, 0.0  ;;  %v312_v2 = vadd.f32 %v5162_v52, %v5723_v56  ;;  %v306_v3 = vpop.f32.mrf.mxu0 }
 0x134   :  { %v5830_v63 = vsel %vm508_vm4, %v512_v48, %v513_v49  ;;  %411 = vst.msk [vmem:[#allocation2 + $0x81] sm:$0xff] %vm361_vm0, %v352_v50  ;;  %v5835_v4 = vsel %vm622_vm5, %v635_v54, %v636_v53  ;;  %v632_v5 = vrot.slane %v5827_v60, 2  ;;  %v633_v6 = vrot.slane %v427_v61, 2  ;;  %463 = vst.msk [vmem:[#allocation3 + $0x48] sm:$0xff] %vm361_vm0, %v5827_v60  ;;  %v1138_v28 = vld [vmem:[%s7167_s3 + $0x8] sm:$0xff]  ;;  %v1137_v47 = vld [vmem:[%s7167_s3] sm:$0xff] }
 0x135   :  { %827 = vst.msk [vmem:[#allocation3 + $0x8] sm:$0xff] %vm361_vm0, %v5830_v63  ;;  %v518_v7 = vrot.slane %v5827_v60, 1  ;;  %851 = vrot.lane.b32.xlu0 %v5792_v41, %s5443_s0  ;;  %1075 = vst.msk [vmem:[#allocation3 + $0x40] sm:$0xff] %vm361_vm0, %v5835_v4  ;;  %v5854_v10 = vsel %vm508_vm4, %v521_v55, %v522_v62  ;;  %v5856_v11 = vld [vmem:[#allocation2 + $0x60] sm:$0xff]  ;;  %v433_v12 = vld [vmem:[#allocation2 + $0x68] sm:$0x3]  ;;  %v307_v15 = vadd.f32 %v5723_v56, %v306_v3  ;;  %v5165_v16 = vpop.f32.mrf.mxu0  ;;  %4492 = vmatpush3.msra.mxu1 %v1138_v28 }
 0x136   :  { %v519_v13 = vrot.slane %v427_v61, 1  ;;  %410 = vst.msk [vmem:[#allocation2 + $0x71] sm:$0xff] %vm361_vm0, %v351_v1  ;;  %v354_v14 = vmax.f32 %v312_v2, 0.0  ;;  %738 = vrot.lane.b32.xlu1 %v5783_v35, %s5444_s26  ;;  %v5866_v18 = vsel %vm622_vm5, %v632_v5, %v633_v6  ;;  %830 = vst.msk [vmem:[#allocation3 + $0x50] sm:$0xff] %vm361_vm0, %v5854_v10  ;;  %v641_v19 = vrot.slane %v5856_v11, 2  ;;  %4493 = vmatprep.subr.mxu1 %v1153_v44  ;;  %s5447_s3 = smov [#allocation17]  }
 0x137   :  { %v642_v20 = vrot.slane %v433_v12, 2  ;;  %466 = vst.msk [vmem:[#allocation3 + $0x90] sm:$0xff] %vm361_vm0, %v5856_v11  ;;  %v527_v21 = vrot.slane %v5856_v11, 1  ;;  %1074 = vst.msk [vmem:[#allocation3 + $0x28] sm:$0xff] %vm361_vm0, %v5866_v18  ;;  %v528_v23 = vrot.slane %v433_v12, 1  ;;  %v353_v24 = vmax.f32 %v307_v15, 0.0  ;;  %v316_v26 = vpop.f32.mrf.mxu0  ;;  %4494 = vmatpush3.msra.mxu1 %v1137_v47 }
 0x138   :  { %v5877_v22 = vsel %vm508_vm4, %v518_v7, %v519_v13  ;;  %413 = vst.msk [vmem:[#allocation2 + $0xc1] sm:$0xff] %vm361_vm0, %v354_v14  ;;  %v322_v25 = vadd.f32 %v5165_v16, %v5723_v56  ;;  %v1091_v29 = vld [vmem:[#allocation3 + $0x10] sm:$0xff]  ;;  %v5892_v32 = vsel %vm622_vm5, %v626_v42, %v627_v43  ;;  %v317_v38 = vadd.f32 %v5723_v56, %v316_v26 }
 0x139   :  { %v5894_v33 = vld [vmem:[#allocation2 + $0x50] sm:$0xff]  ;;  %v5897_v34 = vsel %vm622_vm5, %v641_v19, %v642_v20  ;;  %829 = vst.msk [vmem:[#allocation3 + $0x38] sm:$0xff] %vm361_vm0, %v5877_v22  ;;  %v431_v37 = vld [vmem:[#allocation2 + $0x58] sm:$0x3]  ;;  %5180 = vmatprep.mubr.msk.f32.mxu0 %vm361_vm0, %v1091_v29  ;;  %919 = vrot.lane.b32.xlu0 %v5807_v45, %s5442_s27  ;;  %v5911_v39 = vsel %vm508_vm4, %v527_v21, %v528_v23  ;;  %412 = vst.msk [vmem:[#allocation2 + $0xb1] sm:$0xff] %vm361_vm0, %v353_v24  ;;  %v5168_v43 = vpop.f32.mrf.mxu0 }
 0x13a   :  { %465 = vst.msk [vmem:[#allocation3 + $0x78] sm:$0xff] %vm361_vm0, %v5894_v33  ;;  %1077 = vst.msk [vmem:[#allocation3 + $0x70] sm:$0xff] %vm361_vm0, %v5897_v34  ;;  %v638_v35 = vrot.slane %v5894_v33, 2  ;;  %v639_v36 = vrot.slane %v431_v37, 2  ;;  %v524_v42 = vrot.slane %v5894_v33, 1  ;;  %561 = vrot.lane.b32.xlu1 %v5789_v40, %s5443_s0  ;;  %v525_v50 = vrot.slane %v431_v37, 1 }
 0x13b   :  { %832 = vst.msk [vmem:[#allocation3 + $0x80] sm:$0xff] %vm361_vm0, %v5911_v39  ;;  %v5925_v48 = vld [vmem:[#allocation2 + $0x80] sm:$0xff]  ;;  %v437_v49 = vld [vmem:[#allocation2 + $0x88] sm:$0x3]  ;;  %v356_v51 = vmax.f32 %v322_v25, 0.0  ;;  %v355_v52 = vmax.f32 %v317_v38, 0.0  ;;  %v332_v53 = vadd.f32 %v5168_v43, %v5723_v56  ;;  %v326_v58 = vpop.f32.mrf.mxu0 }
 0x13c   :  { %v5929_v54 = vsel %vm622_vm5, %v638_v35, %v639_v36  ;;  %v843_v55 = vrot.slane %v5925_v48, 2  ;;  %v844_v57 = vrot.slane %v437_v49, 2  ;;  %v805_v40 = vrot.slane %v5925_v48, 1  ;;  %v1097_v5 = vld [vmem:[#allocation3 + $0x40] sm:$0xff] }
 0x13d   :  { %v5933_v59 = vld [vmem:[#allocation2 + $0x70] sm:$0xff]  ;;  %1076 = vst.msk [vmem:[#allocation3 + $0x58] sm:$0xff] %vm361_vm0, %v5929_v54  ;;  %v5938_v61 = vsel %vm508_vm4, %v524_v42, %v525_v50  ;;  %v435_v62 = vld [vmem:[#allocation2 + $0x78] sm:$0x3]  ;;  %v806_v1 = vrot.slane %v437_v49, 1  ;;  %415 = vst.msk [vmem:[#allocation2 + $0xe1] sm:$0xff] %vm361_vm0, %v356_v51  ;;  %v327_v3 = vadd.f32 %v5723_v56, %v326_v58  ;;  %849 = vrot.lane.b32.xlu0 %v5892_v32, %s5443_s0  ;;  %v5171_v12 = vpop.f32.mrf.mxu0 }
 0x13e   :  { %414 = vst.msk [vmem:[#allocation2 + $0xd1] sm:$0xff] %vm361_vm0, %v355_v52  ;;  %v358_v2 = vmax.f32 %v332_v53, 0.0  ;;  %467 = vst.msk [vmem:[#allocation3 + $0xa8] sm:$0xff] %vm361_vm0, %v5933_v59  ;;  %v5948_v6 = vsel %vm622_vm5, %v843_v55, %v844_v57  ;;  %v644_v7 = vrot.slane %v5933_v59, 2  ;;  %v645_v8 = vrot.slane %v435_v62, 2  ;;  %675 = vrot.lane.b32.xlu1 %v5792_v41, %s5442_s27  ;;  %v1094_v13 = vld [vmem:[#allocation3 + $0x28] sm:$0xff] }
 0x13f   :  { %831 = vst.msk [vmem:[#allocation3 + $0x68] sm:$0xff] %vm361_vm0, %v5938_v61  ;;  %v530_v9 = vrot.slane %v5933_v59, 1  ;;  %1079 = vst.msk [vmem:[#allocation3 + $0xa0] sm:$0xff] %vm361_vm0, %v5948_v6  ;;  %v5959_v14 = vsel %vm508_vm4, %v805_v40, %v806_v1  ;;  %v531_v15 = vrot.slane %v435_v62, 1  ;;  %v5961_v16 = vld [vmem:[#allocation2 + $0xc0] sm:$0xff]  ;;  %v357_v19 = vmax.f32 %v327_v3, 0.0  ;;  %5181 = vmatmul.mubr.msk.f32.vlgmr.msra.gmra.mxu0 %vm361_vm0, %v1094_v13  ;;  %v336_v25 = vpop.f32.mrf.mxu0 }
 0x140   :  { %v445_v17 = vld [vmem:[#allocation2 + $0xc8] sm:$0x3]  ;;  %417 = vst.msk [vmem:[#allocation2 + $0x101] sm:$0xff] %vm361_vm0, %v358_v2  ;;  %v342_v20 = vadd.f32 %v5171_v12, %v5723_v56  ;;  %v5967_v41 = vsel %vm622_vm5, %v644_v7, %v645_v8  ;;  %834 = vst.msk [vmem:[#allocation3 + $0xb0] sm:$0xff] %vm361_vm0, %v5959_v14  ;;  %v653_v21 = vrot.slane %v5961_v16, 2  ;;  %v539_v23 = vrot.slane %v5961_v16, 1  ;;  %5183 = vmatprep.mubr.msk.f32.mxu0 %vm361_vm0, %v1097_v5 }
 0x141   :  { %470 = vst.msk [vmem:[#allocation3 + $0xf0] sm:$0xff] %vm361_vm0, %v5961_v16  ;;  %v540_v24 = vrot.slane %v445_v17, 1  ;;  %1078 = vst.msk [vmem:[#allocation3 + $0x88] sm:$0xff] %vm361_vm0, %v5967_v41  ;;  %v5979_v26 = vsel %vm508_vm4, %v530_v9, %v531_v15  ;;  %v5981_v27 = vld [vmem:[#allocation2 + $0xb0] sm:$0xff]  ;;  %v5983_v28 = vld [vmem:[#allocation2 + $0xb8] sm:$0x3]  ;;  %v337_v38 = vadd.f32 %v5723_v56, %v336_v25  ;;  %917 = vrot.lane.b32.xlu0 %v5827_v60, %s5442_s27 }
 0x142   :  { %v654_v29 = vrot.slane %v445_v17, 2  ;;  %416 = vst.msk [vmem:[#allocation2 + $0xf1] sm:$0xff] %vm361_vm0, %v357_v19  ;;  %v360_v37 = vmax.f32 %v342_v20, 0.0  ;;  %833 = vst.msk [vmem:[#allocation3 + $0x98] sm:$0xff] %vm361_vm0, %v5979_v26  ;;  %v536_v36 = vrot.slane %v5981_v27, 1  ;;  %744 = vrot.lane.b32.xlu1 %v5807_v45, %s5444_s26  ;;  %v1103_v42 = vld [vmem:[#allocation3 + $0x70] sm:$0xff] }
 0x143   :  { %469 = vst.msk [vmem:[#allocation3 + $0xd8] sm:$0xff] %vm361_vm0, %v5981_v27  ;;  %v5994_v35 = vsel %vm508_vm4, %v539_v23, %v540_v24  ;;  %v537_v43 = vrot.slane %v5983_v28, 1  ;;  %v359_v44 = vmax.f32 %v337_v38, 0.0 }
 0x144   :  { %v6000_v56 = vsel %vm622_vm5, %v653_v21, %v654_v29  ;;  %836 = vst.msk [vmem:[#allocation3 + $0xe0] sm:$0xff] %vm361_vm0, %v5994_v35  ;;  %419 = vst.msk [vmem:[#allocation2 + $0x121] sm:$0xff] %vm361_vm0, %v360_v37  ;;  %v1100_v47 = vld [vmem:[#allocation3 + $0x58] sm:$0xff]  ;;  %v6017_v53 = vld [vmem:[#allocation2 + $0xe0] sm:$0xff] }
 0x145   :  { %1081 = vst.msk [vmem:[#allocation3 + $0xd0] sm:$0xff] %vm361_vm0, %v6000_v56  ;;  %v6008_v49 = vld [vmem:[#allocation2 + $0xd0] sm:$0xff]  ;;  %v447_v50 = vld [vmem:[#allocation2 + $0xd8] sm:$0x3]  ;;  %5184 = vmatmul.mubr.msk.f32.gmra.mxu0 %vm361_vm0, %v1100_v47  ;;  %v6012_v45 = vsel %vm508_vm4, %v536_v36, %v537_v43  ;;  %v449_v57 = vld [vmem:[#allocation2 + $0xe8] sm:$0x3]  ;;  %991 = vrot.lane.b32.xlu0 %v5854_v10, %s5444_s26 }
 0x146   :  { %471 = vst.msk [vmem:[#allocation3 + $0x108] sm:$0xff] %vm361_vm0, %v6008_v49  ;;  %v542_v51 = vrot.slane %v6008_v49, 1  ;;  %v543_v52 = vrot.slane %v447_v50, 1  ;;  %v656_v55 = vrot.slane %v6008_v49, 2  ;;  %418 = vst.msk [vmem:[#allocation2 + $0x111] sm:$0xff] %vm361_vm0, %v359_v44  ;;  %5186 = vmatprep.mubr.msk.f32.mxu0 %vm361_vm0, %v1103_v42  ;;  %v657_v40 = vrot.slane %v447_v50, 2  ;;  %559 = vrot.lane.b32.xlu1 %v5830_v63, %s5443_s0 }
 0x147   :  { %835 = vst.msk [vmem:[#allocation3 + $0xc8] sm:$0xff] %vm361_vm0, %v6012_v45  ;;  %472 = vst.msk [vmem:[#allocation3 + $0x120] sm:$0xff] %vm361_vm0, %v6017_v53  ;;  %v545_v58 = vrot.slane %v6017_v53, 1  ;;  %v546_v62 = vrot.slane %v449_v57, 1  ;;  %v659_v1 = vrot.slane %v6017_v53, 2  ;;  %v6030_v2 = vld [vmem:[#allocation2 + $0x100] sm:$0xff] }
 0x148   :  { %v1109_v3 = vld [vmem:[#allocation3 + $0xa0] sm:$0xff]  ;;  %v6035_v5 = vsel %vm508_vm4, %v542_v51, %v543_v52  ;;  %v660_v7 = vrot.slane %v449_v57, 2  ;;  %474 = vst.msk [vmem:[#allocation3 + $0x150] sm:$0xff] %vm361_vm0, %v6030_v2  ;;  %v453_v8 = vld [vmem:[#allocation2 + $0x108] sm:$0x3]  ;;  %v551_v9 = vrot.slane %v6030_v2, 1  ;;  %v6044_v15 = vsel %vm622_vm5, %v656_v55, %v657_v40 }
 0x149   :  { %v665_v12 = vrot.slane %v6030_v2, 2  ;;  %v1106_v13 = vld [vmem:[#allocation3 + $0x88] sm:$0xff]  ;;  %837 = vst.msk [vmem:[#allocation3 + $0xf8] sm:$0xff] %vm361_vm0, %v6035_v5  ;;  %v6047_v63 = vsel %vm508_vm4, %v545_v58, %v546_v62  ;;  %v6049_v17 = vld [vmem:[#allocation2 + $0xf0] sm:$0xff]  ;;  %v451_v19 = vld [vmem:[#allocation2 + $0xf8] sm:$0x3]  ;;  %855 = vrot.lane.b32.xlu0 %v5835_v4, %s5443_s0 }
 0x14a   :  { %v552_v20 = vrot.slane %v453_v8, 1  ;;  %v666_v21 = vrot.slane %v453_v8, 2  ;;  %5187 = vmatmul.mubr.msk.f32.gmra.mxu0 %vm361_vm0, %v1106_v13  ;;  %1082 = vst.msk [vmem:[#allocation3 + $0xe8] sm:$0xff] %vm361_vm0, %v6044_v15  ;;  %838 = vst.msk [vmem:[#allocation3 + $0x110] sm:$0xff] %vm361_vm0, %v6047_v63  ;;  %v6057_v23 = vsel %vm622_vm5, %v659_v1, %v660_v7  ;;  %v548_v24 = vrot.slane %v6049_v17, 1  ;;  %v1112_v37 = vld [vmem:[#allocation3 + $0xb8] sm:$0xff]  ;;  %673 = vrot.lane.b32.xlu1 %v5892_v32, %s5442_s27 }
 0x14b   :  { %473 = vst.msk [vmem:[#allocation3 + $0x138] sm:$0xff] %vm361_vm0, %v6049_v17  ;;  %v549_v25 = vrot.slane %v451_v19, 1  ;;  %v662_v29 = vrot.slane %v6049_v17, 2  ;;  %5189 = vmatprep.mubr.msk.f32.mxu0 %vm361_vm0, %v1109_v3  ;;  %1083 = vst.msk [vmem:[#allocation3 + $0x100] sm:$0xff] %vm361_vm0, %v6057_v23  ;;  %v663_v38 = vrot.slane %v451_v19, 2  ;;  %v6116_v1 = vld [vmem:[#allocation2 + $0x120] sm:$0xff] }
 0x14c   :  { %v6069_v36 = vsel %vm508_vm4, %v551_v9, %v552_v20  ;;  %v6072_v42 = vsel %vm622_vm5, %v665_v12, %v666_v21  ;;  %v1115_v43 = vld [vmem:[#allocation3 + $0xd0] sm:$0xff]  ;;  %v457_v3 = vld [vmem:[#allocation2 + $0x128] sm:$0x3]  ;;  %v808_v7 = vrot.slane %v6116_v1, 1  ;;  %v6149_v20 = vld [vmem:[#allocation2 + $0x138] sm:$0x3] }
 0x14d   :  { %v6077_v44 = vsel %vm508_vm4, %v548_v24, %v549_v25  ;;  %840 = vst.msk [vmem:[#allocation3 + $0x140] sm:$0xff] %vm361_vm0, %v6069_v36  ;;  %1085 = vst.msk [vmem:[#allocation3 + $0x130] sm:$0xff] %vm361_vm0, %v6072_v42  ;;  %v6086_v47 = vsel %vm622_vm5, %v662_v29, %v663_v38  ;;  %v6088_v50 = vld [vmem:[#allocation2 + $0x110] sm:$0xff]  ;;  %v455_v51 = vld [vmem:[#allocation2 + $0x118] sm:$0x3]  ;;  %923 = vrot.lane.b32.xlu0 %v5856_v11, %s5442_s27  ;;  %v809_v8 = vrot.slane %v457_v3, 1 }
 0x14e   :  { %839 = vst.msk [vmem:[#allocation3 + $0x128] sm:$0xff] %vm361_vm0, %v6077_v44  ;;  %5190 = vmatmul.mubr.msk.f32.gmra.mxu0 %vm361_vm0, %v1112_v37  ;;  %1084 = vst.msk [vmem:[#allocation3 + $0x118] sm:$0xff] %vm361_vm0, %v6086_v47  ;;  %v554_v32 = vrot.slane %v6088_v50, 1  ;;  %v555_v52 = vrot.slane %v455_v51, 1  ;;  %742 = vrot.lane.b32.xlu1 %v5827_v60, %s5444_s26  ;;  %v668_v40 = vrot.slane %v6088_v50, 2  ;;  %v669_v58 = vrot.slane %v455_v51, 2 }
 0x14f   :  { %475 = vst.msk [vmem:[#allocation3 + $0x168] sm:$0xff] %vm361_vm0, %v6088_v50  ;;  %5192 = vmatprep.mubr.msk.f32.mxu0 %vm361_vm0, %v1115_v43  ;;  %v6124_v9 = vsel %vm508_vm4, %v808_v7, %v809_v8  ;;  %v847_v12 = vrot.slane %v457_v3, 2  ;;  %v985_v8 = vrot.slane %v6149_v20, 1 }
 0x150   :  { %v6102_v55 = vsel %vm508_vm4, %v554_v32, %v555_v52  ;;  %v6112_v60 = vsel %vm622_vm5, %v668_v40, %v669_v58  ;;  %842 = vst.msk [vmem:[#allocation3 + $0x170] sm:$0xff] %vm361_vm0, %v6124_v9 }
 0x151   :  { %v1118_v57 = vld [vmem:[#allocation3 + $0xe8] sm:$0xff]  ;;  %841 = vst.msk [vmem:[#allocation3 + $0x158] sm:$0xff] %vm361_vm0, %v6102_v55  ;;  %989 = vrot.lane.b32.xlu0 %v5877_v22, %s5444_s26  ;;  %1086 = vst.msk [vmem:[#allocation3 + $0x148] sm:$0xff] %vm361_vm0, %v6112_v60 }
 0x152   :  { %5193 = vmatmul.mubr.msk.f32.gmra.mxu0 %vm361_vm0, %v1118_v57  ;;  %v1121_v62 = vld [vmem:[#allocation3 + $0x100] sm:$0xff]  ;;  %565 = vrot.lane.b32.xlu1 %v5854_v10, %s5443_s0  ;;  %v846_v10 = vrot.slane %v6116_v1, 2 }
 0x153   :  { %5195 = vmatprep.mubr.msk.f32.mxu0 %vm361_vm0, %v1121_v62 }
 0x154   :  { %v6134_v13 = vsel %vm622_vm5, %v846_v10, %v847_v12 }
 0x155   :  { %853 = vrot.lane.b32.xlu0 %v5866_v18, %s5443_s0  ;;  %1087 = vst.msk [vmem:[#allocation3 + $0x160] sm:$0xff] %vm361_vm0, %v6134_v13 }
 0x156   :  { %679 = vrot.lane.b32.xlu1 %v5835_v4, %s5442_s27  ;;  %v6144_v4 = vld [vmem:[#allocation2 + $0x130] sm:$0xff] }
 0x157   :  { %v1054_v19 = vrot.slane %v6144_v4, 2  ;;  %v984_v7 = vrot.slane %v6144_v4, 1 }
 0x159   :  { %921 = vrot.lane.b32.xlu0 %v5894_v33, %s5442_s27  ;;  %v986_v10 = vsel %vm508_vm4, %v984_v7, %v985_v8 }
 0x15a   :  { %748 = vrot.lane.b32.xlu1 %v5856_v11, %s5444_s26  ;;  %v1055_v11 = vrot.slane %v6149_v20, 2 }
 0x15c   :  { %v1056_v21 = vsel %vm622_vm5, %v1054_v19, %v1055_v11 }
 0x15d   :  { %995 = vrot.lane.b32.xlu0 %v5911_v39, %s5444_s26  ;;  %1088 = vst.msk [vmem:[#allocation3 + $0x178] sm:$0xff] %vm361_vm0, %v1056_v21 }
 0x15e   :  { %563 = vrot.lane.b32.xlu1 %v5877_v22, %s5443_s0  ;;  %v1127_v22 = vld [vmem:[#allocation3 + $0x130] sm:$0xff] }
 0x161   :  { %859 = vrot.lane.b32.xlu0 %v5897_v34, %s5443_s0 }
 0x162   :  { %677 = vrot.lane.b32.xlu1 %v5866_v18, %s5442_s27  ;;  %v1124_v18 = vld [vmem:[#allocation3 + $0x118] sm:$0xff] }
 0x163   :  { %5196 = vmatmul.mubr.msk.f32.gmra.mxu0 %vm361_vm0, %v1124_v18 }
 0x164   :  { %5198 = vmatprep.mubr.msk.f32.mxu0 %vm361_vm0, %v1127_v22 }
 0x165   :  { %927 = vrot.lane.b32.xlu0 %v5925_v48, %s5442_s27 }
 0x166   :  { %746 = vrot.lane.b32.xlu1 %v5894_v33, %s5444_s26  ;;  %v647_v33 = vrot.slane %v5672_v30, 2  ;;  %v6219_v30 = vpop.permute.xlu0 %1001 }
 0x169   :  { %993 = vrot.lane.b32.xlu0 %v5938_v61, %s5444_s26 }
 0x16a   :  { %569 = vrot.lane.b32.xlu1 %v5911_v39, %s5443_s0  ;;  %v650_v39 = vrot.slane %v5981_v27, 2 }
 0x16d   :  { %857 = vrot.lane.b32.xlu0 %v5929_v54, %s5443_s0 }
 0x16e   :  { %683 = vrot.lane.b32.xlu1 %v5897_v34, %s5442_s27  ;;  %v648_v34 = vrot.slane %v5674_v31, 2 }
 0x171   :  { %925 = vrot.lane.b32.xlu0 %v5933_v59, %s5442_s27 }
 0x172   :  { %752 = vrot.lane.b32.xlu1 %v5925_v48, %s5444_s26  ;;  %v651_v48 = vrot.slane %v5983_v28, 2 }
 0x175   :  { %999 = vrot.lane.b32.xlu0 %v5959_v14, %s5444_s26 }
 0x176   :  { %567 = vrot.lane.b32.xlu1 %v5938_v61, %s5443_s0 }
 0x179   :  { %863 = vrot.lane.b32.xlu0 %v5948_v6, %s5443_s0 }
 0x17a   :  { %681 = vrot.lane.b32.xlu1 %v5929_v54, %s5442_s27  ;;  %v649_v54 = vsel %vm622_vm5, %v647_v33, %v648_v34 }
 0x17d   :  { %997 = vrot.lane.b32.xlu0 %v5979_v26, %s5444_s26 }
 0x17e   :  { %750 = vrot.lane.b32.xlu1 %v5933_v59, %s5444_s26  ;;  %v652_v59 = vsel %vm622_vm5, %v650_v39, %v651_v48 }
 0x181   :  { %861 = vrot.lane.b32.xlu0 %v5967_v41, %s5443_s0 }
 0x182   :  { %571 = vrot.lane.b32.xlu1 %v5979_v26, %s5443_s0 }
 0x185   :  { %931 = vrot.lane.b32.xlu0 %v5961_v16, %s5442_s27 }
 0x186   :  { %685 = vrot.lane.b32.xlu1 %v5967_v41, %s5442_s27 }
 0x189   :  { %865 = vrot.lane.b32.xlu0 %v652_v59, %s5443_s0 }
 0x18a   :  { %687 = vrot.lane.b32.xlu1 %v649_v54, %s5442_s27 }
 0x18d   :  { %1003 = vrot.lane.b32.xlu0 %v5994_v35, %s5444_s26 }
 0x18e   :  { %754 = vrot.lane.b32.xlu1 %v5981_v27, %s5444_s26 }
 0x191   :  { %867 = vrot.lane.b32.xlu0 %v6000_v56, %s5443_s0 }
 0x192   :  { %575 = vrot.lane.b32.xlu1 %v6012_v45, %s5443_s0 }
 0x195   :  { %933 = vrot.lane.b32.xlu0 %v6008_v49, %s5442_s27 }
 0x196   :  { %689 = vrot.lane.b32.xlu1 %v652_v59, %s5442_s27 }
 0x199   :  { %1005 = vrot.lane.b32.xlu0 %v6035_v5, %s5444_s26 }
 0x19a   :  { %756 = vrot.lane.b32.xlu1 %v5961_v16, %s5444_s26 }
 0x19d   :  { %935 = vrot.lane.b32.xlu0 %v6017_v53, %s5442_s27 }
 0x19e   :  { %577 = vrot.lane.b32.xlu1 %v5994_v35, %s5443_s0  ;;  %v1130_v35 = vld [vmem:[#allocation3 + $0x148] sm:$0xff] }
 0x19f   :  { %5199 = vmatmul.mubr.msk.f32.gmra.mxu0 %vm361_vm0, %v1130_v35 }
 0x1a0   :  { %v916_v31 = vpop.permute.xlu1 %915 }
 0x1a1   :  { %869 = vrot.lane.b32.xlu0 %v6044_v15, %s5443_s0 }
 0x1a2   :  { %691 = vrot.lane.b32.xlu1 %v6000_v56, %s5442_s27  ;;  %v1133_v56 = vld [vmem:[#allocation3 + $0x160] sm:$0xff] }
 0x1a3   :  { %v988_v61 = vpop.permute.xlu0 %987  ;;  %5201 = vmatprep.mubr.msk.f32.mxu0 %vm361_vm0, %v1133_v56 }
 0x1a4   :  { %v741_v6 = vpop.permute.xlu1 %740 }
 0x1a5   :  { %1007 = vrot.lane.b32.xlu0 %v6047_v63, %s5444_s26 }
 0x1a6   :  { %758 = vrot.lane.b32.xlu1 %v6008_v49, %s5444_s26 }
 0x1a7   :  { %v852_v14 = vpop.permute.xlu0 %851 }
 0x1a8   :  { %898 = vst.msk [vmem:[#allocation3 + $0x20] sm:$0xff] %vm605_vm6, %v852_v14  ;;  %v739_v16 = vpop.permute.xlu1 %738 }
 0x1a9   :  { %787 = vst.msk [vmem:[#allocation3] sm:$0xff] %vm786_vm8, %v739_v16  ;;  %871 = vrot.lane.b32.xlu0 %v6057_v23, %s5443_s0 }
 0x1aa   :  { %579 = vrot.lane.b32.xlu1 %v6035_v5, %s5443_s0 }
 0x1ab   :  { %v920_v41 = vpop.permute.xlu0 %919 }
 0x1ac   :  { %v562_v26 = vpop.permute.xlu1 %561 }
 0x1ad   :  { %608 = vst.msk [vmem:[#allocation3 + $0x30] sm:$0xff] %vm605_vm6, %v562_v26  ;;  %937 = vrot.lane.b32.xlu0 %v6049_v17, %s5442_s27 }
 0x1ae   :  { %693 = vrot.lane.b32.xlu1 %v6044_v15, %s5442_s27 }
 0x1af   :  { %v850_v27 = vpop.permute.xlu0 %849 }
 0x1b0   :  { %897 = vst.msk [vmem:[#allocation3 + $0x8] sm:$0xff] %vm605_vm6, %v850_v27  ;;  %v676_v28 = vpop.permute.xlu1 %675  ;;  %v1089_v24 = vld [vmem:[#allocation3] sm:$0xff] }
 0x1b1   :  { %963 = vst.msk [vmem:[#allocation3 + $0x8] sm:$0xff] %vm719_vm7, %v916_v31  ;;  %722 = vst.msk [vmem:[#allocation3 + $0x30] sm:$0xff] %vm719_vm7, %v676_v28  ;;  %1009 = vrot.lane.b32.xlu0 %v6077_v44, %s5444_s26 }
 0x1b2   :  { %1035 = vst.msk [vmem:[#allocation3 + $0x8] sm:$0xff] %vm786_vm8, %v988_v61  ;;  %760 = vrot.lane.b32.xlu1 %v6017_v53, %s5444_s26 }
 0x1b3   :  { %v918_v49 = vpop.permute.xlu0 %917 }
 0x1b4   :  { %964 = vst.msk [vmem:[#allocation3 + $0x20] sm:$0xff] %vm719_vm7, %v918_v49  ;;  %v745_v45 = vpop.permute.xlu1 %744 }
 0x1b5   :  { %939 = vrot.lane.b32.xlu0 %v6030_v2, %s5442_s27 }
 0x1b6   :  { %581 = vrot.lane.b32.xlu1 %v6047_v63, %s5443_s0 }
 0x1b7   :  { %v992_v5 = vpop.permute.xlu0 %991 }
 0x1b8   :  { %v560_v15 = vpop.permute.xlu1 %559 }
 0x1b9   :  { %607 = vst.msk [vmem:[#allocation3 + $0x18] sm:$0xff] %vm605_vm6, %v560_v15  ;;  %873 = vrot.lane.b32.xlu0 %v6086_v47, %s5443_s0  ;;  %v1090_v53 = vld [vmem:[#allocation3 + $0x8] sm:$0xff] }
 0x1ba   :  { %695 = vrot.lane.b32.xlu1 %v6057_v23, %s5442_s27  ;;  %1292 = vmatprep.mubr.f32.mxu1 %v1090_v53 }
 0x1bb   :  { %v856_v25 = vpop.permute.xlu0 %855  ;;  %1293 = vmatmul.mubr.f32.vlgmr.msra.gmra.mxu1 %v1089_v24 }
 0x1bc   :  { %900 = vst.msk [vmem:[#allocation3 + $0x50] sm:$0xff] %vm605_vm6, %v856_v25  ;;  %v674_v29 = vpop.permute.xlu1 %673 }
 0x1bd   :  { %721 = vst.msk [vmem:[#allocation3 + $0x18] sm:$0xff] %vm719_vm7, %v674_v29  ;;  %1011 = vrot.lane.b32.xlu0 %v6069_v36, %s5444_s26 }
 0x1be   :  { %788 = vst.msk [vmem:[#allocation3 + $0x18] sm:$0xff] %vm786_vm8, %v741_v6  ;;  %762 = vrot.lane.b32.xlu1 %v6049_v17, %s5444_s26 }
 0x1bf   :  { %v6269_v63 = vpop.permute.xlu0 %923 }
 0x1c0   :  { %v743_v23 = vpop.permute.xlu1 %742 }
 0x1c1   :  { %789 = vst.msk [vmem:[#allocation3 + $0x30] sm:$0xff] %vm786_vm8, %v743_v23  ;;  %875 = vrot.lane.b32.xlu0 %v6072_v42, %s5443_s0 }
 0x1c2   :  { %583 = vrot.lane.b32.xlu1 %v6077_v44, %s5443_s0 }
 0x1c3   :  { %v990_v37 = vpop.permute.xlu0 %989 }
 0x1c4   :  { %1036 = vst.msk [vmem:[#allocation3 + $0x20] sm:$0xff] %vm786_vm8, %v990_v37  ;;  %v566_v38 = vpop.permute.xlu1 %565 }
 0x1c5   :  { %610 = vst.msk [vmem:[#allocation3 + $0x60] sm:$0xff] %vm605_vm6, %v566_v38  ;;  %941 = vrot.lane.b32.xlu0 %v6088_v50, %s5442_s27  ;;  %v1092_v32 = vld [vmem:[#allocation3 + $0x18] sm:$0xff] }
 0x1c6   :  { %697 = vrot.lane.b32.xlu1 %v6086_v47, %s5442_s27 }
 0x1c7   :  { %v854_v17 = vpop.permute.xlu0 %853 }
 0x1c8   :  { %899 = vst.msk [vmem:[#allocation3 + $0x38] sm:$0xff] %vm605_vm6, %v854_v17  ;;  %v680_v43 = vpop.permute.xlu1 %679  ;;  %v1095_v40 = vld [vmem:[#allocation3 + $0x30] sm:$0xff] }
 0x1c9   :  { %965 = vst.msk [vmem:[#allocation3 + $0x38] sm:$0xff] %vm719_vm7, %v920_v41  ;;  %724 = vst.msk [vmem:[#allocation3 + $0x60] sm:$0xff] %vm719_vm7, %v680_v43  ;;  %1013 = vrot.lane.b32.xlu0 %v6102_v55, %s5444_s26 }
 0x1ca   :  { %1037 = vst.msk [vmem:[#allocation3 + $0x38] sm:$0xff] %vm786_vm8, %v992_v5  ;;  %764 = vrot.lane.b32.xlu1 %v6030_v2, %s5444_s26 }
 0x1cb   :  { %v922_v44 = vpop.permute.xlu0 %921  ;;  %v1093_v51 = vld [vmem:[#allocation3 + $0x20] sm:$0xff] }
 0x1cc   :  { %966 = vst.msk [vmem:[#allocation3 + $0x50] sm:$0xff] %vm719_vm7, %v922_v44  ;;  %v6291_v47 = vpop.permute.xlu1 %748  ;;  %1297 = vmatprep.mubr.f32.mxu1 %v1093_v51 }
 0x1cd   :  { %943 = vrot.lane.b32.xlu0 %v6116_v1, %s5442_s27  ;;  %1298 = vmatmul.mubr.f32.gmra.mxu1 %v1092_v32 }
 0x1ce   :  { %585 = vrot.lane.b32.xlu1 %v6069_v36, %s5443_s0  ;;  %v1136_v36 = vld [vmem:[#allocation3 + $0x178] sm:$0xff] }
 0x1cf   :  { %v996_v52 = vpop.permute.xlu0 %995  ;;  %5202 = vmatmul.mubr.msk.f32.gmra.mxu0 %vm361_vm0, %v1136_v36 }
 0x1d0   :  { %v564_v57 = vpop.permute.xlu1 %563 }
 0x1d1   :  { %609 = vst.msk [vmem:[#allocation3 + $0x48] sm:$0xff] %vm605_vm6, %v564_v57  ;;  %877 = vrot.lane.b32.xlu0 %v6112_v60, %s5443_s0  ;;  %v1096_v2 = vld [vmem:[#allocation3 + $0x38] sm:$0xff] }
 0x1d2   :  { %699 = vrot.lane.b32.xlu1 %v6072_v42, %s5442_s27  ;;  %1302 = vmatprep.mubr.f32.mxu1 %v1096_v2 }
 0x1d3   :  { %v860_v58 = vpop.permute.xlu0 %859  ;;  %1303 = vmatmul.mubr.f32.gmra.mxu1 %v1095_v40 }
 0x1d4   :  { %902 = vst.msk [vmem:[#allocation3 + $0x80] sm:$0xff] %vm605_vm6, %v860_v58  ;;  %v678_v62 = vpop.permute.xlu1 %677 }
 0x1d5   :  { %723 = vst.msk [vmem:[#allocation3 + $0x48] sm:$0xff] %vm719_vm7, %v678_v62  ;;  %1015 = vrot.lane.b32.xlu0 %v6124_v9, %s5444_s26 }
 0x1d6   :  { %790 = vst.msk [vmem:[#allocation3 + $0x48] sm:$0xff] %vm786_vm8, %v745_v45  ;;  %766 = vrot.lane.b32.xlu1 %v6088_v50, %s5444_s26 }
 0x1d7   :  { %v928_v42 = vpop.permute.xlu0 %927 }
 0x1d8   :  { %v747_v3 = vpop.permute.xlu1 %746 }
 0x1d9   :  { %791 = vst.msk [vmem:[#allocation3 + $0x60] sm:$0xff] %vm786_vm8, %v747_v3  ;;  %879 = vrot.lane.b32.xlu0 %v6134_v13, %s5443_s0 }
 0x1da   :  { %587 = vrot.lane.b32.xlu1 %v6102_v55, %s5443_s0 }
 0x1db   :  { %v994_v9 = vpop.permute.xlu0 %993 }
 0x1dc   :  { %1038 = vst.msk [vmem:[#allocation3 + $0x50] sm:$0xff] %vm786_vm8, %v994_v9  ;;  %v570_v50 = vpop.permute.xlu1 %569 }
 0x1dd   :  { %612 = vst.msk [vmem:[#allocation3 + $0x90] sm:$0xff] %vm605_vm6, %v570_v50  ;;  %945 = vrot.lane.b32.xlu0 %v6144_v4, %s5442_s27  ;;  %v1098_v19 = vld [vmem:[#allocation3 + $0x48] sm:$0xff] }
 0x1de   :  { %701 = vrot.lane.b32.xlu1 %v6112_v60, %s5442_s27 }
 0x1df   :  { %v858_v12 = vpop.permute.xlu0 %857 }
 0x1e0   :  { %901 = vst.msk [vmem:[#allocation3 + $0x68] sm:$0xff] %vm605_vm6, %v858_v12  ;;  %v684_v55 = vpop.permute.xlu1 %683  ;;  %v1101_v18 = vld [vmem:[#allocation3 + $0x60] sm:$0xff] }
 0x1e1   :  { %967 = vst.msk [vmem:[#allocation3 + $0x68] sm:$0xff] %vm719_vm7, %v6269_v63  ;;  %726 = vst.msk [vmem:[#allocation3 + $0x90] sm:$0xff] %vm719_vm7, %v684_v55  ;;  %1017 = vrot.lane.b32.xlu0 %v986_v10, %s5444_s26 }
 0x1e2   :  { %1039 = vst.msk [vmem:[#allocation3 + $0x68] sm:$0xff] %vm786_vm8, %v996_v52  ;;  %768 = vrot.lane.b32.xlu1 %v6116_v1, %s5444_s26 }
 0x1e3   :  { %v926_v13 = vpop.permute.xlu0 %925  ;;  %v1099_v60 = vld [vmem:[#allocation3 + $0x50] sm:$0xff] }
 0x1e4   :  { %968 = vst.msk [vmem:[#allocation3 + $0x80] sm:$0xff] %vm719_vm7, %v926_v13  ;;  %v753_v4 = vpop.permute.xlu1 %752  ;;  %1307 = vmatprep.mubr.f32.mxu1 %v1099_v60 }
 0x1e5   :  { %1308 = vmatmul.mubr.f32.gmra.mxu1 %v1098_v19 }
 0x1e7   :  { %v1000_v20 = vpop.permute.xlu0 %999 }
 0x1e8   :  { %v568_v11 = vpop.permute.xlu1 %567 }
 0x1e9   :  { %611 = vst.msk [vmem:[#allocation3 + $0x78] sm:$0xff] %vm605_vm6, %v568_v11  ;;  %v1102_v21 = vld [vmem:[#allocation3 + $0x68] sm:$0xff] }
 0x1ea   :  { %1312 = vmatprep.mubr.f32.mxu1 %v1102_v21 }
 0x1eb   :  { %v864_v22 = vpop.permute.xlu0 %863  ;;  %1313 = vmatmul.mubr.f32.gmra.mxu1 %v1101_v18 }
 0x1ec   :  { %904 = vst.msk [vmem:[#allocation3 + $0xb0] sm:$0xff] %vm605_vm6, %v864_v22  ;;  %v682_v1 = vpop.permute.xlu1 %681 }
 0x1ed   :  { %970 = vst.msk [vmem:[#allocation3 + $0xb0] sm:$0xff] %vm719_vm7, %v5700_v46  ;;  %725 = vst.msk [vmem:[#allocation3 + $0x78] sm:$0xff] %vm719_vm7, %v682_v1 }
 0x1ee   :  { %1042 = vst.msk [vmem:[#allocation3 + $0xb0] sm:$0xff] %vm786_vm8, %v6219_v30  ;;  %792 = vst.msk [vmem:[#allocation3 + $0x78] sm:$0xff] %vm786_vm8, %v6291_v47 }
 0x1ef   :  { %v998_v33 = vpop.permute.xlu0 %997 }
 0x1f0   :  { %1040 = vst.msk [vmem:[#allocation3 + $0x80] sm:$0xff] %vm786_vm8, %v998_v33  ;;  %v751_v34 = vpop.permute.xlu1 %750 }
 0x1f1   :  { %793 = vst.msk [vmem:[#allocation3 + $0x90] sm:$0xff] %vm786_vm8, %v751_v34 }
 0x1f3   :  { %v862_v39 = vpop.permute.xlu0 %861 }
 0x1f4   :  { %903 = vst.msk [vmem:[#allocation3 + $0x98] sm:$0xff] %vm605_vm6, %v862_v39  ;;  %v572_v48 = vpop.permute.xlu1 %571 }
 0x1f5   :  { %969 = vst.msk [vmem:[#allocation3 + $0x98] sm:$0xff] %vm719_vm7, %v928_v42  ;;  %v1104_v30 = vld [vmem:[#allocation3 + $0x78] sm:$0xff]  ;;  %v1111_v41 = vld [vmem:[#allocation3 + $0xb0] sm:$0xff] }
 0x1f6   :  { %613 = vst.msk [vmem:[#allocation3 + $0xa8] sm:$0xff] %vm605_vm6, %v572_v48 }
 0x1f7   :  { %1041 = vst.msk [vmem:[#allocation3 + $0x98] sm:$0xff] %vm786_vm8, %v1000_v20  ;;  %v932_v46 = vpop.permute.xlu0 %931  ;;  %v1105_v54 = vld [vmem:[#allocation3 + $0x80] sm:$0xff] }
 0x1f8   :  { %v686_v59 = vpop.permute.xlu1 %685  ;;  %1317 = vmatprep.mubr.f32.mxu1 %v1105_v54  ;;  %v1107_v14 = vld [vmem:[#allocation3 + $0x90] sm:$0xff] }
 0x1f9   :  { %727 = vst.msk [vmem:[#allocation3 + $0xa8] sm:$0xff] %vm719_vm7, %v686_v59  ;;  %1318 = vmatmul.mubr.f32.gmra.mxu1 %v1104_v30 }
 0x1fa   :  { %794 = vst.msk [vmem:[#allocation3 + $0xa8] sm:$0xff] %vm786_vm8, %v753_v4 }
 0x1fb   :  { %v866_v31 = vpop.permute.xlu0 %865 }
 0x1fc   :  { %905 = vst.msk [vmem:[#allocation3 + $0xc8] sm:$0xff] %vm605_vm6, %v866_v31  ;;  %v688_v61 = vpop.permute.xlu1 %687 }
 0x1fd   :  { %971 = vst.msk [vmem:[#allocation3 + $0xc8] sm:$0xff] %vm719_vm7, %v932_v46  ;;  %728 = vst.msk [vmem:[#allocation3 + $0xc0] sm:$0xff] %vm719_vm7, %v688_v61 }
 0x1fe   :  { %v1108_v6 = vld [vmem:[#allocation3 + $0x98] sm:$0xff] }
 0x1ff   :  { %1322 = vmatprep.mubr.f32.mxu1 %v1108_v6  ;;  %v1004_v16 = vpop.permute.xlu0 %1003 }
 0x200   :  { %1323 = vmatmul.mubr.f32.gmra.mxu1 %v1107_v14  ;;  %1043 = vst.msk [vmem:[#allocation3 + $0xc8] sm:$0xff] %vm786_vm8, %v1004_v16  ;;  %v755_v26 = vpop.permute.xlu1 %754 }
 0x201   :  { %1327 = vmatprep.mubr.f32.mxu1 %v1111_v41  ;;  %795 = vst.msk [vmem:[#allocation3 + $0xc0] sm:$0xff] %vm786_vm8, %v755_v26  ;;  %v1110_v27 = vld [vmem:[#allocation3 + $0xa8] sm:$0xff] }
 0x203   :  { %v868_v28 = vpop.permute.xlu0 %867 }
 0x204   :  { %1328 = vmatmul.mubr.f32.gmra.mxu1 %v1110_v27  ;;  %906 = vst.msk [vmem:[#allocation3 + $0xe0] sm:$0xff] %vm605_vm6, %v868_v28  ;;  %v576_v35 = vpop.permute.xlu1 %575 }
 0x205   :  { %615 = vst.msk [vmem:[#allocation3 + $0xd8] sm:$0xff] %vm605_vm6, %v576_v35  ;;  %v2541_v35 = vld [vmem:[#allocation11 + $0x1f8] sm:$0xff] }
 0x206   :  { %4598 = vmatprep.subr.mxu1 %v2541_v35 }
 0x207   :  { %v934_v56 = vpop.permute.xlu0 %933  ;;  %v1114_v49 = vld [vmem:[#allocation3 + $0xc8] sm:$0xff] }
 0x208   :  { %972 = vst.msk [vmem:[#allocation3 + $0xe0] sm:$0xff] %vm719_vm7, %v934_v56  ;;  %v690_v45 = vpop.permute.xlu1 %689  ;;  %1332 = vmatprep.mubr.f32.mxu1 %v1114_v49  ;;  %v1113_v5 = vld [vmem:[#allocation3 + $0xc0] sm:$0xff]  ;;  %v2540_v49 = vld [vmem:[#allocation11 + $0x1f0] sm:$0xff] }
 0x209   :  { %729 = vst.msk [vmem:[#allocation3 + $0xd8] sm:$0xff] %vm719_vm7, %v690_v45  ;;  %1333 = vmatmul.mubr.f32.gmra.mxu1 %v1113_v5  ;;  %v2525_v56 = vld [vmem:[#allocation11 + $0x178] sm:$0xff]  ;;  %v2524_v45 = vld [vmem:[#allocation11 + $0x170] sm:$0xff] }
 0x20a   :  { %4599 = vmatpush3.msra.mxu1 %v2525_v56  ;;  %v2504_v56 = vld [vmem:[#allocation11 + $0xd0] sm:$0xff] }
 0x20b   :  { %v1006_v15 = vpop.permute.xlu0 %1005  ;;  %4600 = vmatprep.subr.mxu1 %v2540_v49 }
 0x20c   :  { %1044 = vst.msk [vmem:[#allocation3 + $0xe0] sm:$0xff] %vm786_vm8, %v1006_v15  ;;  %v757_v53 = vpop.permute.xlu1 %756  ;;  %v2539_v15 = vld [vmem:[#allocation11 + $0x1e8] sm:$0xff]  ;;  %4601 = vmatpush3.msra.mxu1 %v2524_v45 }
 0x20d   :  { %796 = vst.msk [vmem:[#allocation3 + $0xd8] sm:$0xff] %vm786_vm8, %v757_v53  ;;  %v2523_v53 = vld [vmem:[#allocation11 + $0x168] sm:$0xff]  ;;  %4602 = vmatprep.subr.mxu1 %v2539_v15 }
 0x20e   :  { %4603 = vmatpush3.msra.mxu1 %v2523_v53 }
 0x20f   :  { %v936_v24 = vpop.permute.xlu0 %935 }
 0x210   :  { %v578_v25 = vpop.permute.xlu1 %577 }
 0x211   :  { %616 = vst.msk [vmem:[#allocation3 + $0xf0] sm:$0xff] %vm605_vm6, %v578_v25  ;;  %v2522_v25 = vld [vmem:[#allocation11 + $0x160] sm:$0xff] }
 0x213   :  { %v870_v29 = vpop.permute.xlu0 %869  ;;  %v1117_v63 = vld [vmem:[#allocation3 + $0xe0] sm:$0xff] }
 0x214   :  { %907 = vst.msk [vmem:[#allocation3 + $0xf8] sm:$0xff] %vm605_vm6, %v870_v29  ;;  %v692_v23 = vpop.permute.xlu1 %691  ;;  %1337 = vmatprep.mubr.f32.mxu1 %v1117_v63  ;;  %v1116_v37 = vld [vmem:[#allocation3 + $0xd8] sm:$0xff]  ;;  %v6397_v29 = vpop.f32.mrf.mxu0 }
 0x215   :  { %973 = vst.msk [vmem:[#allocation3 + $0xf8] sm:$0xff] %vm719_vm7, %v936_v24  ;;  %730 = vst.msk [vmem:[#allocation3 + $0xf0] sm:$0xff] %vm719_vm7, %v692_v23  ;;  %1338 = vmatmul.mubr.f32.gmra.mxu1 %v1116_v37  ;;  %v2538_v24 = vld [vmem:[#allocation11 + $0x1e0] sm:$0xff]  ;;  %v2537_v23 = vld [vmem:[#allocation11 + $0x1d8] sm:$0xff] }
 0x216   :  { %4604 = vmatprep.subr.mxu1 %v2538_v24 }
 0x217   :  { %v1008_v38 = vpop.permute.xlu0 %1007  ;;  %4605 = vmatpush3.msra.mxu1 %v2522_v25  ;;  %v2503_v25 = vld [vmem:[#allocation11 + $0xc8] sm:$0xff] }
 0x218   :  { %1045 = vst.msk [vmem:[#allocation3 + $0xf8] sm:$0xff] %vm786_vm8, %v1008_v38  ;;  %v759_v17 = vpop.permute.xlu1 %758  ;;  %v2521_v38 = vld [vmem:[#allocation11 + $0x158] sm:$0xff]  ;;  %4606 = vmatprep.subr.mxu1 %v2537_v23 }
 0x219   :  { %797 = vst.msk [vmem:[#allocation3 + $0xf0] sm:$0xff] %vm786_vm8, %v759_v17  ;;  %v6399_v17 = vld [vmem:[#allocation10] ss:$0 sm:$0xff]  ;;  %4607 = vmatpush3.msra.mxu1 %v2521_v38 }
 0x21b   :  { %v872_v43 = vpop.permute.xlu0 %871 }
 0x21c   :  { %908 = vst.msk [vmem:[#allocation3 + $0x110] sm:$0xff] %vm605_vm6, %v872_v43  ;;  %v580_v44 = vpop.permute.xlu1 %579 }
 0x21d   :  { %617 = vst.msk [vmem:[#allocation3 + $0x108] sm:$0xff] %vm605_vm6, %v580_v44  ;;  %v1439_v44 = vpop.f32.mrf.mxu0 }
 0x21f   :  { %v938_v51 = vpop.permute.xlu0 %937  ;;  %v1120_v47 = vld [vmem:[#allocation3 + $0xf8] sm:$0xff] }
 0x220   :  { %974 = vst.msk [vmem:[#allocation3 + $0x110] sm:$0xff] %vm719_vm7, %v938_v51  ;;  %v694_v32 = vpop.permute.xlu1 %693  ;;  %1342 = vmatprep.mubr.f32.mxu1 %v1120_v47  ;;  %v1119_v52 = vld [vmem:[#allocation3 + $0xf0] sm:$0xff] }
 0x221   :  { %731 = vst.msk [vmem:[#allocation3 + $0x108] sm:$0xff] %vm719_vm7, %v694_v32  ;;  %1343 = vmatmul.mubr.f32.gmra.mxu1 %v1119_v52  ;;  %v2536_v47 = vld [vmem:[#allocation11 + $0x1d0] sm:$0xff]  ;;  %v2535_v52 = vld [vmem:[#allocation11 + $0x1c8] sm:$0xff] }
 0x222   :  { %v2520_v32 = vld [vmem:[#allocation11 + $0x150] sm:$0xff]  ;;  %4608 = vmatprep.subr.mxu1 %v2536_v47 }
 0x223   :  { %v1010_v57 = vpop.permute.xlu0 %1009  ;;  %4609 = vmatpush3.msra.mxu1 %v2520_v32 }
 0x224   :  { %1046 = vst.msk [vmem:[#allocation3 + $0x110] sm:$0xff] %vm786_vm8, %v1010_v57  ;;  %v761_v2 = vpop.permute.xlu1 %760  ;;  %4610 = vmatprep.subr.mxu1 %v2535_v52 }
 0x225   :  { %798 = vst.msk [vmem:[#allocation3 + $0x108] sm:$0xff] %vm786_vm8, %v761_v2  ;;  %v2519_v2 = vld [vmem:[#allocation11 + $0x148] sm:$0xff] }
 0x226   :  { %4611 = vmatpush3.msra.mxu1 %v2519_v2 }
 0x227   :  { %v940_v40 = vpop.permute.xlu0 %939 }
 0x228   :  { %v582_v58 = vpop.permute.xlu1 %581 }
 0x229   :  { %618 = vst.msk [vmem:[#allocation3 + $0x120] sm:$0xff] %vm605_vm6, %v582_v58  ;;  %v5185_v58 = vpop.f32.mrf.mxu0 }
 0x22b   :  { %v874_v62 = vpop.permute.xlu0 %873  ;;  %v1123_v36 = vld [vmem:[#allocation3 + $0x110] sm:$0xff] }
 0x22c   :  { %909 = vst.msk [vmem:[#allocation3 + $0x128] sm:$0xff] %vm605_vm6, %v874_v62  ;;  %v696_v42 = vpop.permute.xlu1 %695  ;;  %1347 = vmatprep.mubr.f32.mxu1 %v1123_v36  ;;  %v1122_v3 = vld [vmem:[#allocation3 + $0x108] sm:$0xff] }
 0x22d   :  { %975 = vst.msk [vmem:[#allocation3 + $0x128] sm:$0xff] %vm719_vm7, %v940_v40  ;;  %732 = vst.msk [vmem:[#allocation3 + $0x120] sm:$0xff] %vm719_vm7, %v696_v42  ;;  %1348 = vmatmul.mubr.f32.gmra.mxu1 %v1122_v3  ;;  %v2534_v40 = vld [vmem:[#allocation11 + $0x1c0] sm:$0xff]  ;;  %v2509_v42 = vld [vmem:[#allocation11 + $0xf8] sm:$0xff] }
 0x22e   :  { %v2493_v3 = vld [vmem:[#allocation11 + $0x78] sm:$0xff]  ;;  %4563 = vmatprep.subr.mxu0 %v2509_v42  ;;  %4612 = vmatprep.subr.mxu1 %v2534_v40 }
 0x22f   :  { %v1012_v7 = vpop.permute.xlu0 %1011  ;;  %4564 = vmatpush3.msra.mxu0 %v2493_v3 }
 0x230   :  { %1047 = vst.msk [vmem:[#allocation3 + $0x128] sm:$0xff] %vm786_vm8, %v1012_v7  ;;  %v763_v8 = vpop.permute.xlu1 %762  ;;  %v2508_v7 = vld [vmem:[#allocation11 + $0xf0] sm:$0xff] }
 0x231   :  { %799 = vst.msk [vmem:[#allocation3 + $0x120] sm:$0xff] %vm786_vm8, %v763_v8  ;;  %4565 = vmatprep.subr.mxu0 %v2508_v7 }
 0x233   :  { %v876_v9 = vpop.permute.xlu0 %875 }
 0x234   :  { %910 = vst.msk [vmem:[#allocation3 + $0x140] sm:$0xff] %vm605_vm6, %v876_v9  ;;  %v584_v50 = vpop.permute.xlu1 %583  ;;  %v2518_v9 = vld [vmem:[#allocation11 + $0x140] sm:$0xff] }
 0x235   :  { %619 = vst.msk [vmem:[#allocation3 + $0x138] sm:$0xff] %vm605_vm6, %v584_v50  ;;  %v2492_v50 = vld [vmem:[#allocation11 + $0x70] sm:$0xff]  ;;  %4613 = vmatpush3.msra.mxu1 %v2518_v9 }
 0x236   :  { %4566 = vmatpush3.msra.mxu0 %v2492_v50 }
 0x237   :  { %v942_v10 = vpop.permute.xlu0 %941  ;;  %v1126_v12 = vld [vmem:[#allocation3 + $0x128] sm:$0xff] }
 0x238   :  { %976 = vst.msk [vmem:[#allocation3 + $0x140] sm:$0xff] %vm719_vm7, %v942_v10  ;;  %v698_v55 = vpop.permute.xlu1 %697  ;;  %1352 = vmatprep.mubr.f32.mxu1 %v1126_v12  ;;  %v1125_v13 = vld [vmem:[#allocation3 + $0x120] sm:$0xff]  ;;  %v5445_v10 = vmov 1983009808  }
 0x239   :  { %733 = vst.msk [vmem:[#allocation3 + $0x138] sm:$0xff] %vm719_vm7, %v698_v55  ;;  %1353 = vmatmul.mubr.f32.gmra.mxu1 %v1125_v13  ;;  %v1537_v12 = vunpack.c.l.s4 %v5445_v10  ;;  %v1539_v55 = vlaneseq }
 0x23b   :  { %v1014_v60 = vpop.permute.xlu0 %1013 }
 0x23c   :  { %1048 = vst.msk [vmem:[#allocation3 + $0x140] sm:$0xff] %vm786_vm8, %v1014_v60  ;;  %v765_v4 = vpop.permute.xlu1 %764  ;;  %v2533_v60 = vld [vmem:[#allocation11 + $0x1b8] sm:$0xff] }
 0x23d   :  { %800 = vst.msk [vmem:[#allocation3 + $0x138] sm:$0xff] %vm786_vm8, %v765_v4  ;;  %v2507_v4 = vld [vmem:[#allocation11 + $0xe8] sm:$0xff]  ;;  %4614 = vmatprep.subr.mxu1 %v2533_v60 }
 0x23e   :  { %4567 = vmatprep.subr.mxu0 %v2507_v4 }
 0x23f   :  { %v944_v19 = vpop.permute.xlu0 %943 }
 0x240   :  { %v586_v20 = vpop.permute.xlu1 %585 }
 0x241   :  { %620 = vst.msk [vmem:[#allocation3 + $0x150] sm:$0xff] %vm605_vm6, %v586_v20 }
 0x243   :  { %v878_v11 = vpop.permute.xlu0 %877  ;;  %v1129_v21 = vld [vmem:[#allocation3 + $0x140] sm:$0xff] }
 0x244   :  { %911 = vst.msk [vmem:[#allocation3 + $0x158] sm:$0xff] %vm605_vm6, %v878_v11  ;;  %v700_v18 = vpop.permute.xlu1 %699  ;;  %1357 = vmatprep.mubr.f32.mxu1 %v1129_v21  ;;  %v1128_v22 = vld [vmem:[#allocation3 + $0x138] sm:$0xff] }
 0x245   :  { %977 = vst.msk [vmem:[#allocation3 + $0x158] sm:$0xff] %vm719_vm7, %v944_v19  ;;  %734 = vst.msk [vmem:[#allocation3 + $0x150] sm:$0xff] %vm719_vm7, %v700_v18  ;;  %1358 = vmatmul.mubr.f32.gmra.mxu1 %v1128_v22  ;;  %v2517_v21 = vld [vmem:[#allocation11 + $0x138] sm:$0xff]  ;;  %v2491_v18 = vld [vmem:[#allocation11 + $0x68] sm:$0xff]  ;;  %v1449_v22 = vpop.f32.mrf.mxu0 }
 0x246   :  { %4615 = vmatpush3.msra.mxu1 %v2517_v21  ;;  %4568 = vmatpush3.msra.mxu0 %v2491_v18 }
 0x247   :  { %v1016_v1 = vpop.permute.xlu0 %1015 }
 0x248   :  { %1049 = vst.msk [vmem:[#allocation3 + $0x158] sm:$0xff] %vm786_vm8, %v1016_v1  ;;  %v767_v33 = vpop.permute.xlu1 %766 }
 0x249   :  { %801 = vst.msk [vmem:[#allocation3 + $0x150] sm:$0xff] %vm786_vm8, %v767_v33  ;;  %v2506_v33 = vld [vmem:[#allocation11 + $0xe0] sm:$0xff] }
 0x24a   :  { %4569 = vmatprep.subr.mxu0 %v2506_v33 }
 0x24b   :  { %v880_v34 = vpop.permute.xlu0 %879 }
 0x24c   :  { %912 = vst.msk [vmem:[#allocation3 + $0x170] sm:$0xff] %vm605_vm6, %v880_v34  ;;  %v588_v39 = vpop.permute.xlu1 %587  ;;  %v2532_v34 = vld [vmem:[#allocation11 + $0x1b0] sm:$0xff] }
 0x24d   :  { %621 = vst.msk [vmem:[#allocation3 + $0x168] sm:$0xff] %vm605_vm6, %v588_v39  ;;  %4616 = vmatprep.subr.mxu1 %v2532_v34 }
 0x24f   :  { %v946_v48 = vpop.permute.xlu0 %945  ;;  %v1132_v46 = vld [vmem:[#allocation3 + $0x158] sm:$0xff] }
 0x250   :  { %978 = vst.msk [vmem:[#allocation3 + $0x170] sm:$0xff] %vm719_vm7, %v946_v48  ;;  %v702_v54 = vpop.permute.xlu1 %701  ;;  %1362 = vmatprep.mubr.f32.mxu1 %v1132_v46  ;;  %v1131_v59 = vld [vmem:[#allocation3 + $0x150] sm:$0xff]  ;;  %v2490_v46 = vld [vmem:[#allocation11 + $0x60] sm:$0xff] }
 0x251   :  { %735 = vst.msk [vmem:[#allocation3 + $0x168] sm:$0xff] %vm719_vm7, %v702_v54  ;;  %1363 = vmatmul.mubr.f32.gmra.mxu1 %v1131_v59  ;;  %v2516_v54 = vld [vmem:[#allocation11 + $0x130] sm:$0xff]  ;;  %v5188_v59 = vpop.f32.mrf.mxu0  ;;  %4570 = vmatpush3.msra.mxu0 %v2490_v46 }
 0x252   :  { %4617 = vmatpush3.msra.mxu1 %v2516_v54 }
 0x253   :  { %v1018_v30 = vpop.permute.xlu0 %1017  ;;  %v1459_v15 = vpop.f32.mrf.mxu0 }
 0x254   :  { %1050 = vst.msk [vmem:[#allocation3 + $0x170] sm:$0xff] %vm786_vm8, %v1018_v30  ;;  %v769_v31 = vpop.permute.xlu1 %768  ;;  %v1538_v30 = vunpack.c.0.s8 %v1537_v12 }
 0x255   :  { %802 = vst.msk [vmem:[#allocation3 + $0x168] sm:$0xff] %vm786_vm8, %v769_v31  ;;  %v1540_v31 = vshrl.u32 %v1539_v55, 7 }
 0x257   :  { %v6407_v53 = vsub.s32 %v1538_v30, %v1540_v31 }
 0x25b   :  { %v1135_v61 = vld [vmem:[#allocation3 + $0x170] sm:$0xff] }
 0x25c   :  { %1367 = vmatprep.mubr.f32.mxu1 %v1135_v61  ;;  %v1134_v6 = vld [vmem:[#allocation3 + $0x168] sm:$0xff] }
 0x25d   :  { %1368 = vmatmul.mubr.f32.gmra.mxu1 %v1134_v6 }
 0x27b   :  { %v4495_v14 = vpop.f32.mrf.mxu1 }
 0x27d   :  { %v4496_v16 = vpop.f32.mrf.mxu1 }
 0x27e   :  { %v4497_v37 = vadd.f32 %v4496_v16, %v4495_v14  ;;  %v2505_v14 = vld [vmem:[#allocation11 + $0xd8] sm:$0xff]  ;;  %v2531_v16 = vld [vmem:[#allocation11 + $0x1a8] sm:$0xff] }
 0x27f   :  { %4571 = vmatprep.subr.mxu0 %v2505_v14  ;;  %4618 = vmatprep.subr.mxu1 %v2531_v16  ;;  %v2486_v14 = vld [vmem:[#allocation11 + $0x40] sm:$0xff] }
 0x280   :  { %v1295_v57 = vadd.f32 %v4497_v37, %v6399_v17  ;;  %v2487_v37 = vld [vmem:[#allocation11 + $0x48] sm:$0xff] }
 0x282   :  { %v1440_v19 = vadd.f32 %v1439_v44, %v1295_v57  ;;  %v6409_v44 = vpop.f32.mrf.mxu0 }
 0x284   :  { %v1469_v42 = vpop.f32.mrf.mxu0 }
 0x28d   :  { %v4498_v41 = vpop.f32.mrf.mxu1 }
 0x28f   :  { %v4499_v26 = vpop.f32.mrf.mxu1 }
 0x290   :  { %v4500_v51 = vadd.f32 %v4499_v26, %v4498_v41  ;;  %v1518_v41 = vmax.f32 %v1440_v19, 0.0 }
 0x292   :  { %v1300_v13 = vadd.f32 %v4500_v51, %v6399_v17  ;;  %v6413_v52 = vrot.slane %v1518_v41, %v6407_v53 }
 0x293   :  { %v4501_v27 = vpop.f32.mrf.mxu1 }
 0x294   :  { %v1445_v61 = vadd.f32 %v6397_v29, %v1300_v13  ;;  %v1600_v29 = vcombine.high %v1518_v41, %v1518_v41  ;;  %v6425_v9 = vcombine.high %v6413_v52, %v6413_v52  ;;  %v1566_v60 = vrot.slane %v6413_v52, 1 }
 0x295   :  { %v4502_v28 = vpop.f32.mrf.mxu1 }
 0x296   :  { %v4503_v62 = vadd.f32 %v4502_v28, %v4501_v27  ;;  %v2489_v27 = vld [vmem:[#allocation11 + $0x58] sm:$0xff]  ;;  %v2515_v28 = vld [vmem:[#allocation11 + $0x128] sm:$0xff]  ;;  %v1519_v24 = vmax.f32 %v1445_v61, 0.0  ;;  %v6416_v2 = vrot.slane %v1600_v29, %v6407_v53  ;;  %v1589_v46 = vrot.slane %v6425_v9, 1  ;;  %v2502_v61 = vld [vmem:[#allocation11 + $0xc0] sm:$0xff] }
 0x297   :  { %4572 = vmatpush3.msra.mxu0 %v2489_v27  ;;  %4619 = vmatpush3.msra.mxu1 %v2515_v28  ;;  %v2514_v28 = vld [vmem:[#allocation11 + $0x120] sm:$0xff] }
 0x298   :  { %v1305_v1 = vadd.f32 %v4503_v62, %v6399_v17  ;;  %4573 = vmatprep.subr.mxu0 %v2504_v56  ;;  %v1716_v57 = vcombine.high %v1519_v24, %v1519_v24  ;;  %v6419_v62 = vrot.slane %v1519_v24, %v6407_v53  ;;  %v6432_v10 = vcombine.high %v6416_v2, %v6416_v2  ;;  %v2485_v24 = vld [vmem:[#allocation11 + $0x38] sm:$0xff] }
 0x299   :  { %v1625_v21 = vrot.slane %v6416_v2, 1 }
 0x29a   :  { %v1450_v35 = vadd.f32 %v1449_v22, %v1305_v1  ;;  %v6428_v50 = vrot.slane %v1716_v57, %v6407_v53  ;;  %v6440_v4 = vcombine.high %v6419_v62, %v6419_v62  ;;  %v1683_v54 = vrot.slane %v6419_v62, 1  ;;  %v2484_v57 = vld [vmem:[#allocation11 + $0x30] sm:$0xff] }
 0x29b   :  { %v1647_v31 = vrot.slane %v6432_v10, 1 }
 0x29c   :  { %v1520_v38 = vmax.f32 %v1450_v35, 0.0  ;;  %v6457_v34 = vcombine.high %v6428_v50, %v6428_v50  ;;  %v1705_v16 = vrot.slane %v6440_v4, 1  ;;  %v1741_v56 = vrot.slane %v6428_v50, 1 }
 0x29e   :  { %v6435_v12 = vrot.slane %v1520_v38, %v6407_v53 }
 0x2a5   :  { %v4504_v5 = vpop.f32.mrf.mxu1 }
 0x2a7   :  { %v4505_v63 = vpop.f32.mrf.mxu1 }
 0x2a8   :  { %v4506_v8 = vadd.f32 %v4505_v63, %v4504_v5  ;;  %v2488_v5 = vld [vmem:[#allocation11 + $0x50] sm:$0xff] }
 0x2a9   :  { %4574 = vmatpush3.msra.mxu0 %v2488_v5 }
 0x2aa   :  { %v1310_v39 = vadd.f32 %v4506_v8, %v6399_v17  ;;  %4575 = vmatprep.subr.mxu0 %v2503_v25  ;;  %v1799_v25 = vrot.slane %v6435_v12, 1 }
 0x2ab   :  { %v4507_v43 = vpop.f32.mrf.mxu1  ;;  %4576 = vmatpush3.msra.mxu0 %v2487_v37 }
 0x2ac   :  { %v1455_v49 = vadd.f32 %v5185_v58, %v1310_v39  ;;  %4577 = vmatprep.subr.mxu0 %v2502_v61 }
 0x2ad   :  { %v4508_v36 = vpop.f32.mrf.mxu1  ;;  %4578 = vmatpush3.msra.mxu0 %v2486_v14 }
 0x2ae   :  { %v4509_v20 = vadd.f32 %v4508_v36, %v4507_v43  ;;  %v1521_v51 = vmax.f32 %v1455_v49, 0.0  ;;  %v1832_v36 = vcombine.high %v1520_v38, %v1520_v38 }
 0x2b0   :  { %v1315_v26 = vadd.f32 %v4509_v20, %v6399_v17  ;;  %v1948_v3 = vcombine.high %v1521_v51, %v1521_v51  ;;  %v6443_v19 = vrot.slane %v1832_v36, %v6407_v53  ;;  %v6446_v20 = vrot.slane %v1521_v51, %v6407_v53 }
 0x2b2   :  { %v1460_v63 = vadd.f32 %v1459_v15, %v1315_v26  ;;  %v6452_v18 = vrot.slane %v1948_v3, %v6407_v53  ;;  %v6475_v41 = vcombine.high %v6443_v19, %v6443_v19  ;;  %v6479_v26 = vcombine.high %v6446_v20, %v6446_v20  ;;  %v2501_v15 = vld [vmem:[#allocation11 + $0xb8] sm:$0xff] }
 0x2b3   :  { %4579 = vmatprep.subr.mxu0 %v2501_v15  ;;  %v1857_v38 = vrot.slane %v6443_v19, 1  ;;  %v2513_v3 = vld [vmem:[#allocation11 + $0x118] sm:$0xff] }
 0x2b4   :  { %v1522_v40 = vmax.f32 %v1460_v63, 0.0  ;;  %v6485_v49 = vcombine.high %v6452_v18, %v6452_v18  ;;  %4580 = vmatpush3.msra.mxu0 %v2485_v24 }
 0x2b6   :  { %v2064_v55 = vcombine.high %v1522_v40, %v1522_v40  ;;  %v6460_v39 = vrot.slane %v1522_v40, %v6407_v53  ;;  %v1915_v40 = vrot.slane %v6446_v20, 1 }
 0x2b8   :  { %v6469_v30 = vrot.slane %v2064_v55, %v6407_v53  ;;  %v6490_v29 = vcombine.high %v6460_v39, %v6460_v39 }
 0x2b9   :  { %v4510_v11 = vpop.f32.mrf.mxu1 }
 0x2bb   :  { %v4511_v48 = vpop.f32.mrf.mxu1 }
 0x2bc   :  { %v4512_v6 = vadd.f32 %v4511_v48, %v4510_v11  ;;  %v6448_v11 = vpop.f32.mrf.mxu0 }
 0x2be   :  { %v1320_v47 = vadd.f32 %v4512_v6, %v6399_v17  ;;  %v2530_v6 = vld [vmem:[#allocation11 + $0x1a0] sm:$0xff]  ;;  %v1479_v35 = vpop.f32.mrf.mxu0 }
 0x2bf   :  { %4620 = vmatprep.subr.mxu1 %v2530_v6 }
 0x2c0   :  { %v4513_v45 = vpop.f32.mrf.mxu1  ;;  %v1465_v7 = vadd.f32 %v5188_v59, %v1320_v47  ;;  %v6466_v59 = vcombine.high %v6435_v12, %v6435_v12  ;;  %4621 = vmatpush3.msra.mxu1 %v2514_v28  ;;  %v2500_v47 = vld [vmem:[#allocation11 + $0xb0] sm:$0xff] }
 0x2c1   :  { %4581 = vmatprep.subr.mxu0 %v2500_v47  ;;  %v2528_v28 = vld [vmem:[#allocation11 + $0x190] sm:$0xff] }
 0x2c2   :  { %v4514_v23 = vpop.f32.mrf.mxu1  ;;  %v1523_v22 = vmax.f32 %v1465_v7, 0.0  ;;  %v1821_v37 = vrot.slane %v6466_v59, 1  ;;  %4582 = vmatpush3.msra.mxu0 %v2484_v57 }
 0x2c3   :  { %v4515_v43 = vadd.f32 %v4514_v23, %v4513_v45  ;;  %v1763_v23 = vrot.slane %v6457_v34, 1 }
 0x2c4   :  { %v4516_v32 = vpop.f32.mrf.mxu1  ;;  %v2180_v45 = vcombine.high %v1523_v22, %v1523_v22  ;;  %v6500_v51 = vrot.slane %v1523_v22, %v6407_v53 }
 0x2c5   :  { %v1325_v1 = vadd.f32 %v4515_v43, %v6399_v17  ;;  %v6497_v43 = vcombine.high %v6469_v30, %v6469_v30 }
 0x2c6   :  { %v4517_v58 = vpop.f32.mrf.mxu1  ;;  %v6507_v55 = vrot.slane %v2180_v45, %v6407_v53  ;;  %v2512_v45 = vld [vmem:[#allocation11 + $0x110] sm:$0xff]  ;;  %v6519_v24 = vcombine.high %v6500_v51, %v6500_v51 }
 0x2c7   :  { %v6421_v8 = vadd.f32 %v4517_v58, %v4516_v32  ;;  %v1470_v5 = vadd.f32 %v1469_v42, %v1325_v1  ;;  %v2529_v32 = vld [vmem:[#allocation11 + $0x198] sm:$0xff]  ;;  %v1937_v58 = vrot.slane %v6479_v26, 1  ;;  %v1879_v42 = vrot.slane %v6475_v41, 1  ;;  %v2499_v1 = vld [vmem:[#allocation11 + $0xa8] sm:$0xff] }
 0x2c8   :  { %4622 = vmatprep.subr.mxu1 %v2529_v32  ;;  %4583 = vmatprep.subr.mxu0 %v2499_v1  ;;  %v2497_v32 = vld [vmem:[#allocation11 + $0x98] sm:$0xff]  ;;  %v6528_v15 = vcombine.high %v6507_v55, %v6507_v55 }
 0x2c9   :  { %v4519_v13 = vpop.f32.mrf.mxu1  ;;  %4623 = vmatpush3.msra.mxu1 %v2513_v3 }
 0x2ca   :  { %4624 = vmatprep.subr.mxu1 %v2528_v28 }
 0x2cb   :  { %v4520_v33 = vpop.f32.mrf.mxu1  ;;  %4625 = vmatpush3.msra.mxu1 %v2512_v45 }
 0x2cc   :  { %v4521_v48 = vadd.f32 %v4520_v33, %v4519_v13  ;;  %v6509_v13 = vmax.f32 %v1470_v5, 0.0  ;;  %v2483_v33 = vld [vmem:[#allocation11 + $0x28] sm:$0xff] }
 0x2cd   :  { %4584 = vmatpush3.msra.mxu0 %v2483_v33 }
 0x2ce   :  { %v1335_v27 = vadd.f32 %v4521_v48, %v6399_v17  ;;  %v2498_v48 = vld [vmem:[#allocation11 + $0xa0] sm:$0xff]  ;;  %v6532_v33 = vrot.slane %v6509_v13, %v6407_v53 }
 0x2cf   :  { %4585 = vmatprep.subr.mxu0 %v2498_v48 }
 0x2d0   :  { %v1480_v63 = vadd.f32 %v1479_v35, %v1335_v27  ;;  %v2482_v35 = vld [vmem:[#allocation11 + $0x20] sm:$0xff] }
 0x2d1   :  { %4586 = vmatpush3.msra.mxu0 %v2482_v35  ;;  %v2496_v35 = vld [vmem:[#allocation11 + $0x90] sm:$0xff] }
 0x2d2   :  { %v1526_v36 = vmax.f32 %v1480_v63, 0.0  ;;  %4587 = vmatprep.subr.mxu0 %v2497_v32  ;;  %v2511_v32 = vld [vmem:[#allocation11 + $0x108] sm:$0xff] }
 0x2d3   :  { %4588 = vmatpush3.msra.mxu0 %v2481_v0 }
 0x2d4   :  { %v1549_v14 = vrot.slane %v1526_v36, %v6407_v53  ;;  %v1608_v27 = vcombine.high %v1526_v36, %v1526_v36  ;;  %4589 = vmatprep.subr.mxu0 %v2496_v35  ;;  %v2526_v35 = vld [vmem:[#allocation11 + $0x180] sm:$0xff] }
 0x2d5   :  { %v4522_v63 = vpop.f32.mrf.mxu1 }
 0x2d6   :  { %v1615_v57 = vrot.slane %v1608_v27, %v6407_v53  ;;  %v1569_v36 = vsel %vm1555_vm9, %v1549_v14, %v1566_v60  ;;  %v1579_v3 = vcombine.high %v1549_v14, %v1549_v14  ;;  %v1554_v1 = vrot.slane %v1549_v14, 7 }
 0x2d7   :  { %v6536_v27 = vadd.f32 %v6421_v8, %v6399_v17  ;;  %v4523_v28 = vpop.f32.mrf.mxu1  ;;  %v1570_v60 = vsel %vm1557_vm10, %v1549_v14, %v1569_v36 }
 0x2d8   :  { %v4524_v47 = vadd.f32 %v4523_v28, %v4522_v63  ;;  %v1571_v48 = vsel %vm1559_vm11, %v1549_v14, %v1570_v60  ;;  %v1592_v45 = vsel %vm1555_vm9, %v1579_v3, %v1589_v46  ;;  %v1628_v5 = vsel %vm1555_vm9, %v1615_v57, %v1625_v21  ;;  %v2527_v63 = vld [vmem:[#allocation11 + $0x188] sm:$0xff] }
 0x2d9   :  { %v1572_v6 = vsel %vm1561_vm12, %v1549_v14, %v1571_v48  ;;  %v1593_v8 = vsel %vm1557_vm10, %v1579_v3, %v1592_v45  ;;  %v1629_v61 = vsel %vm1557_vm10, %v1615_v57, %v1628_v5  ;;  %v1637_v36 = vcombine.high %v1615_v57, %v1615_v57  ;;  %v2480_v14 = vld [vmem:[#allocation11 + $0x10] sm:$0xff]  ;;  %4626 = vmatprep.subr.mxu1 %v2527_v63 }
 0x2da   :  { %v1340_v28 = vadd.f32 %v4524_v47, %v6399_v17  ;;  %1573 = vrot.lane.b32.xlu0 %v1572_v6, %s5442_s27  ;;  %v1594_v46 = vsel %vm1559_vm11, %v1579_v3, %v1593_v8  ;;  %v1630_v60 = vsel %vm1559_vm11, %v1615_v57, %v1629_v61  ;;  %v1556_v21 = vsel %vm1555_vm9, %v1554_v1, %v6413_v52  ;;  %v2495_v6 = vld [vmem:[#allocation11 + $0x88] sm:$0xff] }
 0x2db   :  { %v1595_v48 = vsel %vm1561_vm12, %v1579_v3, %v1594_v46  ;;  %v1631_v5 = vsel %vm1561_vm12, %v1615_v57, %v1630_v60  ;;  %v1650_v0 = vsel %vm1555_vm9, %v1637_v36, %v1647_v31  ;;  %v1558_v47 = vsel %vm1557_vm10, %v1554_v1, %v1556_v21  ;;  %v2479_v46 = vld [vmem:[#allocation11 + $0x8] sm:$0xff]  ;;  %4590 = vmatpush3.msra.mxu0 %v2480_v14 }
 0x2dc   :  { %v1485_v45 = vadd.f32 %v6448_v11, %v1340_v28  ;;  %1596 = vrot.lane.b32.xlu1 %v1595_v48, %s5442_s27  ;;  %v1651_v52 = vsel %vm1557_vm10, %v1637_v36, %v1650_v0  ;;  %v1560_v61 = vsel %vm1559_vm11, %v1554_v1, %v1558_v47  ;;  %v1582_v8 = vrot.slane %v1579_v3, 7  ;;  %4627 = vmatpush3.msra.mxu1 %v2511_v32  ;;  %v2573_v47 = vld [vmem:[#allocation11 + $0x2f8] sm:$0xff] }
 0x2dd   :  { %v1652_v60 = vsel %vm1559_vm11, %v1637_v36, %v1651_v52  ;;  %v1562_v22 = vsel %vm1561_vm12, %v1554_v1, %v1560_v61  ;;  %v1618_v31 = vrot.slane %v1615_v57, 7  ;;  %v1640_v7 = vrot.slane %v1637_v36, 7  ;;  %4591 = vmatprep.subr.mxu0 %v2495_v6  ;;  %v2494_v1 = vld [vmem:[#allocation11 + $0x80] sm:$0xff]  ;;  %4628 = vmatprep.subr.mxu1 %v2526_v35 }
 0x2de   :  { %v2296_v11 = vcombine.high %v6509_v13, %v6509_v13  ;;  %v1527_v28 = vmax.f32 %v1485_v45, 0.0  ;;  %1632 = vrot.lane.b32.xlu0 %v1631_v5, %s5442_s27  ;;  %v1653_v21 = vsel %vm1561_vm12, %v1637_v36, %v1652_v60  ;;  %1565 = vst.msk [vmem:[#allocation4] sm:$0x3] %vm1564_vm13, %v1562_v22  ;;  %v1583_v3 = vsel %vm1555_vm9, %v1582_v8, %v6425_v9  ;;  %v2510_v57 = vld [vmem:[#allocation11 + $0x100] sm:$0xff] }
 0x2df   :  { %v2169_v63 = vrot.slane %v6519_v24, 1  ;;  %v1584_v14 = vsel %vm1557_vm10, %v1582_v8, %v1583_v3  ;;  %v1619_v32 = vsel %vm1555_vm9, %v1618_v31, %v6416_v2  ;;  %v1641_v48 = vsel %vm1555_vm9, %v1640_v7, %v6432_v10  ;;  %4592 = vmatpush3.msra.mxu0 %v2479_v46  ;;  %v2478_v36 = vld [vmem:[#allocation11] sm:$0xff]  ;;  %4629 = vmatpush3.msra.mxu1 %v2510_v57 }
 0x2e0   :  { %v1673_v22 = vrot.slane %v1527_v28, %v6407_v53  ;;  %v1724_v5 = vcombine.high %v1527_v28, %v1527_v28  ;;  %1654 = vrot.lane.b32.xlu1 %v1653_v21, %s5442_s27  ;;  %v1585_v9 = vsel %vm1559_vm11, %v1582_v8, %v1584_v14  ;;  %v1620_v0 = vsel %vm1557_vm10, %v1618_v31, %v1619_v32  ;;  %v2605_v28 = vld [vmem:[#allocation11 + $0x3f8] sm:$0xff] }
 0x2e1   :  { %v2205_v6 = vrot.slane %v6507_v55, 1  ;;  %v4525_v45 = vpop.f32.mrf.mxu1  ;;  %v1586_v2 = vsel %vm1561_vm12, %v1582_v8, %v1585_v9  ;;  %v1621_v10 = vsel %vm1559_vm11, %v1618_v31, %v1620_v0  ;;  %v1642_v52 = vsel %vm1557_vm10, %v1640_v7, %v1641_v48  ;;  %4593 = vmatprep.subr.mxu0 %v2494_v1  ;;  %v6594_v8 = vpop.f32.mrf.mxu0  ;;  %4668 = vmatprep.subr.mxu1 %v2605_v28 }
 0x2e2   :  { %v1731_v61 = vrot.slane %v1724_v5, %v6407_v53  ;;  %v1686_v46 = vsel %vm1555_vm9, %v1673_v22, %v1683_v54  ;;  %v1695_v60 = vcombine.high %v1673_v22, %v1673_v22  ;;  %1588 = vst.msk [vmem:[#allocation4 + $0x2] sm:$0x3] %vm1564_vm13, %v1586_v2  ;;  %v1622_v35 = vsel %vm1561_vm12, %v1618_v31, %v1621_v10 }
 0x2e3   :  { %4594 = vmatpush3.msra.mxu0 %v2478_v36  ;;  %v4526_v21 = vpop.f32.mrf.mxu1  ;;  %v1687_v3 = vsel %vm1557_vm10, %v1673_v22, %v1686_v46  ;;  %v2227_v1 = vrot.slane %v6528_v15, 1  ;;  %1624 = vst.msk [vmem:[#allocation4 + $0x4] sm:$0x3] %vm1564_vm13, %v1622_v35  ;;  %v1643_v57 = vsel %vm1559_vm11, %v1640_v7, %v1642_v52  ;;  %v1676_v14 = vrot.slane %v1673_v22, 7  ;;  %v1489_v10 = vpop.f32.mrf.mxu0 }
 0x2e4   :  { %4633 = vmatprep.subr.mxu0 %v2573_v47  ;;  %v4527_v54 = vadd.f32 %v4526_v21, %v4525_v45  ;;  %v1688_v32 = vsel %vm1559_vm11, %v1673_v22, %v1687_v3  ;;  %v1708_v31 = vsel %vm1555_vm9, %v1695_v60, %v1705_v16  ;;  %v1744_v48 = vsel %vm1555_vm9, %v1731_v61, %v1741_v56 }
 0x2e5   :  { %v1689_v36 = vsel %vm1561_vm12, %v1673_v22, %v1688_v32  ;;  %v1709_v5 = vsel %vm1557_vm10, %v1695_v60, %v1708_v31  ;;  %v1745_v9 = vsel %vm1557_vm10, %v1731_v61, %v1744_v48  ;;  %v1753_v0 = vcombine.high %v1731_v61, %v1731_v61 }
 0x2e6   :  { %v1345_v47 = vadd.f32 %v4527_v54, %v6399_v17  ;;  %1690 = vrot.lane.b32.xlu0 %v1689_v36, %s5442_s27  ;;  %v1710_v45 = vsel %vm1559_vm11, %v1695_v60, %v1709_v5  ;;  %v1746_v2 = vsel %vm1559_vm11, %v1731_v61, %v1745_v9  ;;  %v1644_v16 = vsel %vm1561_vm12, %v1640_v7, %v1643_v57 }
 0x2e7   :  { %v1711_v56 = vsel %vm1561_vm12, %v1695_v60, %v1710_v45  ;;  %v1747_v22 = vsel %vm1561_vm12, %v1731_v61, %v1746_v2  ;;  %v1766_v52 = vsel %vm1555_vm9, %v1753_v0, %v1763_v23  ;;  %1646 = vst.msk [vmem:[#allocation4 + $0x6] sm:$0x3] %vm1564_vm13, %v1644_v16  ;;  %v1677_v46 = vsel %vm1555_vm9, %v1676_v14, %v6419_v62 }
 0x2e8   :  { %v1490_v35 = vadd.f32 %v1489_v10, %v1345_v47  ;;  %1712 = vrot.lane.b32.xlu1 %v1711_v56, %s5442_s27  ;;  %v1767_v28 = vsel %vm1557_vm10, %v1753_v0, %v1766_v52  ;;  %v1678_v7 = vsel %vm1557_vm10, %v1676_v14, %v1677_v46  ;;  %v1698_v21 = vrot.slane %v1695_v60, 7 }
 0x2e9   :  { %v1768_v3 = vsel %vm1559_vm11, %v1753_v0, %v1767_v28  ;;  %v1679_v57 = vsel %vm1559_vm11, %v1676_v14, %v1678_v7  ;;  %v1734_v54 = vrot.slane %v1731_v61, 7  ;;  %v1756_v32 = vrot.slane %v1753_v0, 7 }
 0x2ea   :  { %v6630_v23 = vadd.f32 %v6409_v44, %v6536_v27  ;;  %v1528_v31 = vmax.f32 %v1490_v35, 0.0  ;;  %1748 = vrot.lane.b32.xlu0 %v1747_v22, %s5442_s27  ;;  %v1680_v62 = vsel %vm1561_vm12, %v1676_v14, %v1679_v57  ;;  %v1699_v48 = vsel %vm1555_vm9, %v1698_v21, %v6440_v4 }
 0x2eb   :  { %v1769_v60 = vsel %vm1561_vm12, %v1753_v0, %v1768_v3  ;;  %1682 = vst.msk [vmem:[#allocation4 + $0x8] sm:$0x3] %vm1564_vm13, %v1680_v62  ;;  %v1700_v36 = vsel %vm1557_vm10, %v1698_v21, %v1699_v48  ;;  %v1735_v61 = vsel %vm1555_vm9, %v1734_v54, %v6428_v50  ;;  %v1757_v44 = vsel %vm1555_vm9, %v1756_v32, %v6457_v34 }
 0x2ec   :  { %v1789_v27 = vrot.slane %v1528_v31, %v6407_v53  ;;  %v1840_v5 = vcombine.high %v1528_v31, %v1528_v31  ;;  %1770 = vrot.lane.b32.xlu1 %v1769_v60, %s5442_s27  ;;  %v1701_v14 = vsel %vm1559_vm11, %v1698_v21, %v1700_v36  ;;  %v1736_v4 = vsel %vm1557_vm10, %v1734_v54, %v1735_v61 }
 0x2ed   :  { %v2263_v9 = vrot.slane %v6532_v33, 1  ;;  %v4528_v0 = vpop.f32.mrf.mxu1  ;;  %v1702_v47 = vsel %vm1561_vm12, %v1698_v21, %v1701_v14  ;;  %v1737_v45 = vsel %vm1559_vm11, %v1734_v54, %v1736_v4  ;;  %v1758_v50 = vsel %vm1557_vm10, %v1756_v32, %v1757_v44 }
 0x2ee   :  { %v1847_v34 = vrot.slane %v1840_v5, %v6407_v53  ;;  %v1802_v2 = vsel %vm1555_vm9, %v1789_v27, %v1799_v25  ;;  %v1811_v16 = vcombine.high %v1789_v27, %v1789_v27  ;;  %1704 = vst.msk [vmem:[#allocation4 + $0xa] sm:$0x3] %vm1564_vm13, %v1702_v47  ;;  %v1738_v10 = vsel %vm1561_vm12, %v1734_v54, %v1737_v45 }
 0x2ef   :  { %v6659_v56 = vcombine.high %v6532_v33, %v6532_v33  ;;  %v4529_v22 = vpop.f32.mrf.mxu1  ;;  %v1803_v52 = vsel %vm1557_vm10, %v1789_v27, %v1802_v2  ;;  %1740 = vst.msk [vmem:[#allocation4 + $0xc] sm:$0x3] %vm1564_vm13, %v1738_v10  ;;  %v1759_v46 = vsel %vm1559_vm11, %v1756_v32, %v1758_v50  ;;  %v1792_v35 = vrot.slane %v1789_v27, 7 }
 0x2f0   :  { %v4530_v28 = vadd.f32 %v4529_v22, %v4528_v0  ;;  %v1804_v25 = vsel %vm1559_vm11, %v1789_v27, %v1803_v52  ;;  %v1824_v7 = vsel %vm1555_vm9, %v1811_v16, %v1821_v37  ;;  %v1860_v21 = vsel %vm1555_vm9, %v1847_v34, %v1857_v38 }
 0x2f1   :  { %v1805_v3 = vsel %vm1561_vm12, %v1789_v27, %v1804_v25  ;;  %v1825_v57 = vsel %vm1557_vm10, %v1811_v16, %v1824_v7  ;;  %v1861_v54 = vsel %vm1557_vm10, %v1847_v34, %v1860_v21  ;;  %v1869_v31 = vcombine.high %v1847_v34, %v1847_v34 }
 0x2f2   :  { %v1350_v62 = vadd.f32 %v4530_v28, %v6399_v17  ;;  %1806 = vrot.lane.b32.xlu0 %v1805_v3, %s5442_s27  ;;  %v1826_v48 = vsel %vm1559_vm11, %v1811_v16, %v1825_v57  ;;  %v1862_v60 = vsel %vm1559_vm11, %v1847_v34, %v1861_v54  ;;  %v1760_v37 = vsel %vm1561_vm12, %v1756_v32, %v1759_v46  ;;  %v6727_v3 = vpop.f32.mrf.mxu0 }
 0x2f3   :  { %v1827_v36 = vsel %vm1561_vm12, %v1811_v16, %v1826_v48  ;;  %v1863_v38 = vsel %vm1561_vm12, %v1847_v34, %v1862_v60  ;;  %v1882_v61 = vsel %vm1555_vm9, %v1869_v31, %v1879_v42  ;;  %1762 = vst.msk [vmem:[#allocation4 + $0xe] sm:$0x3] %vm1564_vm13, %v1760_v37  ;;  %v1793_v44 = vsel %vm1555_vm9, %v1792_v35, %v6435_v12 }
 0x2f4   :  { %v1495_v27 = vadd.f32 %v6594_v8, %v1350_v62  ;;  %1828 = vrot.lane.b32.xlu1 %v1827_v36, %s5442_s27  ;;  %v1883_v5 = vsel %vm1557_vm10, %v1869_v31, %v1882_v61  ;;  %v1794_v32 = vsel %vm1557_vm10, %v1792_v35, %v1793_v44  ;;  %v1814_v14 = vrot.slane %v1811_v16, 7 }
 0x2f5   :  { %v1884_v4 = vsel %vm1559_vm11, %v1869_v31, %v1883_v5  ;;  %v1795_v0 = vsel %vm1559_vm11, %v1792_v35, %v1794_v32  ;;  %v1850_v47 = vrot.slane %v1847_v34, 7  ;;  %v1872_v42 = vrot.slane %v1869_v31, 7 }
 0x2f6   :  { %v6697_v12 = vrot.slane %v2296_v11, %v6407_v53  ;;  %v1529_v8 = vmax.f32 %v1495_v27, 0.0  ;;  %1864 = vrot.lane.b32.xlu0 %v1863_v38, %s5442_s27  ;;  %v1796_v45 = vsel %vm1561_vm12, %v1792_v35, %v1795_v0  ;;  %v1815_v50 = vsel %vm1555_vm9, %v1814_v14, %v6466_v59 }
 0x2f7   :  { %v1885_v2 = vsel %vm1561_vm12, %v1869_v31, %v1884_v4  ;;  %1798 = vst.msk [vmem:[#allocation4 + $0x10] sm:$0x3] %vm1564_vm13, %v1796_v45  ;;  %v1816_v34 = vsel %vm1557_vm10, %v1814_v14, %v1815_v50  ;;  %v1851_v16 = vsel %vm1555_vm9, %v1850_v47, %v6443_v19  ;;  %v1873_v13 = vsel %vm1555_vm9, %v1872_v42, %v6475_v41  ;;  %v1499_v4 = vpop.f32.mrf.mxu0 }
 0x2f8   :  { %v1905_v11 = vrot.slane %v1529_v8, %v6407_v53  ;;  %v1956_v10 = vcombine.high %v1529_v8, %v1529_v8  ;;  %1886 = vrot.lane.b32.xlu1 %v1885_v2, %s5442_s27  ;;  %v1817_v22 = vsel %vm1559_vm11, %v1814_v14, %v1816_v34  ;;  %v1852_v59 = vsel %vm1557_vm10, %v1850_v47, %v1851_v16 }
 0x2f9   :  { %v6715_v52 = vmax.f32 %v6630_v23, 0.0  ;;  %v4531_v46 = vpop.f32.mrf.mxu1  ;;  %v1818_v35 = vsel %vm1561_vm12, %v1814_v14, %v1817_v22  ;;  %v1853_v19 = vsel %vm1559_vm11, %v1850_v47, %v1852_v59  ;;  %v1874_v28 = vsel %vm1557_vm10, %v1872_v42, %v1873_v13 }
 0x2fa   :  { %v1963_v41 = vrot.slane %v1956_v10, %v6407_v53  ;;  %v1918_v25 = vsel %vm1555_vm9, %v1905_v11, %v1915_v40  ;;  %v1927_v7 = vcombine.high %v1905_v11, %v1905_v11  ;;  %1820 = vst.msk [vmem:[#allocation4 + $0x12] sm:$0x3] %vm1564_vm13, %v1818_v35  ;;  %v1854_v21 = vsel %vm1561_vm12, %v1850_v47, %v1853_v19 }
 0x2fb   :  { %v2285_v23 = vrot.slane %v6659_v56, 1  ;;  %v4532_v57 = vpop.f32.mrf.mxu1  ;;  %v1919_v54 = vsel %vm1557_vm10, %v1905_v11, %v1918_v25  ;;  %1856 = vst.msk [vmem:[#allocation4 + $0x14] sm:$0x3] %vm1564_vm13, %v1854_v21  ;;  %v1875_v31 = vsel %vm1559_vm11, %v1872_v42, %v1874_v28  ;;  %v1908_v62 = vrot.slane %v1905_v11, 7 }
 0x2fc   :  { %v4533_v48 = vadd.f32 %v4532_v57, %v4531_v46  ;;  %v1920_v40 = vsel %vm1559_vm11, %v1905_v11, %v1919_v54  ;;  %v1940_v60 = vsel %vm1555_vm9, %v1927_v7, %v1937_v58  ;;  %v7176_v37 = vrot.slane %v6452_v18, 1 }
 0x2fd   :  { %v1921_v38 = vsel %vm1561_vm12, %v1905_v11, %v1920_v40  ;;  %v1941_v61 = vsel %vm1557_vm10, %v1927_v7, %v1940_v60  ;;  %v1985_v27 = vcombine.high %v1963_v41, %v1963_v41  ;;  %v1876_v58 = vsel %vm1561_vm12, %v1872_v42, %v1875_v31 }
 0x2fe   :  { %v1976_v36 = vsel %vm1555_vm9, %v1963_v41, %v7176_v37  ;;  %v1355_v5 = vadd.f32 %v4533_v48, %v6399_v17  ;;  %1922 = vrot.lane.b32.xlu0 %v1921_v38, %s5442_s27  ;;  %v1942_v32 = vsel %vm1559_vm11, %v1927_v7, %v1941_v61  ;;  %v7177_v8 = vrot.slane %v6485_v49, 1  ;;  %1878 = vst.msk [vmem:[#allocation4 + $0x16] sm:$0x3] %vm1564_vm13, %v1876_v58 }
 0x2ff   :  { %v1977_v44 = vsel %vm1557_vm10, %v1963_v41, %v1976_v36  ;;  %v1943_v0 = vsel %vm1561_vm12, %v1927_v7, %v1942_v32  ;;  %v1909_v50 = vsel %vm1555_vm9, %v1908_v62, %v6446_v20  ;;  %v1930_v16 = vrot.slane %v1927_v7, 7 }
 0x300   :  { %v1978_v14 = vsel %vm1559_vm11, %v1963_v41, %v1977_v44  ;;  %v1998_v45 = vsel %vm1555_vm9, %v1985_v27, %v7177_v8  ;;  %v1500_v2 = vadd.f32 %v1499_v4, %v1355_v5  ;;  %1944 = vrot.lane.b32.xlu1 %v1943_v0, %s5442_s27  ;;  %v1910_v42 = vsel %vm1557_vm10, %v1908_v62, %v1909_v50 }
 0x301   :  { %v1979_v47 = vsel %vm1561_vm12, %v1963_v41, %v1978_v14  ;;  %v1999_v34 = vsel %vm1557_vm10, %v1985_v27, %v1998_v45  ;;  %v1911_v11 = vsel %vm1559_vm11, %v1908_v62, %v1910_v42  ;;  %v1966_v10 = vrot.slane %v1963_v41, 7 }
 0x302   :  { %v2000_v13 = vsel %vm1559_vm11, %v1985_v27, %v1999_v34  ;;  %v1988_v22 = vrot.slane %v1985_v27, 7  ;;  %v2321_v59 = vrot.slane %v6697_v12, 1  ;;  %v1530_v46 = vmax.f32 %v1500_v2, 0.0  ;;  %1980 = vrot.lane.b32.xlu0 %v1979_v47, %s5442_s27 }
 0x303   :  { %v1912_v20 = vsel %vm1561_vm12, %v1908_v62, %v1911_v11  ;;  %v1931_v35 = vsel %vm1555_vm9, %v1930_v16, %v6479_v26  ;;  %v2001_v19 = vsel %vm1561_vm12, %v1985_v27, %v2000_v13  ;;  %v1967_v41 = vsel %vm1555_vm9, %v1966_v10, %v6452_v18 }
 0x304   :  { %1914 = vst.msk [vmem:[#allocation4 + $0x18] sm:$0x3] %vm1564_vm13, %v1912_v20  ;;  %v1932_v28 = vsel %vm1557_vm10, %v1930_v16, %v1931_v35  ;;  %v1989_v25 = vsel %vm1555_vm9, %v1988_v22, %v6485_v49  ;;  %v2021_v7 = vrot.slane %v1530_v46, %v6407_v53  ;;  %v2072_v21 = vcombine.high %v1530_v46, %v1530_v46 }
 0x305   :  { %2002 = vrot.lane.b32.xlu1 %v2001_v19, %s5442_s27  ;;  %v1933_v57 = vsel %vm1559_vm11, %v1930_v16, %v1932_v28  ;;  %v1968_v26 = vsel %vm1557_vm10, %v1966_v10, %v1967_v41  ;;  %v6778_v54 = vcombine.high %v6697_v12, %v6697_v12  ;;  %v4534_v31 = vpop.f32.mrf.mxu1  ;;  %v1990_v49 = vsel %vm1557_vm10, %v1988_v22, %v1989_v25 }
 0x306   :  { %v1934_v62 = vsel %vm1561_vm12, %v1930_v16, %v1933_v57  ;;  %v1969_v18 = vsel %vm1559_vm11, %v1966_v10, %v1968_v26  ;;  %v2079_v48 = vrot.slane %v2072_v21, %v6407_v53  ;;  %v7178_v40 = vrot.slane %v6460_v39, 1 }
 0x307   :  { %v2043_v37 = vcombine.high %v2021_v7, %v2021_v7  ;;  %1936 = vst.msk [vmem:[#allocation4 + $0x1a] sm:$0x3] %vm1564_vm13, %v1934_v62  ;;  %v1970_v36 = vsel %vm1561_vm12, %v1966_v10, %v1969_v18  ;;  %v6791_v38 = vrot.slane %v6715_v52, %v6407_v53  ;;  %v4535_v61 = vpop.f32.mrf.mxu1  ;;  %v1991_v27 = vsel %vm1559_vm11, %v1988_v22, %v1990_v49 }
 0x308   :  { %v2034_v60 = vsel %vm1555_vm9, %v2021_v7, %v7178_v40  ;;  %1972 = vst.msk [vmem:[#allocation4 + $0x1c] sm:$0x3] %vm1564_vm13, %v1970_v36  ;;  %v2024_v5 = vrot.slane %v2021_v7, 7  ;;  %v4536_v32 = vadd.f32 %v4535_v61, %v4534_v31  ;;  %v7179_v58 = vrot.slane %v6490_v29, 1  ;;  %v6842_v36 = vpop.f32.mrf.mxu0 }
 0x309   :  { %v2035_v44 = vsel %vm1557_vm10, %v2021_v7, %v2034_v60  ;;  %v7180_v0 = vrot.slane %v6469_v30, 1  ;;  %v2101_v2 = vcombine.high %v2079_v48, %v2079_v48  ;;  %v1992_v13 = vsel %vm1561_vm12, %v1988_v22, %v1991_v27 }
 0x30a   :  { %v2036_v14 = vsel %vm1559_vm11, %v2021_v7, %v2035_v44  ;;  %v2056_v4 = vsel %vm1555_vm9, %v2043_v37, %v7179_v58  ;;  %v1360_v34 = vadd.f32 %v4536_v32, %v6399_v17  ;;  %v7181_v46 = vrot.slane %v6497_v43, 1  ;;  %1994 = vst.msk [vmem:[#allocation4 + $0x1e] sm:$0x3] %vm1564_vm13, %v1992_v13  ;;  %v1509_v13 = vpop.f32.mrf.mxu0 }
 0x30b   :  { %v2092_v47 = vsel %vm1555_vm9, %v2079_v48, %v7180_v0  ;;  %v2037_v8 = vsel %vm1561_vm12, %v2021_v7, %v2036_v14  ;;  %v2057_v45 = vsel %vm1557_vm10, %v2043_v37, %v2056_v4  ;;  %v2025_v17 = vsel %vm1555_vm9, %v2024_v5, %v6460_v39 }
 0x30c   :  { %v2093_v50 = vsel %vm1557_vm10, %v2079_v48, %v2092_v47  ;;  %2038 = vrot.lane.b32.xlu0 %v2037_v8, %s5442_s27  ;;  %v2058_v42 = vsel %vm1559_vm11, %v2043_v37, %v2057_v45  ;;  %v2114_v20 = vsel %vm1555_vm9, %v2101_v2, %v7181_v46  ;;  %v1505_v35 = vadd.f32 %v6727_v3, %v1360_v34 }
 0x30d   :  { %v2094_v16 = vsel %vm1559_vm11, %v2079_v48, %v2093_v50  ;;  %v2059_v11 = vsel %vm1561_vm12, %v2043_v37, %v2058_v42  ;;  %v2115_v19 = vsel %vm1557_vm10, %v2101_v2, %v2114_v20  ;;  %v2026_v22 = vsel %vm1557_vm10, %v2024_v5, %v2025_v17  ;;  %v5261_v20 = vld [vmem:[#allocation10] ss:$0 sm:$0xff] }
 0x30e   :  { %v2095_v10 = vsel %vm1561_vm12, %v2079_v48, %v2094_v16  ;;  %2060 = vrot.lane.b32.xlu1 %v2059_v11, %s5442_s27  ;;  %v2046_v28 = vrot.slane %v2043_v37, 7  ;;  %v2116_v41 = vsel %vm1559_vm11, %v2101_v2, %v2115_v19  ;;  %v2027_v25 = vsel %vm1559_vm11, %v2024_v5, %v2026_v22 }
 0x30f   :  { %v2082_v7 = vrot.slane %v2079_v48, 7  ;;  %v2104_v21 = vrot.slane %v2101_v2, 7  ;;  %v2412_v57 = vcombine.high %v6715_v52, %v6715_v52  ;;  %v1531_v26 = vmax.f32 %v1505_v35, 0.0 }
 0x310   :  { %2096 = vrot.lane.b32.xlu0 %v2095_v10, %s5442_s27  ;;  %v2028_v39 = vsel %vm1561_vm12, %v2024_v5, %v2027_v25  ;;  %v2047_v3 = vsel %vm1555_vm9, %v2046_v28, %v6490_v29  ;;  %v2117_v31 = vsel %vm1561_vm12, %v2101_v2, %v2116_v41  ;;  %v2343_v61 = vrot.slane %v6778_v54, 1 }
 0x311   :  { %2030 = vst.msk [vmem:[#allocation4 + $0x20] sm:$0x3] %vm1564_vm13, %v2028_v39  ;;  %v2048_v62 = vsel %vm1557_vm10, %v2046_v28, %v2047_v3  ;;  %v2083_v18 = vsel %vm1555_vm9, %v2082_v7, %v6469_v30  ;;  %v2105_v49 = vsel %vm1555_vm9, %v2104_v21, %v6497_v43  ;;  %v2137_v48 = vrot.slane %v1531_v26, %v6407_v53  ;;  %v4537_v37 = vpop.f32.mrf.mxu1 }
 0x312   :  { %v2188_v40 = vcombine.high %v1531_v26, %v1531_v26  ;;  %2118 = vrot.lane.b32.xlu1 %v2117_v31, %s5442_s27  ;;  %v2049_v60 = vsel %vm1559_vm11, %v2046_v28, %v2048_v62  ;;  %v2084_v29 = vsel %vm1557_vm10, %v2082_v7, %v2083_v18  ;;  %v2106_v43 = vsel %vm1557_vm10, %v2104_v21, %v2105_v49 }
 0x313   :  { %v2050_v44 = vsel %vm1561_vm12, %v2046_v28, %v2049_v60  ;;  %v2085_v30 = vsel %vm1559_vm11, %v2082_v7, %v2084_v29  ;;  %v7182_v5 = vrot.slane %v6500_v51, 1  ;;  %v2159_v14 = vcombine.high %v2137_v48, %v2137_v48  ;;  %v4538_v0 = vpop.f32.mrf.mxu1 }
 0x314   :  { %v2195_v27 = vrot.slane %v2188_v40, %v6407_v53  ;;  %2052 = vst.msk [vmem:[#allocation4 + $0x22] sm:$0x3] %vm1564_vm13, %v2050_v44  ;;  %v2086_v58 = vsel %vm1561_vm12, %v2082_v7, %v2085_v30  ;;  %v2379_v4 = vrot.slane %v6791_v38, 1  ;;  %v2107_v8 = vsel %vm1559_vm11, %v2104_v21, %v2106_v43 }
 0x315   :  { %v2150_v32 = vsel %vm1555_vm9, %v2137_v48, %v7182_v5  ;;  %2088 = vst.msk [vmem:[#allocation4 + $0x24] sm:$0x3] %vm1564_vm13, %v2086_v58  ;;  %v2140_v45 = vrot.slane %v2137_v48, 7  ;;  %v4539_v50 = vadd.f32 %v4538_v0, %v4537_v37  ;;  %v2172_v34 = vsel %vm1555_vm9, %v2159_v14, %v2169_v63 }
 0x316   :  { %v2151_v47 = vsel %vm1557_vm10, %v2137_v48, %v2150_v32  ;;  %v2208_v42 = vsel %vm1555_vm9, %v2195_v27, %v2205_v6  ;;  %v2173_v11 = vsel %vm1557_vm10, %v2159_v14, %v2172_v34  ;;  %v2217_v46 = vcombine.high %v2195_v27, %v2195_v27 }
 0x317   :  { %v2152_v2 = vsel %vm1559_vm11, %v2137_v48, %v2151_v47  ;;  %v2209_v10 = vsel %vm1557_vm10, %v2195_v27, %v2208_v42  ;;  %v1365_v17 = vadd.f32 %v5261_v20, %v4539_v50  ;;  %v2174_v35 = vsel %vm1559_vm11, %v2159_v14, %v2173_v11 }
 0x318   :  { %v2153_v16 = vsel %vm1561_vm12, %v2137_v48, %v2152_v2  ;;  %v2210_v63 = vsel %vm1559_vm11, %v2195_v27, %v2209_v10  ;;  %v2108_v19 = vsel %vm1561_vm12, %v2104_v21, %v2107_v8  ;;  %v2175_v6 = vsel %vm1561_vm12, %v2159_v14, %v2174_v35 }
 0x319   :  { %2154 = vrot.lane.b32.xlu0 %v2153_v16, %s5442_s27  ;;  %v2211_v22 = vsel %vm1561_vm12, %v2195_v27, %v2210_v63  ;;  %v2230_v28 = vsel %vm1555_vm9, %v2217_v46, %v2227_v1  ;;  %2110 = vst.msk [vmem:[#allocation4 + $0x26] sm:$0x3] %vm1564_vm13, %v2108_v19  ;;  %v2141_v41 = vsel %vm1555_vm9, %v2140_v45, %v6500_v51  ;;  %v2162_v26 = vrot.slane %v2159_v14, 7 }
 0x31a   :  { %v1510_v25 = vadd.f32 %v1509_v13, %v1365_v17  ;;  %2176 = vrot.lane.b32.xlu1 %v2175_v6, %s5442_s27  ;;  %v2231_v7 = vsel %vm1557_vm10, %v2217_v46, %v2230_v28  ;;  %v2142_v21 = vsel %vm1557_vm10, %v2140_v45, %v2141_v41  ;;  %v2198_v31 = vrot.slane %v2195_v27, 7 }
 0x31b   :  { %v2232_v39 = vsel %vm1559_vm11, %v2217_v46, %v2231_v7  ;;  %v2143_v3 = vsel %vm1559_vm11, %v2140_v45, %v2142_v21  ;;  %v2220_v62 = vrot.slane %v2217_v46, 7  ;;  %v6887_v1 = vcombine.high %v6791_v38, %v6791_v38 }
 0x31c   :  { %v1532_v18 = vmax.f32 %v1510_v25, 0.0  ;;  %v2144_v51 = vsel %vm1561_vm12, %v2140_v45, %v2143_v3  ;;  %v2163_v49 = vsel %vm1555_vm9, %v2162_v26, %v6519_v24  ;;  %v2233_v48 = vsel %vm1561_vm12, %v2217_v46, %v2232_v39 }
 0x31d   :  { %2212 = vrot.lane.b32.xlu0 %v2211_v22, %s5442_s27  ;;  %2146 = vst.msk [vmem:[#allocation4 + $0x28] sm:$0x3] %vm1564_vm13, %v2144_v51  ;;  %v2164_v40 = vsel %vm1557_vm10, %v2162_v26, %v2163_v49  ;;  %v2199_v60 = vsel %vm1555_vm9, %v2198_v31, %v6507_v55  ;;  %v2221_v29 = vsel %vm1555_vm9, %v2220_v62, %v6528_v15  ;;  %v4540_v27 = vpop.f32.mrf.mxu1 }
 0x31e   :  { %v2253_v37 = vrot.slane %v1532_v18, %v6407_v53  ;;  %v2304_v44 = vcombine.high %v1532_v18, %v1532_v18  ;;  %2234 = vrot.lane.b32.xlu1 %v2233_v48, %s5442_s27  ;;  %v2165_v30 = vsel %vm1559_vm11, %v2162_v26, %v2164_v40  ;;  %v2200_v24 = vsel %vm1557_vm10, %v2198_v31, %v2199_v60 }
 0x31f   :  { %v6908_v43 = vrot.slane %v2412_v57, %v6407_v53  ;;  %v2166_v55 = vsel %vm1561_vm12, %v2162_v26, %v2165_v30  ;;  %v2201_v15 = vsel %vm1559_vm11, %v2198_v31, %v2200_v24  ;;  %v2222_v5 = vsel %vm1557_vm10, %v2220_v62, %v2221_v29  ;;  %v4541_v0 = vpop.f32.mrf.mxu1 }
 0x320   :  { %v2311_v32 = vrot.slane %v2304_v44, %v6407_v53  ;;  %v2266_v14 = vsel %vm1555_vm9, %v2253_v37, %v2263_v9  ;;  %v2275_v58 = vcombine.high %v2253_v37, %v2253_v37  ;;  %2168 = vst.msk [vmem:[#allocation4 + $0x2a] sm:$0x3] %vm1564_vm13, %v2166_v55  ;;  %v2202_v52 = vsel %vm1561_vm12, %v2198_v31, %v2201_v15 }
 0x321   :  { %v2401_v57 = vrot.slane %v6887_v1, 1  ;;  %v2267_v47 = vsel %vm1557_vm10, %v2253_v37, %v2266_v14  ;;  %2204 = vst.msk [vmem:[#allocation4 + $0x2c] sm:$0x3] %vm1564_vm13, %v2202_v52  ;;  %v2223_v8 = vsel %vm1559_vm11, %v2220_v62, %v2222_v5  ;;  %v2256_v45 = vrot.slane %v2253_v37, 7 }
 0x322   :  { %v4542_v50 = vadd.f32 %v4541_v0, %v4540_v27  ;;  %v2268_v2 = vsel %vm1559_vm11, %v2253_v37, %v2267_v47  ;;  %v2288_v9 = vsel %vm1555_vm9, %v2275_v58, %v2285_v23  ;;  %v2324_v34 = vsel %vm1555_vm9, %v2311_v32, %v2321_v59 }
 0x323   :  { %v2269_v42 = vsel %vm1561_vm12, %v2253_v37, %v2268_v2  ;;  %v2289_v16 = vsel %vm1557_vm10, %v2275_v58, %v2288_v9  ;;  %v2325_v13 = vsel %vm1557_vm10, %v2311_v32, %v2324_v34  ;;  %v2333_v11 = vcombine.high %v2311_v32, %v2311_v32 }
 0x324   :  { %v1370_v10 = vadd.f32 %v5261_v20, %v4542_v50  ;;  %2270 = vrot.lane.b32.xlu0 %v2269_v42, %s5442_s27  ;;  %v2290_v46 = vsel %vm1559_vm11, %v2275_v58, %v2289_v16  ;;  %v2326_v17 = vsel %vm1559_vm11, %v2311_v32, %v2325_v13  ;;  %v2224_v23 = vsel %vm1561_vm12, %v2220_v62, %v2223_v8 }
 0x325   :  { %v2291_v35 = vsel %vm1561_vm12, %v2275_v58, %v2290_v46  ;;  %v2327_v59 = vsel %vm1561_vm12, %v2311_v32, %v2326_v17  ;;  %v2346_v63 = vsel %vm1555_vm9, %v2333_v11, %v2343_v61  ;;  %2226 = vst.msk [vmem:[#allocation4 + $0x2e] sm:$0x3] %vm1564_vm13, %v2224_v23  ;;  %v2257_v20 = vsel %vm1555_vm9, %v2256_v45, %v6532_v33 }
 0x326   :  { %v1515_v19 = vadd.f32 %v6842_v36, %v1370_v10  ;;  %2292 = vrot.lane.b32.xlu1 %v2291_v35, %s5442_s27  ;;  %v2347_v6 = vsel %vm1557_vm10, %v2333_v11, %v2346_v63  ;;  %v2258_v22 = vsel %vm1557_vm10, %v2256_v45, %v2257_v20  ;;  %v2278_v28 = vrot.slane %v2275_v58, 7 }
 0x327   :  { %v2348_v41 = vsel %vm1559_vm11, %v2333_v11, %v2347_v6  ;;  %v2259_v25 = vsel %vm1559_vm11, %v2256_v45, %v2258_v22  ;;  %v2314_v7 = vrot.slane %v2311_v32, 7  ;;  %v2336_v61 = vrot.slane %v2333_v11, 7 }
 0x328   :  { %v2448_v21 = vcombine.high %v6908_v43, %v6908_v43  ;;  %v1533_v26 = vmax.f32 %v1515_v19, 0.0  ;;  %2328 = vrot.lane.b32.xlu0 %v2327_v59, %s5442_s27  ;;  %v2260_v33 = vsel %vm1561_vm12, %v2256_v45, %v2259_v25  ;;  %v2279_v36 = vsel %vm1555_vm9, %v2278_v28, %v6659_v56 }
 0x329   :  { %v2349_v39 = vsel %vm1561_vm12, %v2333_v11, %v2348_v41  ;;  %2262 = vst.msk [vmem:[#allocation4 + $0x30] sm:$0x3] %vm1564_vm13, %v2260_v33  ;;  %v2280_v3 = vsel %vm1557_vm10, %v2278_v28, %v2279_v36  ;;  %v2315_v31 = vsel %vm1555_vm9, %v2314_v7, %v6697_v12  ;;  %v2337_v62 = vsel %vm1555_vm9, %v2336_v61, %v6778_v54 }
 0x32a   :  { %v2369_v18 = vrot.slane %v1533_v26, %v6407_v53  ;;  %v2420_v51 = vcombine.high %v1533_v26, %v1533_v26  ;;  %2350 = vrot.lane.b32.xlu1 %v2349_v39, %s5442_s27  ;;  %v2281_v49 = vsel %vm1559_vm11, %v2278_v28, %v2280_v3  ;;  %v2316_v56 = vsel %vm1557_vm10, %v2314_v7, %v2315_v31 }
 0x32b   :  { %v2437_v48 = vrot.slane %v6908_v43, 1  ;;  %v2282_v40 = vsel %vm1561_vm12, %v2278_v28, %v2281_v49  ;;  %v2317_v60 = vsel %vm1559_vm11, %v2314_v7, %v2316_v56  ;;  %v2338_v12 = vsel %vm1557_vm10, %v2336_v61, %v2337_v62  ;;  %v2572_v56 = vld [vmem:[#allocation11 + $0x2f0] sm:$0xff] }
 0x32c   :  { %v2427_v29 = vrot.slane %v2420_v51, %v6407_v53  ;;  %v2382_v54 = vsel %vm1555_vm9, %v2369_v18, %v2379_v4  ;;  %v2391_v37 = vcombine.high %v2369_v18, %v2369_v18  ;;  %2284 = vst.msk [vmem:[#allocation4 + $0x32] sm:$0x3] %vm1564_vm13, %v2282_v40  ;;  %v2318_v44 = vsel %vm1561_vm12, %v2314_v7, %v2317_v60  ;;  %v2557_v51 = vld [vmem:[#allocation11 + $0x278] sm:$0xff]  ;;  %v2571_v60 = vld [vmem:[#allocation11 + $0x2e8] sm:$0xff] }
 0x32d   :  { %v2383_v30 = vsel %vm1557_vm10, %v2369_v18, %v2382_v54  ;;  %v2459_v24 = vrot.slane %v2448_v21, 1  ;;  %2320 = vst.msk [vmem:[#allocation4 + $0x34] sm:$0x3] %vm1564_vm13, %v2318_v44  ;;  %v2339_v27 = vsel %vm1559_vm11, %v2336_v61, %v2338_v12  ;;  %v2372_v55 = vrot.slane %v2369_v18, 7  ;;  %v2589_v40 = vld [vmem:[#allocation11 + $0x378] sm:$0xff]  ;;  %v2604_v12 = vld [vmem:[#allocation11 + $0x3f0] sm:$0xff] }
 0x32e   :  { %v2384_v15 = vsel %vm1559_vm11, %v2369_v18, %v2383_v30  ;;  %v2404_v5 = vsel %vm1555_vm9, %v2391_v37, %v2401_v57  ;;  %v2440_v4 = vsel %vm1555_vm9, %v2427_v29, %v2437_v48  ;;  %v2449_v32 = vcombine.high %v2427_v29, %v2427_v29  ;;  %v2556_v48 = vld [vmem:[#allocation11 + $0x270] sm:$0xff]  ;;  %v2603_v44 = vld [vmem:[#allocation11 + $0x3e8] sm:$0xff] }
 0x32f   :  { %v2385_v14 = vsel %vm1561_vm12, %v2369_v18, %v2384_v15  ;;  %v2405_v58 = vsel %vm1557_vm10, %v2391_v37, %v2404_v5  ;;  %v2441_v52 = vsel %vm1557_vm10, %v2427_v29, %v2440_v4  ;;  %v2340_v0 = vsel %vm1561_vm12, %v2336_v61, %v2339_v27  ;;  %v2588_v54 = vld [vmem:[#allocation11 + $0x370] sm:$0xff]  ;;  %v2587_v27 = vld [vmem:[#allocation11 + $0x368] sm:$0xff]  ;;  %v2602_v15 = vld [vmem:[#allocation11 + $0x3e0] sm:$0xff] }
 0x330   :  { %2386 = vrot.lane.b32.xlu0 %v2385_v14, %s5442_s27  ;;  %v2406_v47 = vsel %vm1559_vm11, %v2391_v37, %v2405_v58  ;;  %v2442_v8 = vsel %vm1559_vm11, %v2427_v29, %v2441_v52  ;;  %v2462_v45 = vsel %vm1555_vm9, %v2449_v32, %v2459_v24  ;;  %2342 = vst.msk [vmem:[#allocation4 + $0x36] sm:$0x3] %vm1564_vm13, %v2340_v0  ;;  %v2394_v16 = vrot.slane %v2391_v37, 7  ;;  %v2554_v24 = vld [vmem:[#allocation11 + $0x260] sm:$0xff]  ;;  %v2553_v4 = vld [vmem:[#allocation11 + $0x258] sm:$0xff]  ;;  %v2568_v58 = vld [vmem:[#allocation11 + $0x2d0] sm:$0xff] }
 0x331   :  { %v2373_v57 = vsel %vm1555_vm9, %v2372_v55, %v6791_v38  ;;  %v2407_v50 = vsel %vm1561_vm12, %v2391_v37, %v2406_v47  ;;  %v2463_v2 = vsel %vm1557_vm10, %v2449_v32, %v2462_v45  ;;  %v2430_v13 = vrot.slane %v2427_v29, 7  ;;  %v2570_v37 = vld [vmem:[#allocation11 + $0x2e0] sm:$0xff]  ;;  %v2601_v52 = vld [vmem:[#allocation11 + $0x3d8] sm:$0xff]  ;;  %v2552_v45 = vld [vmem:[#allocation11 + $0x250] sm:$0xff] }
 0x332   :  { %v2374_v9 = vsel %vm1557_vm10, %v2372_v55, %v2373_v57  ;;  %2408 = vrot.lane.b32.xlu1 %v2407_v50, %s5442_s27  ;;  %v2464_v34 = vsel %vm1559_vm11, %v2449_v32, %v2463_v2  ;;  %v2443_v11 = vsel %vm1561_vm12, %v2427_v29, %v2442_v8  ;;  %v2452_v46 = vrot.slane %v2449_v32, 7  ;;  %v2555_v29 = vld [vmem:[#allocation11 + $0x268] sm:$0xff]  ;;  %v2585_v57 = vld [vmem:[#allocation11 + $0x358] sm:$0xff] }
 0x333   :  { %v2375_v42 = vsel %vm1559_vm11, %v2372_v55, %v2374_v9  ;;  %v2395_v38 = vsel %vm1555_vm9, %v2394_v16, %v6887_v1  ;;  %v2431_v17 = vsel %vm1555_vm9, %v2430_v13, %v6908_v43  ;;  %v2465_v23 = vsel %vm1561_vm12, %v2449_v32, %v2464_v34  ;;  %v2586_v32 = vld [vmem:[#allocation11 + $0x360] sm:$0xff]  ;;  %v2567_v50 = vld [vmem:[#allocation11 + $0x2c8] sm:$0xff] }
 0x334   :  { %v2376_v10 = vsel %vm1561_vm12, %v2372_v55, %v2375_v42  ;;  %2444 = vrot.lane.b32.xlu0 %v2443_v11, %s5442_s27  ;;  %v2396_v35 = vsel %vm1557_vm10, %v2394_v16, %v2395_v38  ;;  %v2432_v59 = vsel %vm1557_vm10, %v2430_v13, %v2431_v17  ;;  %v2453_v63 = vsel %vm1555_vm9, %v2452_v46, %v2448_v21  ;;  %v2569_v55 = vld [vmem:[#allocation11 + $0x2d8] sm:$0xff]  ;;  %v2600_v42 = vld [vmem:[#allocation11 + $0x3d0] sm:$0xff]  ;;  %v2566_v11 = vld [vmem:[#allocation11 + $0x2c0] sm:$0xff] }
 0x335   :  { %2378 = vst.msk [vmem:[#allocation4 + $0x38] sm:$0x3] %vm1564_vm13, %v2376_v10  ;;  %v2397_v20 = vsel %vm1559_vm11, %v2394_v16, %v2396_v35  ;;  %v2433_v19 = vsel %vm1559_vm11, %v2430_v13, %v2432_v59  ;;  %v2454_v6 = vsel %vm1557_vm10, %v2452_v46, %v2453_v63  ;;  %v2550_v38 = vld [vmem:[#allocation11 + $0x240] sm:$0xff]  ;;  %v2583_v17 = vld [vmem:[#allocation11 + $0x348] sm:$0xff]  ;;  %v2549_v59 = vld [vmem:[#allocation11 + $0x238] sm:$0xff] }
 0x336   :  { %2466 = vrot.lane.b32.xlu1 %v2465_v23, %s5442_s27  ;;  %v2398_v1 = vsel %vm1561_vm12, %v2394_v16, %v2397_v20  ;;  %v2434_v43 = vsel %vm1561_vm12, %v2430_v13, %v2433_v19  ;;  %v2455_v22 = vsel %vm1559_vm11, %v2452_v46, %v2454_v6  ;;  %v2551_v16 = vld [vmem:[#allocation11 + $0x248] sm:$0xff]  ;;  %v2584_v13 = vld [vmem:[#allocation11 + $0x350] sm:$0xff]  ;;  %v2565_v23 = vld [vmem:[#allocation11 + $0x2b8] sm:$0xff]  ;;  %s4394_s27 = sshll.u32 %s5447_s3, 4  ;;  %s4395_s27 = int_to_ptr.vmem [resolvable:$true] %s4394_s27 }
 0x337   :  { %2400 = vst.msk [vmem:[#allocation4 + $0x3a] sm:$0x3] %vm1564_vm13, %v2398_v1  ;;  %2436 = vst.msk [vmem:[#allocation4 + $0x3c] sm:$0x3] %vm1564_vm13, %v2434_v43  ;;  %v2456_v28 = vsel %vm1561_vm12, %v2452_v46, %v2455_v22  ;;  %v2599_v46 = vld [vmem:[#allocation11 + $0x3c8] sm:$0xff]  ;;  %v2598_v35 = vld [vmem:[#allocation11 + $0x3c0] sm:$0xff]  ;;  %p5407_p8 = scmp.lt.s32.totalorder %s4395_s27, %s4395_s27 }
 0x338   :  { %2458 = vst.msk [vmem:[#allocation4 + $0x3e] sm:$0x3] %vm1564_vm13, %v2456_v28  ;;  %v2582_v63 = vld [vmem:[#allocation11 + $0x340] sm:$0xff]  ;;  %v2564_v19 = vld [vmem:[#allocation11 + $0x2b0] sm:$0xff]  ;;  %v2597_v6 = vld [vmem:[#allocation11 + $0x3b8] sm:$0xff]  ;;  %s5402_s0 = scalar_lea.vmem %s4395_s27, 32 }
 0x339   :  { %v2548_v1 = vld [vmem:[#allocation11 + $0x230] sm:$0xff]  ;;  %v2581_v43 = vld [vmem:[#allocation11 + $0x338] sm:$0xff]  ;;  %v2563_v28 = vld [vmem:[#allocation11 + $0x2a8] sm:$0xff]  ;;  %p5403_p7 = scmp.ne.s32.totalorder %s4395_s27, %s5402_s0  ;;  %p5408_p9 = scmp.lt.s32.totalorder %s5402_s0, %s5402_s0 }
 0x33b   :  { %p5409_p10 = por %p5408_p9, %p5407_p8 }
 0x33d   :  { %p5410_p11 = pnand %p5409_p10, %p5403_p7 }
 0x34c   :  { %v1574_v41 = vpop.permute.xlu0 %1573 }
 0x34d   :  { %1577 = vst.msk [vmem:[#allocation4] sm:$0x3] %vm1576_vm14, %v1574_v41  ;;  %v2596_v41 = vld [vmem:[#allocation11 + $0x3b0] sm:$0xff] }
 0x34e   :  { %v1597_v25 = vpop.permute.xlu1 %1596 }
 0x34f   :  { %1599 = vst.msk [vmem:[#allocation4 + $0x2] sm:$0x3] %vm1576_vm14, %v1597_v25  ;;  %v2547_v25 = vld [vmem:[#allocation11 + $0x228] sm:$0xff] }
 0x350   :  { %v1633_v7 = vpop.permute.xlu0 %1632 }
 0x351   :  { %1635 = vst.msk [vmem:[#allocation4 + $0x4] sm:$0x3] %vm1576_vm14, %v1633_v7  ;;  %v2580_v7 = vld [vmem:[#allocation11 + $0x330] sm:$0xff] }
 0x352   :  { %v1655_v61 = vpop.permute.xlu1 %1654 }
 0x353   :  { %1657 = vst.msk [vmem:[#allocation4 + $0x6] sm:$0x3] %vm1576_vm14, %v1655_v61 }
 0x358   :  { %v1691_v21 = vpop.permute.xlu0 %1690 }
 0x359   :  { %1693 = vst.msk [vmem:[#allocation4 + $0x8] sm:$0x3] %vm1576_vm14, %v1691_v21  ;;  %v2562_v21 = vld [vmem:[#allocation11 + $0x2a0] sm:$0xff] }
 0x35a   :  { %v1713_v26 = vpop.permute.xlu1 %1712  ;;  %v2470_v33 = vld [vmem:[#allocation4] sm:$0xff] }
 0x35b   :  { %1715 = vst.msk [vmem:[#allocation4 + $0xa] sm:$0x3] %vm1576_vm14, %v1713_v26  ;;  %v3012_v36 = vrot.slane %v2470_v33, %v6407_v53  ;;  %v3005_v39 = vcombine.high %v2470_v33, %v2470_v33  ;;  %v2595_v26 = vld [vmem:[#allocation11 + $0x3a8] sm:$0xff]  ;;  %v2546_v33 = vld [vmem:[#allocation11 + $0x220] sm:$0xff] }
 0x35c   :  { %v1749_v3 = vpop.permute.xlu0 %1748 }
 0x35d   :  { %1751 = vst.msk [vmem:[#allocation4 + $0xc] sm:$0x3] %vm1576_vm14, %v1749_v3  ;;  %v3020_v31 = vcombine.high %v3012_v36, %v3012_v36  ;;  %v3019_v62 = vrot.slane %v3005_v39, %v6407_v53  ;;  %v2561_v3 = vld [vmem:[#allocation11 + $0x298] sm:$0xff] }
 0x35e   :  { %v1771_v18 = vpop.permute.xlu1 %1770 }
 0x35f   :  { %1773 = vst.msk [vmem:[#allocation4 + $0xe] sm:$0x3] %vm1576_vm14, %v1771_v18  ;;  %3237 = vmatprep.mubr.f32.mxu0 %v3020_v31  ;;  %v3021_v49 = vcombine.high %v3019_v62, %v3019_v62  ;;  %v2594_v31 = vld [vmem:[#allocation11 + $0x3a0] sm:$0xff] }
 0x360   :  { %3238 = vmatmul.mubr.f32.vlgmr.msra.gmra.mxu0 %v3012_v36  ;;  %v2579_v36 = vld [vmem:[#allocation11 + $0x328] sm:$0xff]  ;;  %v2578_v18 = vld [vmem:[#allocation11 + $0x320] sm:$0xff] }
 0x361   :  { %4634 = vmatpush3.msra.mxu0 %v2557_v51  ;;  %3307 = vmatprep.mubr.f32.mxu1 %v3021_v49  ;;  %v2560_v51 = vld [vmem:[#allocation11 + $0x290] sm:$0xff]  ;;  %v2593_v49 = vld [vmem:[#allocation11 + $0x398] sm:$0xff] }
 0x362   :  { %4635 = vmatprep.subr.mxu0 %v2572_v56  ;;  %3308 = vmatmul.mubr.f32.vlgmr.msra.gmra.mxu1 %v3019_v62  ;;  %v2545_v62 = vld [vmem:[#allocation11 + $0x218] sm:$0xff]  ;;  %v2544_v56 = vld [vmem:[#allocation11 + $0x210] sm:$0xff] }
 0x363   :  { %4636 = vmatpush3.msra.mxu0 %v2556_v48  ;;  %4669 = vmatpush3.msra.mxu1 %v2589_v40  ;;  %v2577_v48 = vld [vmem:[#allocation11 + $0x318] sm:$0xff] }
 0x364   :  { %4637 = vmatprep.subr.mxu0 %v2571_v60  ;;  %4670 = vmatprep.subr.mxu1 %v2604_v12  ;;  %v1807_v30 = vpop.permute.xlu0 %1806  ;;  %v2559_v60 = vld [vmem:[#allocation11 + $0x288] sm:$0xff]  ;;  %v2592_v12 = vld [vmem:[#allocation11 + $0x390] sm:$0xff] }
 0x365   :  { %4638 = vmatpush3.msra.mxu0 %v2555_v29  ;;  %4671 = vmatpush3.msra.mxu1 %v2588_v54  ;;  %1809 = vst.msk [vmem:[#allocation4 + $0x10] sm:$0x3] %vm1576_vm14, %v1807_v30  ;;  %v2543_v29 = vld [vmem:[#allocation11 + $0x208] sm:$0xff]  ;;  %v2576_v54 = vld [vmem:[#allocation11 + $0x310] sm:$0xff] }
 0x366   :  { %4639 = vmatprep.subr.mxu0 %v2570_v37  ;;  %4672 = vmatprep.subr.mxu1 %v2603_v44  ;;  %v1829_v5 = vpop.permute.xlu1 %1828  ;;  %v2471_v14 = vld [vmem:[#allocation4 + $0x8] sm:$0xff] }
 0x367   :  { %4640 = vmatpush3.msra.mxu0 %v2554_v24  ;;  %4673 = vmatpush3.msra.mxu1 %v2587_v27  ;;  %1831 = vst.msk [vmem:[#allocation4 + $0x12] sm:$0x3] %vm1576_vm14, %v1829_v5  ;;  %v7039_v0 = vrot.slane %v2471_v14, %v6407_v53  ;;  %v3022_v47 = vcombine.high %v2471_v14, %v2471_v14  ;;  %v2558_v44 = vld [vmem:[#allocation11 + $0x280] sm:$0xff]  ;;  %v2591_v30 = vld [vmem:[#allocation11 + $0x388] sm:$0xff] }
 0x368   :  { %4641 = vmatprep.subr.mxu0 %v2569_v55  ;;  %4674 = vmatprep.subr.mxu1 %v2602_v15  ;;  %v1865_v8 = vpop.permute.xlu0 %1864  ;;  %v2542_v27 = vld [vmem:[#allocation11 + $0x200] sm:$0xff]  ;;  %v2575_v55 = vld [vmem:[#allocation11 + $0x308] sm:$0xff] }
 0x369   :  { %4642 = vmatpush3.msra.mxu0 %v2553_v4  ;;  %4675 = vmatpush3.msra.mxu1 %v2586_v32  ;;  %1867 = vst.msk [vmem:[#allocation4 + $0x14] sm:$0x3] %vm1576_vm14, %v1865_v8  ;;  %v3037_v2 = vcombine.high %v7039_v0, %v7039_v0  ;;  %v7045_v9 = vrot.slane %v3022_v47, %v6407_v53  ;;  %v2590_v4 = vld [vmem:[#allocation11 + $0x380] sm:$0xff]  ;;  %v2637_v32 = vld [vmem:[#allocation11 + $0x4f8] sm:$0xff] }
 0x36a   :  { %4643 = vmatprep.subr.mxu0 %v2568_v58  ;;  %4676 = vmatprep.subr.mxu1 %v2601_v52  ;;  %v1887_v34 = vpop.permute.xlu1 %1886  ;;  %v2574_v14 = vld [vmem:[#allocation11 + $0x300] sm:$0xff]  ;;  %v2621_v52 = vld [vmem:[#allocation11 + $0x478] sm:$0xff] }
 0x36b   :  { %4644 = vmatpush3.msra.mxu0 %v2552_v45  ;;  %4677 = vmatpush3.msra.mxu1 %v2585_v57  ;;  %1889 = vst.msk [vmem:[#allocation4 + $0x16] sm:$0x3] %vm1576_vm14, %v1887_v34  ;;  %v3038_v10 = vcombine.high %v7045_v9, %v7045_v9  ;;  %v2636_v45 = vld [vmem:[#allocation11 + $0x4f0] sm:$0xff]  ;;  %v2669_v57 = vld [vmem:[#allocation11 + $0x5f8] sm:$0xff] }
 0x36c   :  { %4645 = vmatprep.subr.mxu0 %v2567_v50  ;;  %3377 = vmatprep.mubr.f32.mxu0 %v3037_v2  ;;  %v2620_v2 = vld [vmem:[#allocation11 + $0x470] sm:$0xff]  ;;  %v2653_v34 = vld [vmem:[#allocation11 + $0x578] sm:$0xff] }
 0x36d   :  { %4678 = vmatprep.subr.mxu1 %v2600_v42  ;;  %4646 = vmatpush3.msra.mxu0 %v2551_v16  ;;  %v2635_v42 = vld [vmem:[#allocation11 + $0x4e8] sm:$0xff]  ;;  %v2668_v16 = vld [vmem:[#allocation11 + $0x5f0] sm:$0xff] }
 0x36e   :  { %4679 = vmatpush3.msra.mxu1 %v2584_v13  ;;  %4647 = vmatprep.subr.mxu0 %v2566_v11  ;;  %v2619_v13 = vld [vmem:[#allocation11 + $0x468] sm:$0xff]  ;;  %v2652_v11 = vld [vmem:[#allocation11 + $0x570] sm:$0xff] }
 0x36f   :  { %4680 = vmatprep.subr.mxu1 %v2599_v46  ;;  %3447 = vmatprep.mubr.f32.mxu1 %v3038_v10  ;;  %v2634_v10 = vld [vmem:[#allocation11 + $0x4e0] sm:$0xff]  ;;  %v2667_v46 = vld [vmem:[#allocation11 + $0x5e8] sm:$0xff] }
 0x370   :  { %4648 = vmatpush3.msra.mxu0 %v2550_v38  ;;  %4681 = vmatpush3.msra.mxu1 %v2583_v17  ;;  %v1923_v20 = vpop.permute.xlu0 %1922  ;;  %v2618_v38 = vld [vmem:[#allocation11 + $0x460] sm:$0xff]  ;;  %v2651_v17 = vld [vmem:[#allocation11 + $0x568] sm:$0xff] }
 0x371   :  { %4649 = vmatprep.subr.mxu0 %v2565_v23  ;;  %4682 = vmatprep.subr.mxu1 %v2598_v35  ;;  %1925 = vst.msk [vmem:[#allocation4 + $0x18] sm:$0x3] %vm1576_vm14, %v1923_v20  ;;  %v2666_v23 = vld [vmem:[#allocation11 + $0x5e0] sm:$0xff]  ;;  %v2632_v20 = vld [vmem:[#allocation11 + $0x4d0] sm:$0xff] }
 0x372   :  { %4650 = vmatpush3.msra.mxu0 %v2549_v59  ;;  %4683 = vmatpush3.msra.mxu1 %v2582_v63  ;;  %v1945_v22 = vpop.permute.xlu1 %1944  ;;  %v2472_v40 = vld [vmem:[#allocation4 + $0x10] sm:$0xff]  ;;  %v2617_v59 = vld [vmem:[#allocation11 + $0x458] sm:$0xff]  ;;  %v2650_v63 = vld [vmem:[#allocation11 + $0x560] sm:$0xff] }
 0x373   :  { %4651 = vmatprep.subr.mxu0 %v2564_v19  ;;  %4684 = vmatprep.subr.mxu1 %v2597_v6  ;;  %1947 = vst.msk [vmem:[#allocation4 + $0x1a] sm:$0x3] %vm1576_vm14, %v1945_v22  ;;  %v3039_v24 = vcombine.high %v2472_v40, %v2472_v40  ;;  %v7056_v15 = vrot.slane %v2472_v40, %v6407_v53  ;;  %v2665_v19 = vld [vmem:[#allocation11 + $0x5d8] sm:$0xff]  ;;  %v2631_v22 = vld [vmem:[#allocation11 + $0x4c8] sm:$0xff]  ;;  %v2660_v40 = vld [vmem:[#allocation11 + $0x5b0] sm:$0xff] }
 0x374   :  { %4652 = vmatpush3.msra.mxu0 %v2548_v1  ;;  %4685 = vmatpush3.msra.mxu1 %v2581_v43  ;;  %v1981_v61 = vpop.permute.xlu0 %1980  ;;  %v2616_v1 = vld [vmem:[#allocation11 + $0x450] sm:$0xff]  ;;  %v2649_v43 = vld [vmem:[#allocation11 + $0x558] sm:$0xff] }
 0x375   :  { %4653 = vmatprep.subr.mxu0 %v2563_v28  ;;  %4686 = vmatprep.subr.mxu1 %v2596_v41  ;;  %1983 = vst.msk [vmem:[#allocation4 + $0x1c] sm:$0x3] %vm1576_vm14, %v1981_v61  ;;  %v7060_v47 = vrot.slane %v3039_v24, %v6407_v53  ;;  %v3054_v8 = vcombine.high %v7056_v15, %v7056_v15  ;;  %v2664_v28 = vld [vmem:[#allocation11 + $0x5d0] sm:$0xff]  ;;  %v2630_v61 = vld [vmem:[#allocation11 + $0x4c0] sm:$0xff]  ;;  %v2643_v24 = vld [vmem:[#allocation11 + $0x528] sm:$0xff] }
 0x376   :  { %4654 = vmatpush3.msra.mxu0 %v2547_v25  ;;  %4687 = vmatpush3.msra.mxu1 %v2580_v7  ;;  %v2615_v25 = vld [vmem:[#allocation11 + $0x448] sm:$0xff]  ;;  %v2648_v7 = vld [vmem:[#allocation11 + $0x550] sm:$0xff] }
 0x377   :  { %v2003_v39 = vpop.permute.xlu1 %2002  ;;  %4655 = vmatprep.subr.mxu0 %v2562_v21  ;;  %4688 = vmatprep.subr.mxu1 %v2595_v26  ;;  %v2663_v21 = vld [vmem:[#allocation11 + $0x5c8] sm:$0xff] }
 0x378   :  { %2005 = vst.msk [vmem:[#allocation4 + $0x1e] sm:$0x3] %vm1576_vm14, %v2003_v39  ;;  %4656 = vmatpush3.msra.mxu0 %v2546_v33  ;;  %4689 = vmatpush3.msra.mxu1 %v2579_v36  ;;  %v2614_v33 = vld [vmem:[#allocation11 + $0x440] sm:$0xff]  ;;  %v2647_v36 = vld [vmem:[#allocation11 + $0x548] sm:$0xff]  ;;  %v2629_v39 = vld [vmem:[#allocation11 + $0x4b8] sm:$0xff] }
 0x379   :  { %4657 = vmatprep.subr.mxu0 %v2561_v3  ;;  %4690 = vmatprep.subr.mxu1 %v2594_v31  ;;  %v2662_v3 = vld [vmem:[#allocation11 + $0x5c0] sm:$0xff]  ;;  %v2613_v31 = vld [vmem:[#allocation11 + $0x438] sm:$0xff] }
 0x37a   :  { %4658 = vmatpush3.msra.mxu0 %v2545_v62  ;;  %4691 = vmatpush3.msra.mxu1 %v2578_v18  ;;  %v2646_v62 = vld [vmem:[#allocation11 + $0x540] sm:$0xff]  ;;  %v2628_v18 = vld [vmem:[#allocation11 + $0x4b0] sm:$0xff] }
 0x37b   :  { %4659 = vmatprep.subr.mxu0 %v2560_v51  ;;  %4692 = vmatprep.subr.mxu1 %v2593_v49  ;;  %v2661_v51 = vld [vmem:[#allocation11 + $0x5b8] sm:$0xff]  ;;  %v2612_v49 = vld [vmem:[#allocation11 + $0x430] sm:$0xff] }
 0x37c   :  { %4660 = vmatpush3.msra.mxu0 %v2544_v56  ;;  %4693 = vmatpush3.msra.mxu1 %v2577_v48  ;;  %v2645_v56 = vld [vmem:[#allocation11 + $0x538] sm:$0xff]  ;;  %v2627_v48 = vld [vmem:[#allocation11 + $0x4a8] sm:$0xff] }
 0x37d   :  { %4661 = vmatprep.subr.mxu0 %v2559_v60  ;;  %4694 = vmatprep.subr.mxu1 %v2592_v12  ;;  %v2611_v12 = vld [vmem:[#allocation11 + $0x428] sm:$0xff] }
 0x37e   :  { %v2039_v37 = vpop.permute.xlu0 %2038  ;;  %4662 = vmatpush3.msra.mxu0 %v2543_v29  ;;  %4695 = vmatpush3.msra.mxu1 %v2576_v54  ;;  %v2644_v29 = vld [vmem:[#allocation11 + $0x530] sm:$0xff]  ;;  %v2626_v54 = vld [vmem:[#allocation11 + $0x4a0] sm:$0xff] }
 0x37f   :  { %2041 = vst.msk [vmem:[#allocation4 + $0x20] sm:$0x3] %vm1576_vm14, %v2039_v37  ;;  %4663 = vmatprep.subr.mxu0 %v2558_v44  ;;  %4696 = vmatprep.subr.mxu1 %v2591_v30  ;;  %v2659_v37 = vld [vmem:[#allocation11 + $0x5a8] sm:$0xff]  ;;  %v2610_v30 = vld [vmem:[#allocation11 + $0x420] sm:$0xff] }
 0x380   :  { %v2061_v5 = vpop.permute.xlu1 %2060  ;;  %4664 = vmatpush3.msra.mxu0 %v2542_v27  ;;  %4697 = vmatpush3.msra.mxu1 %v2575_v55  ;;  %v2625_v27 = vld [vmem:[#allocation11 + $0x498] sm:$0xff]  ;;  %v2658_v55 = vld [vmem:[#allocation11 + $0x5a0] sm:$0xff] }
 0x381   :  { %2063 = vst.msk [vmem:[#allocation4 + $0x22] sm:$0x3] %vm1576_vm14, %v2061_v5  ;;  %3378 = vmatmul.mubr.f32.vlgmr.msra.gmra.mxu0 %v7039_v0  ;;  %4698 = vmatprep.subr.mxu1 %v2590_v4  ;;  %v3055_v0 = vcombine.high %v7060_v47, %v7060_v47  ;;  %v2609_v4 = vld [vmem:[#allocation11 + $0x418] sm:$0xff] }
 0x382   :  { %v2097_v58 = vpop.permute.xlu0 %2096  ;;  %4703 = vmatprep.subr.mxu0 %v2637_v32  ;;  %4699 = vmatpush3.msra.mxu1 %v2574_v14  ;;  %v2642_v32 = vld [vmem:[#allocation11 + $0x520] sm:$0xff]  ;;  %v2624_v14 = vld [vmem:[#allocation11 + $0x490] sm:$0xff] }
 0x383   :  { %2099 = vst.msk [vmem:[#allocation4 + $0x24] sm:$0x3] %vm1576_vm14, %v2097_v58  ;;  %4704 = vmatpush3.msra.mxu0 %v2621_v52  ;;  %3517 = vmatprep.mubr.f32.mxu0 %v3054_v8  ;;  %v2657_v58 = vld [vmem:[#allocation11 + $0x598] sm:$0xff]  ;;  %v2608_v8 = vld [vmem:[#allocation11 + $0x410] sm:$0xff] }
 0x384   :  { %v2119_v50 = vpop.permute.xlu1 %2118  ;;  %3448 = vmatmul.mubr.f32.vlgmr.msra.gmra.mxu1 %v7045_v9  ;;  %4705 = vmatprep.subr.mxu0 %v2636_v45  ;;  %v2633_v9 = vld [vmem:[#allocation11 + $0x4d8] sm:$0xff] }
 0x385   :  { %2121 = vst.msk [vmem:[#allocation4 + $0x26] sm:$0x3] %vm1576_vm14, %v2119_v50  ;;  %4738 = vmatprep.subr.mxu1 %v2669_v57  ;;  %4706 = vmatpush3.msra.mxu0 %v2620_v2  ;;  %v2641_v45 = vld [vmem:[#allocation11 + $0x518] sm:$0xff]  ;;  %v2623_v50 = vld [vmem:[#allocation11 + $0x488] sm:$0xff]  ;;  %v2656_v2 = vld [vmem:[#allocation11 + $0x590] sm:$0xff] }
 0x386   :  { %4739 = vmatpush3.msra.mxu1 %v2653_v34  ;;  %3587 = vmatprep.mubr.f32.mxu1 %v3055_v0  ;;  %v2473_v57 = vld [vmem:[#allocation4 + $0x18] sm:$0xff]  ;;  %v2607_v34 = vld [vmem:[#allocation11 + $0x408] sm:$0xff] }
 0x387   :  { %4707 = vmatprep.subr.mxu0 %v2635_v42  ;;  %4740 = vmatprep.subr.mxu1 %v2668_v16  ;;  %v2640_v0 = vld [vmem:[#allocation11 + $0x510] sm:$0xff]  ;;  %v2622_v42 = vld [vmem:[#allocation11 + $0x480] sm:$0xff]  ;;  %v2655_v16 = vld [vmem:[#allocation11 + $0x588] sm:$0xff] }
 0x388   :  { %4708 = vmatpush3.msra.mxu0 %v2619_v13  ;;  %4741 = vmatpush3.msra.mxu1 %v2652_v11  ;;  %v3056_v13 = vcombine.high %v2473_v57, %v2473_v57  ;;  %v2606_v11 = vld [vmem:[#allocation11 + $0x400] sm:$0xff] }
 0x389   :  { %4709 = vmatprep.subr.mxu0 %v2634_v10  ;;  %4742 = vmatprep.subr.mxu1 %v2667_v46  ;;  %v2639_v10 = vld [vmem:[#allocation11 + $0x508] sm:$0xff]  ;;  %v7079_v46 = vrot.slane %v2473_v57, %v6407_v53 }
 0x38a   :  { %4710 = vmatpush3.msra.mxu0 %v2618_v38  ;;  %4743 = vmatpush3.msra.mxu1 %v2651_v17  ;;  %v2654_v38 = vld [vmem:[#allocation11 + $0x580] sm:$0xff]  ;;  %v2723_v57 = vld [vmem:[#allocation11 + $0x7a8] sm:$0xff] }
 0x38b   :  { %v2155_v35 = vpop.permute.xlu0 %2154  ;;  %4711 = vmatprep.subr.mxu0 %v2633_v9  ;;  %4744 = vmatprep.subr.mxu1 %v2666_v23  ;;  %v2701_v9 = vld [vmem:[#allocation11 + $0x6f8] sm:$0xff]  ;;  %v2638_v23 = vld [vmem:[#allocation11 + $0x500] sm:$0xff] }
 0x38c   :  { %2157 = vst.msk [vmem:[#allocation4 + $0x28] sm:$0x3] %vm1576_vm14, %v2155_v35  ;;  %v2177_v6 = vpop.permute.xlu1 %2176  ;;  %4712 = vmatpush3.msra.mxu0 %v2617_v59  ;;  %4745 = vmatpush3.msra.mxu1 %v2650_v63  ;;  %v2685_v35 = vld [vmem:[#allocation11 + $0x678] sm:$0xff]  ;;  %v7083_v63 = vrot.slane %v3056_v13, %v6407_v53  ;;  %v2688_v13 = vld [vmem:[#allocation11 + $0x690] sm:$0xff] }
 0x38d   :  { %2179 = vst.msk [vmem:[#allocation4 + $0x2a] sm:$0x3] %vm1576_vm14, %v2177_v6  ;;  %4713 = vmatprep.subr.mxu0 %v2632_v20  ;;  %4746 = vmatprep.subr.mxu1 %v2665_v19  ;;  %v3071_v20 = vcombine.high %v7079_v46, %v7079_v46  ;;  %v2700_v19 = vld [vmem:[#allocation11 + $0x6f0] sm:$0xff]  ;;  %v2733_v6 = vld [vmem:[#allocation11 + $0x7f8] sm:$0xff] }
 0x38e   :  { %4714 = vmatpush3.msra.mxu0 %v2616_v1  ;;  %4747 = vmatpush3.msra.mxu1 %v2649_v43  ;;  %v2684_v1 = vld [vmem:[#allocation11 + $0x670] sm:$0xff] }
 0x38f   :  { %v2213_v41 = vpop.permute.xlu0 %2212  ;;  %4715 = vmatprep.subr.mxu0 %v2631_v22  ;;  %4748 = vmatprep.subr.mxu1 %v2664_v28  ;;  %v2717_v22 = vld [vmem:[#allocation11 + $0x778] sm:$0xff]  ;;  %v2699_v28 = vld [vmem:[#allocation11 + $0x6e8] sm:$0xff] }
 0x390   :  { %2215 = vst.msk [vmem:[#allocation4 + $0x2c] sm:$0x3] %vm1576_vm14, %v2213_v41  ;;  %v2235_v26 = vpop.permute.xlu1 %2234  ;;  %4716 = vmatpush3.msra.mxu0 %v2615_v25  ;;  %4749 = vmatpush3.msra.mxu1 %v2648_v7  ;;  %v2732_v41 = vld [vmem:[#allocation11 + $0x7f0] sm:$0xff]  ;;  %v2683_v7 = vld [vmem:[#allocation11 + $0x668] sm:$0xff] }
 0x391   :  { %2237 = vst.msk [vmem:[#allocation4 + $0x2e] sm:$0x3] %vm1576_vm14, %v2235_v26  ;;  %4717 = vmatprep.subr.mxu0 %v2630_v61  ;;  %4750 = vmatprep.subr.mxu1 %v2663_v21  ;;  %v2716_v61 = vld [vmem:[#allocation11 + $0x770] sm:$0xff]  ;;  %v2698_v21 = vld [vmem:[#allocation11 + $0x6e0] sm:$0xff]  ;;  %v2731_v26 = vld [vmem:[#allocation11 + $0x7e8] sm:$0xff] }
 0x392   :  { %4718 = vmatpush3.msra.mxu0 %v2614_v33  ;;  %4751 = vmatpush3.msra.mxu1 %v2647_v36  ;;  %v2715_v33 = vld [vmem:[#allocation11 + $0x768] sm:$0xff]  ;;  %v2697_v36 = vld [vmem:[#allocation11 + $0x6d8] sm:$0xff] }
 0x393   :  { %4719 = vmatprep.subr.mxu0 %v2629_v39  ;;  %4752 = vmatprep.subr.mxu1 %v2662_v3  ;;  %v2730_v39 = vld [vmem:[#allocation11 + $0x7e0] sm:$0xff]  ;;  %v2681_v3 = vld [vmem:[#allocation11 + $0x658] sm:$0xff] }
 0x394   :  { %4720 = vmatpush3.msra.mxu0 %v2613_v31  ;;  %4753 = vmatpush3.msra.mxu1 %v2646_v62  ;;  %v2714_v31 = vld [vmem:[#allocation11 + $0x760] sm:$0xff]  ;;  %v2696_v62 = vld [vmem:[#allocation11 + $0x6d0] sm:$0xff] }
 0x395   :  { %4721 = vmatprep.subr.mxu0 %v2628_v18  ;;  %4754 = vmatprep.subr.mxu1 %v2661_v51  ;;  %v2729_v18 = vld [vmem:[#allocation11 + $0x7d8] sm:$0xff]  ;;  %v2680_v51 = vld [vmem:[#allocation11 + $0x650] sm:$0xff] }
 0x396   :  { %v2271_v60 = vpop.permute.xlu0 %2270  ;;  %4722 = vmatpush3.msra.mxu0 %v2612_v49  ;;  %4755 = vmatpush3.msra.mxu1 %v2645_v56  ;;  %v2713_v49 = vld [vmem:[#allocation11 + $0x758] sm:$0xff]  ;;  %v2695_v56 = vld [vmem:[#allocation11 + $0x6c8] sm:$0xff] }
 0x397   :  { %2273 = vst.msk [vmem:[#allocation4 + $0x30] sm:$0x3] %vm1576_vm14, %v2271_v60  ;;  %4723 = vmatprep.subr.mxu0 %v2627_v48  ;;  %4756 = vmatprep.subr.mxu1 %v2660_v40  ;;  %v2728_v48 = vld [vmem:[#allocation11 + $0x7d0] sm:$0xff]  ;;  %v2679_v40 = vld [vmem:[#allocation11 + $0x648] sm:$0xff] }
 0x398   :  { %v2293_v44 = vpop.permute.xlu1 %2292  ;;  %4724 = vmatpush3.msra.mxu0 %v2611_v12  ;;  %4757 = vmatpush3.msra.mxu1 %v2644_v29  ;;  %v2712_v60 = vld [vmem:[#allocation11 + $0x750] sm:$0xff]  ;;  %v2694_v12 = vld [vmem:[#allocation11 + $0x6c0] sm:$0xff]  ;;  %v2727_v29 = vld [vmem:[#allocation11 + $0x7c8] sm:$0xff] }
 0x399   :  { %2295 = vst.msk [vmem:[#allocation4 + $0x32] sm:$0x3] %vm1576_vm14, %v2293_v44  ;;  %4725 = vmatprep.subr.mxu0 %v2626_v54  ;;  %4758 = vmatprep.subr.mxu1 %v2659_v37  ;;  %v2678_v54 = vld [vmem:[#allocation11 + $0x640] sm:$0xff]  ;;  %v2711_v37 = vld [vmem:[#allocation11 + $0x748] sm:$0xff]  ;;  %v2693_v44 = vld [vmem:[#allocation11 + $0x6b8] sm:$0xff] }
 0x39a   :  { %v2329_v5 = vpop.permute.xlu0 %2328  ;;  %4726 = vmatpush3.msra.mxu0 %v2610_v30  ;;  %4759 = vmatpush3.msra.mxu1 %v2643_v24  ;;  %v2726_v30 = vld [vmem:[#allocation11 + $0x7c0] sm:$0xff]  ;;  %v2677_v24 = vld [vmem:[#allocation11 + $0x638] sm:$0xff] }
 0x39b   :  { %2331 = vst.msk [vmem:[#allocation4 + $0x34] sm:$0x3] %vm1576_vm14, %v2329_v5  ;;  %4727 = vmatprep.subr.mxu0 %v2625_v27  ;;  %4760 = vmatprep.subr.mxu1 %v2658_v55  ;;  %v2710_v27 = vld [vmem:[#allocation11 + $0x740] sm:$0xff]  ;;  %v2692_v55 = vld [vmem:[#allocation11 + $0x6b0] sm:$0xff]  ;;  %v2725_v5 = vld [vmem:[#allocation11 + $0x7b8] sm:$0xff] }
 0x39c   :  { %v2351_v52 = vpop.permute.xlu1 %2350  ;;  %4728 = vmatpush3.msra.mxu0 %v2609_v4  ;;  %4761 = vmatpush3.msra.mxu1 %v2642_v32  ;;  %v2676_v4 = vld [vmem:[#allocation11 + $0x630] sm:$0xff]  ;;  %v2709_v32 = vld [vmem:[#allocation11 + $0x738] sm:$0xff] }
 0x39d   :  { %2353 = vst.msk [vmem:[#allocation4 + $0x36] sm:$0x3] %vm1576_vm14, %v2351_v52  ;;  %4729 = vmatprep.subr.mxu0 %v2624_v14  ;;  %4762 = vmatprep.subr.mxu1 %v2657_v58  ;;  %v2691_v14 = vld [vmem:[#allocation11 + $0x6a8] sm:$0xff]  ;;  %v2724_v58 = vld [vmem:[#allocation11 + $0x7b0] sm:$0xff] }
 0x39e   :  { %4730 = vmatpush3.msra.mxu0 %v2608_v8  ;;  %4763 = vmatpush3.msra.mxu1 %v2641_v45  ;;  %v2675_v52 = vld [vmem:[#allocation11 + $0x628] sm:$0xff]  ;;  %v2708_v8 = vld [vmem:[#allocation11 + $0x730] sm:$0xff]  ;;  %v2690_v45 = vld [vmem:[#allocation11 + $0x6a0] sm:$0xff] }
 0x39f   :  { %4731 = vmatprep.subr.mxu0 %v2623_v50  ;;  %4764 = vmatprep.subr.mxu1 %v2656_v2  ;;  %v2674_v50 = vld [vmem:[#allocation11 + $0x620] sm:$0xff]  ;;  %v2707_v2 = vld [vmem:[#allocation11 + $0x728] sm:$0xff] }
 0x3a0   :  { %4732 = vmatpush3.msra.mxu0 %v2607_v34  ;;  %4765 = vmatpush3.msra.mxu1 %v2640_v0  ;;  %v2689_v34 = vld [vmem:[#allocation11 + $0x698] sm:$0xff]  ;;  %v2722_v0 = vld [vmem:[#allocation11 + $0x7a0] sm:$0xff] }
 0x3a1   :  { %4733 = vmatprep.subr.mxu0 %v2622_v42  ;;  %4766 = vmatprep.subr.mxu1 %v2655_v16  ;;  %v2673_v42 = vld [vmem:[#allocation11 + $0x618] sm:$0xff]  ;;  %v2706_v16 = vld [vmem:[#allocation11 + $0x720] sm:$0xff] }
 0x3a2   :  { %v2387_v17 = vpop.permute.xlu0 %2386  ;;  %4734 = vmatpush3.msra.mxu0 %v2606_v11  ;;  %4767 = vmatpush3.msra.mxu1 %v2639_v10  ;;  %v2721_v11 = vld [vmem:[#allocation11 + $0x798] sm:$0xff]  ;;  %v2672_v10 = vld [vmem:[#allocation11 + $0x610] sm:$0xff] }
 0x3a3   :  { %2389 = vst.msk [vmem:[#allocation4 + $0x38] sm:$0x3] %vm1576_vm14, %v2387_v17  ;;  %3518 = vmatmul.mubr.f32.vlgmr.msra.gmra.mxu0 %v7056_v15  ;;  %4768 = vmatprep.subr.mxu1 %v2654_v38  ;;  %v3072_v15 = vcombine.high %v7083_v63, %v7083_v63  ;;  %v2705_v38 = vld [vmem:[#allocation11 + $0x718] sm:$0xff] }
 0x3a4   :  { %v2409_v59 = vpop.permute.xlu1 %2408  ;;  %4773 = vmatprep.subr.mxu0 %v2701_v9  ;;  %4769 = vmatpush3.msra.mxu1 %v2638_v23  ;;  %v2474_v17 = vld [vmem:[#allocation4 + $0x20] sm:$0xff]  ;;  %v2687_v9 = vld [vmem:[#allocation11 + $0x688] sm:$0xff]  ;;  %v2720_v23 = vld [vmem:[#allocation11 + $0x790] sm:$0xff] }
 0x3a5   :  { %2411 = vst.msk [vmem:[#allocation4 + $0x3a] sm:$0x3] %vm1576_vm14, %v2409_v59  ;;  %4774 = vmatpush3.msra.mxu0 %v2685_v35  ;;  %3657 = vmatprep.mubr.f32.mxu0 %v3071_v20  ;;  %v2671_v35 = vld [vmem:[#allocation11 + $0x608] sm:$0xff]  ;;  %v2704_v59 = vld [vmem:[#allocation11 + $0x710] sm:$0xff]  ;;  %v2686_v20 = vld [vmem:[#allocation11 + $0x680] sm:$0xff] }
 0x3a6   :  { %v2445_v43 = vpop.permute.xlu0 %2444  ;;  %3588 = vmatmul.mubr.f32.vlgmr.msra.gmra.mxu1 %v7060_v47  ;;  %4775 = vmatprep.subr.mxu0 %v2700_v19  ;;  %v2682_v47 = vld [vmem:[#allocation11 + $0x660] sm:$0xff]  ;;  %v2719_v19 = vld [vmem:[#allocation11 + $0x788] sm:$0xff] }
 0x3a7   :  { %2447 = vst.msk [vmem:[#allocation4 + $0x3c] sm:$0x3] %vm1576_vm14, %v2445_v43  ;;  %4808 = vmatprep.subr.mxu1 %v2733_v6  ;;  %4776 = vmatpush3.msra.mxu0 %v2684_v1  ;;  %v3073_v6 = vcombine.high %v2474_v17, %v2474_v17  ;;  %v2670_v1 = vld [vmem:[#allocation11 + $0x600] sm:$0xff]  ;;  %v2703_v43 = vld [vmem:[#allocation11 + $0x708] sm:$0xff] }
 0x3a8   :  { %v2467_v25 = vpop.permute.xlu1 %2466  ;;  %4809 = vmatpush3.msra.mxu1 %v2717_v22  ;;  %3727 = vmatprep.mubr.f32.mxu1 %v3072_v15  ;;  %v7095_v22 = vrot.slane %v2474_v17, %v6407_v53  ;;  %v2718_v15 = vld [vmem:[#allocation11 + $0x780] sm:$0xff] }
 0x3a9   :  { %2469 = vst.msk [vmem:[#allocation4 + $0x3e] sm:$0x3] %vm1576_vm14, %v2467_v25  ;;  %4777 = vmatprep.subr.mxu0 %v2699_v28  ;;  %4810 = vmatprep.subr.mxu1 %v2732_v41  ;;  %v2765_v28 = vld [vmem:[#allocation11 + $0x8f8] sm:$0xff]  ;;  %v2702_v41 = vld [vmem:[#allocation11 + $0x700] sm:$0xff] }
 0x3aa   :  { %4778 = vmatpush3.msra.mxu0 %v2683_v7  ;;  %4811 = vmatpush3.msra.mxu1 %v2716_v61  ;;  %v2749_v25 = vld [vmem:[#allocation11 + $0x878] sm:$0xff]  ;;  %v7098_v7 = vrot.slane %v3073_v6, %v6407_v53  ;;  %v3088_v61 = vcombine.high %v7095_v22, %v7095_v22  ;;  %v2786_v17 = vld [vmem:[#allocation11 + $0x9a0] sm:$0xff] }
 0x3ab   :  { %4779 = vmatprep.subr.mxu0 %v2698_v21  ;;  %4812 = vmatprep.subr.mxu1 %v2731_v26  ;;  %v2764_v21 = vld [vmem:[#allocation11 + $0x8f0] sm:$0xff]  ;;  %v2797_v26 = vld [vmem:[#allocation11 + $0x9f8] sm:$0xff]  ;;  %v2475_v6 = vld [vmem:[#allocation4 + $0x28] sm:$0xff] }
 0x3ac   :  { %4780 = vmatpush3.msra.mxu0 %v2682_v47  ;;  %4813 = vmatpush3.msra.mxu1 %v2715_v33  ;;  %v2748_v47 = vld [vmem:[#allocation11 + $0x870] sm:$0xff]  ;;  %v2781_v33 = vld [vmem:[#allocation11 + $0x978] sm:$0xff] }
 0x3ad   :  { %4781 = vmatprep.subr.mxu0 %v2697_v36  ;;  %4814 = vmatprep.subr.mxu1 %v2730_v39  ;;  %v3089_v36 = vcombine.high %v7098_v7, %v7098_v7  ;;  %v2763_v39 = vld [vmem:[#allocation11 + $0x8e8] sm:$0xff] }
 0x3ae   :  { %4782 = vmatpush3.msra.mxu0 %v2681_v3  ;;  %4815 = vmatpush3.msra.mxu1 %v2714_v31  ;;  %v2747_v3 = vld [vmem:[#allocation11 + $0x868] sm:$0xff]  ;;  %v2780_v31 = vld [vmem:[#allocation11 + $0x970] sm:$0xff] }
 0x3af   :  { %4783 = vmatprep.subr.mxu0 %v2696_v62  ;;  %4816 = vmatprep.subr.mxu1 %v2729_v18  ;;  %v2762_v62 = vld [vmem:[#allocation11 + $0x8e0] sm:$0xff]  ;;  %v2795_v18 = vld [vmem:[#allocation11 + $0x9e8] sm:$0xff] }
 0x3b0   :  { %4784 = vmatpush3.msra.mxu0 %v2680_v51  ;;  %4817 = vmatpush3.msra.mxu1 %v2713_v49  ;;  %v2746_v51 = vld [vmem:[#allocation11 + $0x860] sm:$0xff]  ;;  %v2779_v49 = vld [vmem:[#allocation11 + $0x968] sm:$0xff] }
 0x3b1   :  { %4785 = vmatprep.subr.mxu0 %v2695_v56  ;;  %4818 = vmatprep.subr.mxu1 %v2728_v48  ;;  %v2794_v56 = vld [vmem:[#allocation11 + $0x9e0] sm:$0xff]  ;;  %v2745_v48 = vld [vmem:[#allocation11 + $0x858] sm:$0xff] }
 0x3b2   :  { %4786 = vmatpush3.msra.mxu0 %v2679_v40  ;;  %4819 = vmatpush3.msra.mxu1 %v2712_v60  ;;  %v2778_v40 = vld [vmem:[#allocation11 + $0x960] sm:$0xff]  ;;  %v2760_v60 = vld [vmem:[#allocation11 + $0x8d0] sm:$0xff] }
 0x3b3   :  { %4787 = vmatprep.subr.mxu0 %v2694_v12  ;;  %4820 = vmatprep.subr.mxu1 %v2727_v29  ;;  %v2793_v12 = vld [vmem:[#allocation11 + $0x9d8] sm:$0xff]  ;;  %v2744_v29 = vld [vmem:[#allocation11 + $0x850] sm:$0xff] }
 0x3b4   :  { %4788 = vmatpush3.msra.mxu0 %v2678_v54  ;;  %4821 = vmatpush3.msra.mxu1 %v2711_v37  ;;  %v2777_v54 = vld [vmem:[#allocation11 + $0x958] sm:$0xff]  ;;  %v2759_v37 = vld [vmem:[#allocation11 + $0x8c8] sm:$0xff] }
 0x3b5   :  { %4789 = vmatprep.subr.mxu0 %v2693_v44  ;;  %4822 = vmatprep.subr.mxu1 %v2726_v30  ;;  %v2792_v44 = vld [vmem:[#allocation11 + $0x9d0] sm:$0xff]  ;;  %v2743_v30 = vld [vmem:[#allocation11 + $0x848] sm:$0xff] }
 0x3b6   :  { %4790 = vmatpush3.msra.mxu0 %v2677_v24  ;;  %4823 = vmatpush3.msra.mxu1 %v2710_v27  ;;  %v2776_v24 = vld [vmem:[#allocation11 + $0x950] sm:$0xff]  ;;  %v2758_v27 = vld [vmem:[#allocation11 + $0x8c0] sm:$0xff] }
 0x3b7   :  { %4791 = vmatprep.subr.mxu0 %v2692_v55  ;;  %4824 = vmatprep.subr.mxu1 %v2725_v5  ;;  %v2791_v55 = vld [vmem:[#allocation11 + $0x9c8] sm:$0xff]  ;;  %v2742_v5 = vld [vmem:[#allocation11 + $0x840] sm:$0xff] }
 0x3b8   :  { %4792 = vmatpush3.msra.mxu0 %v2676_v4  ;;  %4825 = vmatpush3.msra.mxu1 %v2709_v32  ;;  %v2775_v4 = vld [vmem:[#allocation11 + $0x948] sm:$0xff]  ;;  %v2757_v32 = vld [vmem:[#allocation11 + $0x8b8] sm:$0xff] }
 0x3b9   :  { %4793 = vmatprep.subr.mxu0 %v2691_v14  ;;  %4826 = vmatprep.subr.mxu1 %v2724_v58  ;;  %v2790_v14 = vld [vmem:[#allocation11 + $0x9c0] sm:$0xff]  ;;  %v2741_v58 = vld [vmem:[#allocation11 + $0x838] sm:$0xff] }
 0x3ba   :  { %4794 = vmatpush3.msra.mxu0 %v2675_v52  ;;  %4827 = vmatpush3.msra.mxu1 %v2708_v8  ;;  %v2774_v52 = vld [vmem:[#allocation11 + $0x940] sm:$0xff]  ;;  %v2756_v8 = vld [vmem:[#allocation11 + $0x8b0] sm:$0xff] }
 0x3bb   :  { %4795 = vmatprep.subr.mxu0 %v2690_v45  ;;  %4828 = vmatprep.subr.mxu1 %v2723_v57  ;;  %v2789_v45 = vld [vmem:[#allocation11 + $0x9b8] sm:$0xff]  ;;  %v2740_v57 = vld [vmem:[#allocation11 + $0x830] sm:$0xff] }
 0x3bc   :  { %4796 = vmatpush3.msra.mxu0 %v2674_v50  ;;  %4829 = vmatpush3.msra.mxu1 %v2707_v2  ;;  %v2773_v50 = vld [vmem:[#allocation11 + $0x938] sm:$0xff]  ;;  %v2755_v2 = vld [vmem:[#allocation11 + $0x8a8] sm:$0xff] }
 0x3bd   :  { %4797 = vmatprep.subr.mxu0 %v2689_v34  ;;  %4830 = vmatprep.subr.mxu1 %v2722_v0  ;;  %v2788_v34 = vld [vmem:[#allocation11 + $0x9b0] sm:$0xff]  ;;  %v2739_v0 = vld [vmem:[#allocation11 + $0x828] sm:$0xff] }
 0x3be   :  { %4798 = vmatpush3.msra.mxu0 %v2673_v42  ;;  %4831 = vmatpush3.msra.mxu1 %v2706_v16  ;;  %v2772_v42 = vld [vmem:[#allocation11 + $0x930] sm:$0xff]  ;;  %v2754_v16 = vld [vmem:[#allocation11 + $0x8a0] sm:$0xff] }
 0x3bf   :  { %4799 = vmatprep.subr.mxu0 %v2688_v13  ;;  %4832 = vmatprep.subr.mxu1 %v2721_v11  ;;  %v2787_v13 = vld [vmem:[#allocation11 + $0x9a8] sm:$0xff]  ;;  %v2738_v11 = vld [vmem:[#allocation11 + $0x820] sm:$0xff] }
 0x3c0   :  { %4800 = vmatpush3.msra.mxu0 %v2672_v10  ;;  %4833 = vmatpush3.msra.mxu1 %v2705_v38  ;;  %v2771_v10 = vld [vmem:[#allocation11 + $0x928] sm:$0xff]  ;;  %v2753_v38 = vld [vmem:[#allocation11 + $0x898] sm:$0xff] }
 0x3c1   :  { %4801 = vmatprep.subr.mxu0 %v2687_v9  ;;  %4834 = vmatprep.subr.mxu1 %v2720_v23  ;;  %v2737_v9 = vld [vmem:[#allocation11 + $0x818] sm:$0xff]  ;;  %v2770_v23 = vld [vmem:[#allocation11 + $0x920] sm:$0xff] }
 0x3c2   :  { %4802 = vmatpush3.msra.mxu0 %v2671_v35  ;;  %4835 = vmatpush3.msra.mxu1 %v2704_v59  ;;  %v2752_v35 = vld [vmem:[#allocation11 + $0x890] sm:$0xff]  ;;  %v2785_v59 = vld [vmem:[#allocation11 + $0x998] sm:$0xff] }
 0x3c3   :  { %4803 = vmatprep.subr.mxu0 %v2686_v20  ;;  %4836 = vmatprep.subr.mxu1 %v2719_v19  ;;  %v2736_v20 = vld [vmem:[#allocation11 + $0x810] sm:$0xff]  ;;  %v2769_v19 = vld [vmem:[#allocation11 + $0x918] sm:$0xff] }
 0x3c4   :  { %4804 = vmatpush3.msra.mxu0 %v2670_v1  ;;  %4837 = vmatpush3.msra.mxu1 %v2703_v43  ;;  %v2751_v1 = vld [vmem:[#allocation11 + $0x888] sm:$0xff]  ;;  %v2784_v43 = vld [vmem:[#allocation11 + $0x990] sm:$0xff] }
 0x3c5   :  { %3658 = vmatmul.mubr.f32.vlgmr.msra.gmra.mxu0 %v7079_v46  ;;  %4838 = vmatprep.subr.mxu1 %v2718_v15  ;;  %v2796_v46 = vld [vmem:[#allocation11 + $0x9f0] sm:$0xff]  ;;  %v2735_v15 = vld [vmem:[#allocation11 + $0x808] sm:$0xff] }
 0x3c6   :  { %4843 = vmatprep.subr.mxu0 %v2765_v28  ;;  %4839 = vmatpush3.msra.mxu1 %v2702_v41  ;;  %v2768_v28 = vld [vmem:[#allocation11 + $0x910] sm:$0xff]  ;;  %v2750_v41 = vld [vmem:[#allocation11 + $0x880] sm:$0xff] }
 0x3c7   :  { %4844 = vmatpush3.msra.mxu0 %v2749_v25  ;;  %3797 = vmatprep.mubr.f32.mxu0 %v3088_v61  ;;  %v2783_v25 = vld [vmem:[#allocation11 + $0x988] sm:$0xff]  ;;  %v3090_v61 = vcombine.high %v2475_v6, %v2475_v6 }
 0x3c8   :  { %3728 = vmatmul.mubr.f32.vlgmr.msra.gmra.mxu1 %v7083_v63  ;;  %4845 = vmatprep.subr.mxu0 %v2764_v21  ;;  %v2761_v63 = vld [vmem:[#allocation11 + $0x8d8] sm:$0xff]  ;;  %v2734_v21 = vld [vmem:[#allocation11 + $0x800] sm:$0xff] }
 0x3c9   :  { %4878 = vmatprep.subr.mxu1 %v2797_v26  ;;  %4846 = vmatpush3.msra.mxu0 %v2748_v47  ;;  %v2767_v26 = vld [vmem:[#allocation11 + $0x908] sm:$0xff]  ;;  %v7107_v47 = vrot.slane %v2475_v6, %v6407_v53  ;;  %v2850_v6 = vld [vmem:[#allocation11 + $0xba0] sm:$0xff] }
 0x3ca   :  { %4879 = vmatpush3.msra.mxu1 %v2781_v33  ;;  %3867 = vmatprep.mubr.f32.mxu1 %v3089_v36  ;;  %v2782_v33 = vld [vmem:[#allocation11 + $0x980] sm:$0xff]  ;;  %v2829_v36 = vld [vmem:[#allocation11 + $0xaf8] sm:$0xff] }
 0x3cb   :  { %4847 = vmatprep.subr.mxu0 %v2763_v39  ;;  %4880 = vmatprep.subr.mxu1 %v2796_v46  ;;  %v2766_v39 = vld [vmem:[#allocation11 + $0x900] sm:$0xff]  ;;  %v2813_v46 = vld [vmem:[#allocation11 + $0xa78] sm:$0xff] }
 0x3cc   :  { %4848 = vmatpush3.msra.mxu0 %v2747_v3  ;;  %4881 = vmatpush3.msra.mxu1 %v2780_v31  ;;  %v7110_v3 = vrot.slane %v3090_v61, %v6407_v53  ;;  %v3105_v31 = vcombine.high %v7107_v47, %v7107_v47  ;;  %v2476_v61 = vld [vmem:[#allocation4 + $0x30] sm:$0xff] }
 0x3cd   :  { %4849 = vmatprep.subr.mxu0 %v2762_v62  ;;  %4882 = vmatprep.subr.mxu1 %v2795_v18  ;;  %v2828_v62 = vld [vmem:[#allocation11 + $0xaf0] sm:$0xff]  ;;  %v2861_v18 = vld [vmem:[#allocation11 + $0xbf8] sm:$0xff] }
 0x3ce   :  { %4850 = vmatpush3.msra.mxu0 %v2746_v51  ;;  %4883 = vmatpush3.msra.mxu1 %v2779_v49  ;;  %v2812_v51 = vld [vmem:[#allocation11 + $0xa70] sm:$0xff]  ;;  %v2845_v49 = vld [vmem:[#allocation11 + $0xb78] sm:$0xff] }
 0x3cf   :  { %4851 = vmatprep.subr.mxu0 %v2761_v63  ;;  %4884 = vmatprep.subr.mxu1 %v2794_v56  ;;  %v3106_v63 = vcombine.high %v7110_v3, %v7110_v3  ;;  %v2827_v56 = vld [vmem:[#allocation11 + $0xae8] sm:$0xff] }
 0x3d0   :  { %4852 = vmatpush3.msra.mxu0 %v2745_v48  ;;  %4885 = vmatpush3.msra.mxu1 %v2778_v40  ;;  %v2811_v48 = vld [vmem:[#allocation11 + $0xa68] sm:$0xff]  ;;  %v2844_v40 = vld [vmem:[#allocation11 + $0xb70] sm:$0xff] }
 0x3d1   :  { %4853 = vmatprep.subr.mxu0 %v2760_v60  ;;  %4886 = vmatprep.subr.mxu1 %v2793_v12  ;;  %v2826_v60 = vld [vmem:[#allocation11 + $0xae0] sm:$0xff]  ;;  %v2859_v12 = vld [vmem:[#allocation11 + $0xbe8] sm:$0xff] }
 0x3d2   :  { %4854 = vmatpush3.msra.mxu0 %v2744_v29  ;;  %4887 = vmatpush3.msra.mxu1 %v2777_v54  ;;  %v2810_v29 = vld [vmem:[#allocation11 + $0xa60] sm:$0xff]  ;;  %v2843_v54 = vld [vmem:[#allocation11 + $0xb68] sm:$0xff] }
 0x3d3   :  { %4855 = vmatprep.subr.mxu0 %v2759_v37  ;;  %4888 = vmatprep.subr.mxu1 %v2792_v44  ;;  %v2858_v37 = vld [vmem:[#allocation11 + $0xbe0] sm:$0xff]  ;;  %v2809_v44 = vld [vmem:[#allocation11 + $0xa58] sm:$0xff] }
 0x3d4   :  { %4856 = vmatpush3.msra.mxu0 %v2743_v30  ;;  %4889 = vmatpush3.msra.mxu1 %v2776_v24  ;;  %v2842_v30 = vld [vmem:[#allocation11 + $0xb60] sm:$0xff]  ;;  %v2824_v24 = vld [vmem:[#allocation11 + $0xad0] sm:$0xff] }
 0x3d5   :  { %4857 = vmatprep.subr.mxu0 %v2758_v27  ;;  %4890 = vmatprep.subr.mxu1 %v2791_v55  ;;  %v2857_v27 = vld [vmem:[#allocation11 + $0xbd8] sm:$0xff]  ;;  %v2808_v55 = vld [vmem:[#allocation11 + $0xa50] sm:$0xff] }
 0x3d6   :  { %4858 = vmatpush3.msra.mxu0 %v2742_v5  ;;  %4891 = vmatpush3.msra.mxu1 %v2775_v4  ;;  %v2841_v5 = vld [vmem:[#allocation11 + $0xb58] sm:$0xff]  ;;  %v2823_v4 = vld [vmem:[#allocation11 + $0xac8] sm:$0xff] }
 0x3d7   :  { %4859 = vmatprep.subr.mxu0 %v2757_v32  ;;  %4892 = vmatprep.subr.mxu1 %v2790_v14  ;;  %v2856_v32 = vld [vmem:[#allocation11 + $0xbd0] sm:$0xff]  ;;  %v2807_v14 = vld [vmem:[#allocation11 + $0xa48] sm:$0xff] }
 0x3d8   :  { %4860 = vmatpush3.msra.mxu0 %v2741_v58  ;;  %4893 = vmatpush3.msra.mxu1 %v2774_v52  ;;  %v2840_v58 = vld [vmem:[#allocation11 + $0xb50] sm:$0xff]  ;;  %v2822_v52 = vld [vmem:[#allocation11 + $0xac0] sm:$0xff] }
 0x3d9   :  { %4861 = vmatprep.subr.mxu0 %v2756_v8  ;;  %4894 = vmatprep.subr.mxu1 %v2789_v45  ;;  %v2855_v8 = vld [vmem:[#allocation11 + $0xbc8] sm:$0xff]  ;;  %v2806_v45 = vld [vmem:[#allocation11 + $0xa40] sm:$0xff] }
 0x3da   :  { %4862 = vmatpush3.msra.mxu0 %v2740_v57  ;;  %4895 = vmatpush3.msra.mxu1 %v2773_v50  ;;  %v2839_v57 = vld [vmem:[#allocation11 + $0xb48] sm:$0xff]  ;;  %v2821_v50 = vld [vmem:[#allocation11 + $0xab8] sm:$0xff] }
 0x3db   :  { %4863 = vmatprep.subr.mxu0 %v2755_v2  ;;  %4896 = vmatprep.subr.mxu1 %v2788_v34  ;;  %v2854_v2 = vld [vmem:[#allocation11 + $0xbc0] sm:$0xff]  ;;  %v2805_v34 = vld [vmem:[#allocation11 + $0xa38] sm:$0xff] }
 0x3dc   :  { %4864 = vmatpush3.msra.mxu0 %v2739_v0  ;;  %4897 = vmatpush3.msra.mxu1 %v2772_v42  ;;  %v2838_v0 = vld [vmem:[#allocation11 + $0xb40] sm:$0xff]  ;;  %v2820_v42 = vld [vmem:[#allocation11 + $0xab0] sm:$0xff] }
 0x3dd   :  { %4865 = vmatprep.subr.mxu0 %v2754_v16  ;;  %4898 = vmatprep.subr.mxu1 %v2787_v13  ;;  %v2853_v16 = vld [vmem:[#allocation11 + $0xbb8] sm:$0xff]  ;;  %v2804_v13 = vld [vmem:[#allocation11 + $0xa30] sm:$0xff] }
 0x3de   :  { %4866 = vmatpush3.msra.mxu0 %v2738_v11  ;;  %4899 = vmatpush3.msra.mxu1 %v2771_v10  ;;  %v2837_v11 = vld [vmem:[#allocation11 + $0xb38] sm:$0xff]  ;;  %v2819_v10 = vld [vmem:[#allocation11 + $0xaa8] sm:$0xff] }
 0x3df   :  { %4867 = vmatprep.subr.mxu0 %v2753_v38  ;;  %4900 = vmatprep.subr.mxu1 %v2786_v17  ;;  %v2852_v38 = vld [vmem:[#allocation11 + $0xbb0] sm:$0xff]  ;;  %v2803_v17 = vld [vmem:[#allocation11 + $0xa28] sm:$0xff] }
 0x3e0   :  { %4868 = vmatpush3.msra.mxu0 %v2737_v9  ;;  %4901 = vmatpush3.msra.mxu1 %v2770_v23  ;;  %v2836_v9 = vld [vmem:[#allocation11 + $0xb30] sm:$0xff]  ;;  %v2818_v23 = vld [vmem:[#allocation11 + $0xaa0] sm:$0xff] }
 0x3e1   :  { %4869 = vmatprep.subr.mxu0 %v2752_v35  ;;  %4902 = vmatprep.subr.mxu1 %v2785_v59  ;;  %v2851_v35 = vld [vmem:[#allocation11 + $0xba8] sm:$0xff]  ;;  %v2802_v59 = vld [vmem:[#allocation11 + $0xa20] sm:$0xff] }
 0x3e2   :  { %4870 = vmatpush3.msra.mxu0 %v2736_v20  ;;  %4903 = vmatpush3.msra.mxu1 %v2769_v19  ;;  %v2835_v20 = vld [vmem:[#allocation11 + $0xb28] sm:$0xff]  ;;  %v2817_v19 = vld [vmem:[#allocation11 + $0xa98] sm:$0xff] }
 0x3e3   :  { %4871 = vmatprep.subr.mxu0 %v2751_v1  ;;  %4904 = vmatprep.subr.mxu1 %v2784_v43  ;;  %v2801_v1 = vld [vmem:[#allocation11 + $0xa18] sm:$0xff]  ;;  %v2834_v43 = vld [vmem:[#allocation11 + $0xb20] sm:$0xff] }
 0x3e4   :  { %4872 = vmatpush3.msra.mxu0 %v2735_v15  ;;  %4905 = vmatpush3.msra.mxu1 %v2768_v28  ;;  %v2816_v15 = vld [vmem:[#allocation11 + $0xa90] sm:$0xff]  ;;  %v2849_v28 = vld [vmem:[#allocation11 + $0xb98] sm:$0xff] }
 0x3e5   :  { %4873 = vmatprep.subr.mxu0 %v2750_v41  ;;  %4906 = vmatprep.subr.mxu1 %v2783_v25  ;;  %v2800_v41 = vld [vmem:[#allocation11 + $0xa10] sm:$0xff]  ;;  %v2833_v25 = vld [vmem:[#allocation11 + $0xb18] sm:$0xff] }
 0x3e6   :  { %4874 = vmatpush3.msra.mxu0 %v2734_v21  ;;  %4907 = vmatpush3.msra.mxu1 %v2767_v26  ;;  %v2815_v21 = vld [vmem:[#allocation11 + $0xa88] sm:$0xff]  ;;  %v2848_v26 = vld [vmem:[#allocation11 + $0xb90] sm:$0xff] }
 0x3e7   :  { %3798 = vmatmul.mubr.f32.vlgmr.msra.gmra.mxu0 %v7095_v22  ;;  %4908 = vmatprep.subr.mxu1 %v2782_v33  ;;  %v2860_v22 = vld [vmem:[#allocation11 + $0xbf0] sm:$0xff]  ;;  %v2799_v33 = vld [vmem:[#allocation11 + $0xa08] sm:$0xff] }
 0x3e8   :  { %4913 = vmatprep.subr.mxu0 %v2829_v36  ;;  %4909 = vmatpush3.msra.mxu1 %v2766_v39  ;;  %v2832_v36 = vld [vmem:[#allocation11 + $0xb10] sm:$0xff]  ;;  %v2814_v39 = vld [vmem:[#allocation11 + $0xa80] sm:$0xff] }
 0x3e9   :  { %4914 = vmatpush3.msra.mxu0 %v2813_v46  ;;  %3937 = vmatprep.mubr.f32.mxu0 %v3105_v31  ;;  %v2847_v46 = vld [vmem:[#allocation11 + $0xb88] sm:$0xff]  ;;  %v3107_v31 = vcombine.high %v2476_v61, %v2476_v61 }
 0x3ea   :  { %3868 = vmatmul.mubr.f32.vlgmr.msra.gmra.mxu1 %v7098_v7  ;;  %4915 = vmatprep.subr.mxu0 %v2828_v62  ;;  %v2825_v7 = vld [vmem:[#allocation11 + $0xad8] sm:$0xff]  ;;  %v2798_v62 = vld [vmem:[#allocation11 + $0xa00] sm:$0xff] }
 0x3eb   :  { %4948 = vmatprep.subr.mxu1 %v2861_v18  ;;  %4916 = vmatpush3.msra.mxu0 %v2812_v51  ;;  %v2831_v18 = vld [vmem:[#allocation11 + $0xb08] sm:$0xff]  ;;  %v7119_v51 = vrot.slane %v2476_v61, %v6407_v53  ;;  %v2914_v61 = vld [vmem:[#allocation11 + $0xda0] sm:$0xff] }
 0x3ec   :  { %4949 = vmatpush3.msra.mxu1 %v2845_v49  ;;  %4007 = vmatprep.mubr.f32.mxu1 %v3106_v63  ;;  %v2846_v49 = vld [vmem:[#allocation11 + $0xb80] sm:$0xff]  ;;  %v2893_v63 = vld [vmem:[#allocation11 + $0xcf8] sm:$0xff] }
 0x3ed   :  { %4917 = vmatprep.subr.mxu0 %v2827_v56  ;;  %4950 = vmatprep.subr.mxu1 %v2860_v22  ;;  %v2830_v56 = vld [vmem:[#allocation11 + $0xb00] sm:$0xff]  ;;  %v2877_v22 = vld [vmem:[#allocation11 + $0xc78] sm:$0xff] }
 0x3ee   :  { %4918 = vmatpush3.msra.mxu0 %v2811_v48  ;;  %4951 = vmatpush3.msra.mxu1 %v2844_v40  ;;  %v7122_v48 = vrot.slane %v3107_v31, %v6407_v53  ;;  %v3122_v40 = vcombine.high %v7119_v51, %v7119_v51  ;;  %v2477_v31 = vld [vmem:[#allocation4 + $0x38] sm:$0xff] }
 0x3ef   :  { %4919 = vmatprep.subr.mxu0 %v2826_v60  ;;  %4952 = vmatprep.subr.mxu1 %v2859_v12  ;;  %v2892_v60 = vld [vmem:[#allocation11 + $0xcf0] sm:$0xff]  ;;  %v2925_v12 = vld [vmem:[#allocation11 + $0xdf8] sm:$0xff] }
 0x3f0   :  { %4920 = vmatpush3.msra.mxu0 %v2810_v29  ;;  %4953 = vmatpush3.msra.mxu1 %v2843_v54  ;;  %v2876_v29 = vld [vmem:[#allocation11 + $0xc70] sm:$0xff]  ;;  %v2909_v54 = vld [vmem:[#allocation11 + $0xd78] sm:$0xff] }
 0x3f1   :  { %4921 = vmatprep.subr.mxu0 %v2825_v7  ;;  %4954 = vmatprep.subr.mxu1 %v2858_v37  ;;  %v3123_v7 = vcombine.high %v7122_v48, %v7122_v48  ;;  %v2891_v37 = vld [vmem:[#allocation11 + $0xce8] sm:$0xff] }
 0x3f2   :  { %4922 = vmatpush3.msra.mxu0 %v2809_v44  ;;  %4955 = vmatpush3.msra.mxu1 %v2842_v30  ;;  %v2875_v44 = vld [vmem:[#allocation11 + $0xc68] sm:$0xff]  ;;  %v2908_v30 = vld [vmem:[#allocation11 + $0xd70] sm:$0xff] }
 0x3f3   :  { %4923 = vmatprep.subr.mxu0 %v2824_v24  ;;  %4956 = vmatprep.subr.mxu1 %v2857_v27  ;;  %v2890_v24 = vld [vmem:[#allocation11 + $0xce0] sm:$0xff]  ;;  %v2923_v27 = vld [vmem:[#allocation11 + $0xde8] sm:$0xff] }
 0x3f4   :  { %4924 = vmatpush3.msra.mxu0 %v2808_v55  ;;  %4957 = vmatpush3.msra.mxu1 %v2841_v5  ;;  %v2874_v55 = vld [vmem:[#allocation11 + $0xc60] sm:$0xff]  ;;  %v2907_v5 = vld [vmem:[#allocation11 + $0xd68] sm:$0xff] }
 0x3f5   :  { %4925 = vmatprep.subr.mxu0 %v2823_v4  ;;  %4958 = vmatprep.subr.mxu1 %v2856_v32  ;;  %v2922_v4 = vld [vmem:[#allocation11 + $0xde0] sm:$0xff]  ;;  %v2873_v32 = vld [vmem:[#allocation11 + $0xc58] sm:$0xff] }
 0x3f6   :  { %4926 = vmatpush3.msra.mxu0 %v2807_v14  ;;  %4959 = vmatpush3.msra.mxu1 %v2840_v58  ;;  %v2906_v14 = vld [vmem:[#allocation11 + $0xd60] sm:$0xff]  ;;  %v2888_v58 = vld [vmem:[#allocation11 + $0xcd0] sm:$0xff] }
 0x3f7   :  { %4927 = vmatprep.subr.mxu0 %v2822_v52  ;;  %4960 = vmatprep.subr.mxu1 %v2855_v8  ;;  %v2921_v52 = vld [vmem:[#allocation11 + $0xdd8] sm:$0xff]  ;;  %v2872_v8 = vld [vmem:[#allocation11 + $0xc50] sm:$0xff] }
 0x3f8   :  { %4928 = vmatpush3.msra.mxu0 %v2806_v45  ;;  %4961 = vmatpush3.msra.mxu1 %v2839_v57  ;;  %v2905_v45 = vld [vmem:[#allocation11 + $0xd58] sm:$0xff]  ;;  %v2887_v57 = vld [vmem:[#allocation11 + $0xcc8] sm:$0xff] }
 0x3f9   :  { %4929 = vmatprep.subr.mxu0 %v2821_v50  ;;  %4962 = vmatprep.subr.mxu1 %v2854_v2  ;;  %v2920_v50 = vld [vmem:[#allocation11 + $0xdd0] sm:$0xff]  ;;  %v2871_v2 = vld [vmem:[#allocation11 + $0xc48] sm:$0xff] }
 0x3fa   :  { %4930 = vmatpush3.msra.mxu0 %v2805_v34  ;;  %4963 = vmatpush3.msra.mxu1 %v2838_v0  ;;  %v2904_v34 = vld [vmem:[#allocation11 + $0xd50] sm:$0xff]  ;;  %v2886_v0 = vld [vmem:[#allocation11 + $0xcc0] sm:$0xff] }
 0x3fb   :  { %4931 = vmatprep.subr.mxu0 %v2820_v42  ;;  %4964 = vmatprep.subr.mxu1 %v2853_v16  ;;  %v2919_v42 = vld [vmem:[#allocation11 + $0xdc8] sm:$0xff]  ;;  %v2870_v16 = vld [vmem:[#allocation11 + $0xc40] sm:$0xff] }
 0x3fc   :  { %4932 = vmatpush3.msra.mxu0 %v2804_v13  ;;  %4965 = vmatpush3.msra.mxu1 %v2837_v11  ;;  %v2903_v13 = vld [vmem:[#allocation11 + $0xd48] sm:$0xff]  ;;  %v2885_v11 = vld [vmem:[#allocation11 + $0xcb8] sm:$0xff] }
 0x3fd   :  { %4933 = vmatprep.subr.mxu0 %v2819_v10  ;;  %4966 = vmatprep.subr.mxu1 %v2852_v38  ;;  %v2918_v10 = vld [vmem:[#allocation11 + $0xdc0] sm:$0xff]  ;;  %v2869_v38 = vld [vmem:[#allocation11 + $0xc38] sm:$0xff] }
 0x3fe   :  { %4934 = vmatpush3.msra.mxu0 %v2803_v17  ;;  %4967 = vmatpush3.msra.mxu1 %v2836_v9  ;;  %v2902_v17 = vld [vmem:[#allocation11 + $0xd40] sm:$0xff]  ;;  %v2884_v9 = vld [vmem:[#allocation11 + $0xcb0] sm:$0xff] }
 0x3ff   :  { %4935 = vmatprep.subr.mxu0 %v2818_v23  ;;  %4968 = vmatprep.subr.mxu1 %v2851_v35  ;;  %v2917_v23 = vld [vmem:[#allocation11 + $0xdb8] sm:$0xff]  ;;  %v2868_v35 = vld [vmem:[#allocation11 + $0xc30] sm:$0xff] }
 0x400   :  { %4936 = vmatpush3.msra.mxu0 %v2802_v59  ;;  %4969 = vmatpush3.msra.mxu1 %v2835_v20  ;;  %v2901_v59 = vld [vmem:[#allocation11 + $0xd38] sm:$0xff]  ;;  %v2883_v20 = vld [vmem:[#allocation11 + $0xca8] sm:$0xff] }
 0x401   :  { %4937 = vmatprep.subr.mxu0 %v2817_v19  ;;  %4970 = vmatprep.subr.mxu1 %v2850_v6  ;;  %v2916_v19 = vld [vmem:[#allocation11 + $0xdb0] sm:$0xff]  ;;  %v2867_v6 = vld [vmem:[#allocation11 + $0xc28] sm:$0xff] }
 0x402   :  { %4938 = vmatpush3.msra.mxu0 %v2801_v1  ;;  %4971 = vmatpush3.msra.mxu1 %v2834_v43  ;;  %v2900_v1 = vld [vmem:[#allocation11 + $0xd30] sm:$0xff]  ;;  %v2882_v43 = vld [vmem:[#allocation11 + $0xca0] sm:$0xff] }
 0x403   :  { %4939 = vmatprep.subr.mxu0 %v2816_v15  ;;  %4972 = vmatprep.subr.mxu1 %v2849_v28  ;;  %v2915_v15 = vld [vmem:[#allocation11 + $0xda8] sm:$0xff]  ;;  %v2866_v28 = vld [vmem:[#allocation11 + $0xc20] sm:$0xff] }
 0x404   :  { %4940 = vmatpush3.msra.mxu0 %v2800_v41  ;;  %4973 = vmatpush3.msra.mxu1 %v2833_v25  ;;  %v2899_v41 = vld [vmem:[#allocation11 + $0xd28] sm:$0xff]  ;;  %v2881_v25 = vld [vmem:[#allocation11 + $0xc98] sm:$0xff] }
 0x405   :  { %4941 = vmatprep.subr.mxu0 %v2815_v21  ;;  %4974 = vmatprep.subr.mxu1 %v2848_v26  ;;  %v2865_v21 = vld [vmem:[#allocation11 + $0xc18] sm:$0xff]  ;;  %v2898_v26 = vld [vmem:[#allocation11 + $0xd20] sm:$0xff] }
 0x406   :  { %4942 = vmatpush3.msra.mxu0 %v2799_v33  ;;  %4975 = vmatpush3.msra.mxu1 %v2832_v36  ;;  %v2880_v33 = vld [vmem:[#allocation11 + $0xc90] sm:$0xff]  ;;  %v2913_v36 = vld [vmem:[#allocation11 + $0xd98] sm:$0xff] }
 0x407   :  { %4943 = vmatprep.subr.mxu0 %v2814_v39  ;;  %4976 = vmatprep.subr.mxu1 %v2847_v46  ;;  %v2864_v39 = vld [vmem:[#allocation11 + $0xc10] sm:$0xff]  ;;  %v2897_v46 = vld [vmem:[#allocation11 + $0xd18] sm:$0xff] }
 0x408   :  { %4944 = vmatpush3.msra.mxu0 %v2798_v62  ;;  %4977 = vmatpush3.msra.mxu1 %v2831_v18  ;;  %v2879_v62 = vld [vmem:[#allocation11 + $0xc88] sm:$0xff]  ;;  %v2912_v18 = vld [vmem:[#allocation11 + $0xd90] sm:$0xff] }
 0x409   :  { %3938 = vmatmul.mubr.f32.vlgmr.msra.gmra.mxu0 %v7107_v47  ;;  %4978 = vmatprep.subr.mxu1 %v2846_v49  ;;  %v2924_v47 = vld [vmem:[#allocation11 + $0xdf0] sm:$0xff]  ;;  %v2863_v49 = vld [vmem:[#allocation11 + $0xc08] sm:$0xff] }
 0x40a   :  { %4983 = vmatprep.subr.mxu0 %v2893_v63  ;;  %4979 = vmatpush3.msra.mxu1 %v2830_v56  ;;  %v2896_v63 = vld [vmem:[#allocation11 + $0xd10] sm:$0xff]  ;;  %v2878_v56 = vld [vmem:[#allocation11 + $0xc80] sm:$0xff] }
 0x40b   :  { %4984 = vmatpush3.msra.mxu0 %v2877_v22  ;;  %4077 = vmatprep.mubr.f32.mxu0 %v3122_v40  ;;  %v2911_v22 = vld [vmem:[#allocation11 + $0xd88] sm:$0xff]  ;;  %v3124_v40 = vcombine.high %v2477_v31, %v2477_v31 }
 0x40c   :  { %4008 = vmatmul.mubr.f32.vlgmr.msra.gmra.mxu1 %v7110_v3  ;;  %4985 = vmatprep.subr.mxu0 %v2892_v60  ;;  %v2889_v3 = vld [vmem:[#allocation11 + $0xcd8] sm:$0xff]  ;;  %v2862_v60 = vld [vmem:[#allocation11 + $0xc00] sm:$0xff] }
 0x40d   :  { %5018 = vmatprep.subr.mxu1 %v2925_v12  ;;  %4986 = vmatpush3.msra.mxu0 %v2876_v29  ;;  %v2895_v12 = vld [vmem:[#allocation11 + $0xd08] sm:$0xff]  ;;  %v7131_v29 = vrot.slane %v2477_v31, %v6407_v53  ;;  %v2929_v31 = vld [vmem:[#allocation11 + $0xe18] sm:$0xff] }
 0x40e   :  { %5019 = vmatpush3.msra.mxu1 %v2909_v54  ;;  %4147 = vmatprep.mubr.f32.mxu1 %v3123_v7  ;;  %v2910_v54 = vld [vmem:[#allocation11 + $0xd80] sm:$0xff]  ;;  %v2957_v7 = vld [vmem:[#allocation11 + $0xef8] sm:$0xff] }
 0x40f   :  { %4987 = vmatprep.subr.mxu0 %v2891_v37  ;;  %5020 = vmatprep.subr.mxu1 %v2924_v47  ;;  %v2894_v37 = vld [vmem:[#allocation11 + $0xd00] sm:$0xff]  ;;  %v2941_v47 = vld [vmem:[#allocation11 + $0xe78] sm:$0xff] }
 0x410   :  { %4988 = vmatpush3.msra.mxu0 %v2875_v44  ;;  %5021 = vmatpush3.msra.mxu1 %v2908_v30  ;;  %v7134_v44 = vrot.slane %v3124_v40, %v6407_v53  ;;  %v3139_v30 = vcombine.high %v7131_v29, %v7131_v29  ;;  %v2976_v40 = vld [vmem:[#allocation11 + $0xf90] sm:$0xff] }
 0x411   :  { %4989 = vmatprep.subr.mxu0 %v2890_v24  ;;  %5022 = vmatprep.subr.mxu1 %v2923_v27  ;;  %v2956_v24 = vld [vmem:[#allocation11 + $0xef0] sm:$0xff]  ;;  %v2989_v27 = vld [vmem:[#allocation11 + $0xff8] sm:$0xff] }
 0x412   :  { %4990 = vmatpush3.msra.mxu0 %v2874_v55  ;;  %5023 = vmatpush3.msra.mxu1 %v2907_v5  ;;  %v2940_v55 = vld [vmem:[#allocation11 + $0xe70] sm:$0xff]  ;;  %v2973_v5 = vld [vmem:[#allocation11 + $0xf78] sm:$0xff]  ;;  %v3140_v53 = vcombine.high %v7134_v44, %v7134_v44 }
 0x413   :  { %4991 = vmatprep.subr.mxu0 %v2889_v3  ;;  %5024 = vmatprep.subr.mxu1 %v2922_v4  ;;  %v2955_v3 = vld [vmem:[#allocation11 + $0xee8] sm:$0xff] }
 0x414   :  { %4992 = vmatpush3.msra.mxu0 %v2873_v32  ;;  %5025 = vmatpush3.msra.mxu1 %v2906_v14  ;;  %v2939_v4 = vld [vmem:[#allocation11 + $0xe68] sm:$0xff]  ;;  %v2972_v32 = vld [vmem:[#allocation11 + $0xf70] sm:$0xff]  ;;  %v2954_v14 = vld [vmem:[#allocation11 + $0xee0] sm:$0xff] }
 0x415   :  { %4993 = vmatprep.subr.mxu0 %v2888_v58  ;;  %5026 = vmatprep.subr.mxu1 %v2921_v52  ;;  %v2987_v58 = vld [vmem:[#allocation11 + $0xfe8] sm:$0xff]  ;;  %v2938_v52 = vld [vmem:[#allocation11 + $0xe60] sm:$0xff] }
 0x416   :  { %4994 = vmatpush3.msra.mxu0 %v2872_v8  ;;  %5027 = vmatpush3.msra.mxu1 %v2905_v45  ;;  %v2971_v8 = vld [vmem:[#allocation11 + $0xf68] sm:$0xff]  ;;  %v2986_v45 = vld [vmem:[#allocation11 + $0xfe0] sm:$0xff] }
 0x417   :  { %4995 = vmatprep.subr.mxu0 %v2887_v57  ;;  %5028 = vmatprep.subr.mxu1 %v2920_v50  ;;  %v2937_v57 = vld [vmem:[#allocation11 + $0xe58] sm:$0xff]  ;;  %v2970_v50 = vld [vmem:[#allocation11 + $0xf60] sm:$0xff] }
 0x418   :  { %4996 = vmatpush3.msra.mxu0 %v2871_v2  ;;  %5029 = vmatpush3.msra.mxu1 %v2904_v34  ;;  %v2952_v2 = vld [vmem:[#allocation11 + $0xed0] sm:$0xff]  ;;  %v2985_v34 = vld [vmem:[#allocation11 + $0xfd8] sm:$0xff] }
 0x419   :  { %4997 = vmatprep.subr.mxu0 %v2886_v0  ;;  %5030 = vmatprep.subr.mxu1 %v2919_v42  ;;  %v2936_v0 = vld [vmem:[#allocation11 + $0xe50] sm:$0xff]  ;;  %v2969_v42 = vld [vmem:[#allocation11 + $0xf58] sm:$0xff] }
 0x41a   :  { %4998 = vmatpush3.msra.mxu0 %v2870_v16  ;;  %5031 = vmatpush3.msra.mxu1 %v2903_v13  ;;  %v2951_v16 = vld [vmem:[#allocation11 + $0xec8] sm:$0xff]  ;;  %v2984_v13 = vld [vmem:[#allocation11 + $0xfd0] sm:$0xff] }
 0x41b   :  { %4999 = vmatprep.subr.mxu0 %v2885_v11  ;;  %5032 = vmatprep.subr.mxu1 %v2918_v10  ;;  %v2935_v11 = vld [vmem:[#allocation11 + $0xe48] sm:$0xff]  ;;  %v2968_v10 = vld [vmem:[#allocation11 + $0xf50] sm:$0xff] }
 0x41c   :  { %5000 = vmatpush3.msra.mxu0 %v2869_v38  ;;  %5033 = vmatpush3.msra.mxu1 %v2902_v17  ;;  %v2950_v38 = vld [vmem:[#allocation11 + $0xec0] sm:$0xff]  ;;  %v2983_v17 = vld [vmem:[#allocation11 + $0xfc8] sm:$0xff] }
 0x41d   :  { %5001 = vmatprep.subr.mxu0 %v2884_v9  ;;  %5034 = vmatprep.subr.mxu1 %v2917_v23  ;;  %v2934_v9 = vld [vmem:[#allocation11 + $0xe40] sm:$0xff]  ;;  %v2967_v23 = vld [vmem:[#allocation11 + $0xf48] sm:$0xff] }
 0x41e   :  { %5002 = vmatpush3.msra.mxu0 %v2868_v35  ;;  %5035 = vmatpush3.msra.mxu1 %v2901_v59  ;;  %v2949_v35 = vld [vmem:[#allocation11 + $0xeb8] sm:$0xff]  ;;  %v2982_v59 = vld [vmem:[#allocation11 + $0xfc0] sm:$0xff] }
 0x41f   :  { %5003 = vmatprep.subr.mxu0 %v2883_v20  ;;  %5036 = vmatprep.subr.mxu1 %v2916_v19  ;;  %v2933_v20 = vld [vmem:[#allocation11 + $0xe38] sm:$0xff]  ;;  %v2966_v19 = vld [vmem:[#allocation11 + $0xf40] sm:$0xff] }
 0x420   :  { %5004 = vmatpush3.msra.mxu0 %v2867_v6  ;;  %5037 = vmatpush3.msra.mxu1 %v2900_v1  ;;  %v2948_v6 = vld [vmem:[#allocation11 + $0xeb0] sm:$0xff]  ;;  %v2981_v1 = vld [vmem:[#allocation11 + $0xfb8] sm:$0xff] }
 0x421   :  { %5005 = vmatprep.subr.mxu0 %v2882_v43  ;;  %5038 = vmatprep.subr.mxu1 %v2915_v15  ;;  %v2932_v43 = vld [vmem:[#allocation11 + $0xe30] sm:$0xff]  ;;  %v2965_v15 = vld [vmem:[#allocation11 + $0xf38] sm:$0xff] }
 0x422   :  { %5006 = vmatpush3.msra.mxu0 %v2866_v28  ;;  %5039 = vmatpush3.msra.mxu1 %v2899_v41  ;;  %v2947_v28 = vld [vmem:[#allocation11 + $0xea8] sm:$0xff]  ;;  %v2980_v41 = vld [vmem:[#allocation11 + $0xfb0] sm:$0xff] }
 0x423   :  { %5007 = vmatprep.subr.mxu0 %v2881_v25  ;;  %5040 = vmatprep.subr.mxu1 %v2914_v61  ;;  %v2931_v25 = vld [vmem:[#allocation11 + $0xe28] sm:$0xff]  ;;  %v2964_v61 = vld [vmem:[#allocation11 + $0xf30] sm:$0xff] }
 0x424   :  { %5008 = vmatpush3.msra.mxu0 %v2865_v21  ;;  %5041 = vmatpush3.msra.mxu1 %v2898_v26  ;;  %v2946_v21 = vld [vmem:[#allocation11 + $0xea0] sm:$0xff]  ;;  %v2979_v26 = vld [vmem:[#allocation11 + $0xfa8] sm:$0xff] }
 0x425   :  { %5009 = vmatprep.subr.mxu0 %v2880_v33  ;;  %5042 = vmatprep.subr.mxu1 %v2913_v36  ;;  %v2930_v33 = vld [vmem:[#allocation11 + $0xe20] sm:$0xff]  ;;  %v2963_v36 = vld [vmem:[#allocation11 + $0xf28] sm:$0xff] }
 0x426   :  { %5010 = vmatpush3.msra.mxu0 %v2864_v39  ;;  %5043 = vmatpush3.msra.mxu1 %v2897_v46  ;;  %v2945_v39 = vld [vmem:[#allocation11 + $0xe98] sm:$0xff]  ;;  %v2978_v46 = vld [vmem:[#allocation11 + $0xfa0] sm:$0xff] }
 0x427   :  { %5011 = vmatprep.subr.mxu0 %v2879_v62  ;;  %5044 = vmatprep.subr.mxu1 %v2912_v18  ;;  %v2962_v62 = vld [vmem:[#allocation11 + $0xf20] sm:$0xff]  ;;  %v2944_v18 = vld [vmem:[#allocation11 + $0xe90] sm:$0xff] }
 0x428   :  { %5012 = vmatpush3.msra.mxu0 %v2863_v49  ;;  %5045 = vmatpush3.msra.mxu1 %v2896_v63  ;;  %v2977_v49 = vld [vmem:[#allocation11 + $0xf98] sm:$0xff]  ;;  %v2928_v63 = vld [vmem:[#allocation11 + $0xe10] sm:$0xff] }
 0x429   :  { %5013 = vmatprep.subr.mxu0 %v2878_v56  ;;  %5046 = vmatprep.subr.mxu1 %v2911_v22  ;;  %v2961_v56 = vld [vmem:[#allocation11 + $0xf18] sm:$0xff]  ;;  %v2943_v22 = vld [vmem:[#allocation11 + $0xe88] sm:$0xff] }
 0x42a   :  { %5014 = vmatpush3.msra.mxu0 %v2862_v60  ;;  %5047 = vmatpush3.msra.mxu1 %v2895_v12  ;;  %v2927_v60 = vld [vmem:[#allocation11 + $0xe08] sm:$0xff]  ;;  %v2960_v12 = vld [vmem:[#allocation11 + $0xf10] sm:$0xff] }
 0x42b   :  { %4078 = vmatmul.mubr.f32.vlgmr.msra.gmra.mxu0 %v7119_v51  ;;  %5048 = vmatprep.subr.mxu1 %v2910_v54  ;;  %v2988_v51 = vld [vmem:[#allocation11 + $0xff0] sm:$0xff]  ;;  %v2942_v54 = vld [vmem:[#allocation11 + $0xe80] sm:$0xff] }
 0x42c   :  { %5053 = vmatprep.subr.mxu0 %v2957_v7  ;;  %5049 = vmatpush3.msra.mxu1 %v2894_v37  ;;  %v2975_v7 = vld [vmem:[#allocation11 + $0xf88] sm:$0xff]  ;;  %v2926_v37 = vld [vmem:[#allocation11 + $0xe00] sm:$0xff] }
 0x42d   :  { %5054 = vmatpush3.msra.mxu0 %v2941_v47  ;;  %4217 = vmatprep.mubr.f32.mxu0 %v3139_v30  ;;  %v2959_v47 = vld [vmem:[#allocation11 + $0xf08] sm:$0xff]  ;;  %v2974_v30 = vld [vmem:[#allocation11 + $0xf80] sm:$0xff] }
 0x42e   :  { %4148 = vmatmul.mubr.f32.vlgmr.msra.gmra.mxu1 %v7122_v48  ;;  %5055 = vmatprep.subr.mxu0 %v2956_v24  ;;  %v2953_v48 = vld [vmem:[#allocation11 + $0xed8] sm:$0xff]  ;;  %v2958_v24 = vld [vmem:[#allocation11 + $0xf00] sm:$0xff] }
 0x42f   :  { %5088 = vmatprep.subr.mxu1 %v2989_v27  ;;  %5056 = vmatpush3.msra.mxu0 %v2940_v55  ;;  %v7183_v27 = vmov 0.0   ;;  %v4309_v55 = vld [vmem:[#allocation14 + $0x78] sm:$0xff] }
 0x430   :  { %5089 = vmatpush3.msra.mxu1 %v2973_v5  ;;  %4287 = vmatprep.mubr.f32.mxu1 %v3140_v53  ;;  %v4308_v5 = vld [vmem:[#allocation14 + $0x70] sm:$0xff]  ;;  %v4307_v53 = vld [vmem:[#allocation14 + $0x68] sm:$0xff] }
 0x431   :  { %5057 = vmatprep.subr.mxu0 %v2955_v3  ;;  %5090 = vmatprep.subr.mxu1 %v2988_v51  ;;  %v4306_v3 = vld [vmem:[#allocation14 + $0x60] sm:$0xff]  ;;  %v4304_v51 = vld [vmem:[#allocation14 + $0x50] sm:$0xff] }
 0x432   :  { %5058 = vmatpush3.msra.mxu0 %v2939_v4  ;;  %5091 = vmatpush3.msra.mxu1 %v2972_v32  ;;  %v4302_v4 = vld [vmem:[#allocation14 + $0x40] sm:$0xff]  ;;  %v4301_v32 = vld [vmem:[#allocation14 + $0x38] sm:$0xff] }
 0x433   :  { %5059 = vmatprep.subr.mxu0 %v2954_v14  ;;  %5092 = vmatprep.subr.mxu1 %v2987_v58  ;;  %v4300_v14 = vld [vmem:[#allocation14 + $0x30] sm:$0xff]  ;;  %v4299_v58 = vld [vmem:[#allocation14 + $0x28] sm:$0xff] }
 0x434   :  { %5060 = vmatpush3.msra.mxu0 %v2938_v52  ;;  %5093 = vmatpush3.msra.mxu1 %v2971_v8  ;;  %v4298_v52 = vld [vmem:[#allocation14 + $0x20] sm:$0xff]  ;;  %v4297_v8 = vld [vmem:[#allocation14 + $0x18] sm:$0xff] }
 0x435   :  { %5061 = vmatprep.subr.mxu0 %v2953_v48  ;;  %5094 = vmatprep.subr.mxu1 %v2986_v45  ;;  %v4296_v48 = vld [vmem:[#allocation14 + $0x10] sm:$0xff]  ;;  %v4295_v45 = vld [vmem:[#allocation14 + $0x8] sm:$0xff] }
 0x436   :  { %5062 = vmatpush3.msra.mxu0 %v2937_v57  ;;  %5095 = vmatpush3.msra.mxu1 %v2970_v50  ;;  %v4294_v57 = vld [vmem:[#allocation14] sm:$0xff]  ;;  %v4595_v50 = vpop.f32.mrf.mxu0 }
 0x437   :  { %5063 = vmatprep.subr.mxu0 %v2952_v2  ;;  %5096 = vmatprep.subr.mxu1 %v2985_v34  ;;  %v4630_v34 = vpop.f32.mrf.mxu1 }
 0x438   :  { %5064 = vmatpush3.msra.mxu0 %v2936_v0  ;;  %5097 = vmatpush3.msra.mxu1 %v2969_v42  ;;  %v4596_v2 = vpop.f32.mrf.mxu0 }
 0x439   :  { %5065 = vmatprep.subr.mxu0 %v2951_v16  ;;  %5098 = vmatprep.subr.mxu1 %v2984_v13  ;;  %v4597_v42 = vadd.f32 %v4596_v2, %v4595_v50  ;;  %v4441_v16 = vld [vmem:[#allocation13] ss:$0 sm:$0xff]  ;;  %v4631_v13 = vpop.f32.mrf.mxu1 }
 0x43a   :  { %5066 = vmatpush3.msra.mxu0 %v2935_v11  ;;  %5099 = vmatpush3.msra.mxu1 %v2968_v10 }
 0x43b   :  { %5067 = vmatprep.subr.mxu0 %v2950_v38  ;;  %5100 = vmatprep.subr.mxu1 %v2983_v17  ;;  %v3240_v38 = vadd.f32 %v4597_v42, %v4441_v16  ;;  %v4632_v17 = vadd.f32 %v4631_v13, %v4630_v34  ;;  %v4442_v34 = vld [vmem:[#allocation16] ss:$0 sm:$0xff] }
 0x43c   :  { %5068 = vmatpush3.msra.mxu0 %v2934_v9  ;;  %5101 = vmatpush3.msra.mxu1 %v2967_v23 }
 0x43d   :  { %5069 = vmatprep.subr.mxu0 %v2949_v35  ;;  %5102 = vmatprep.subr.mxu1 %v2982_v59  ;;  %v3310_v59 = vadd.f32 %v4632_v17, %v3240_v38 }
 0x43e   :  { %5070 = vmatpush3.msra.mxu0 %v2933_v20  ;;  %5103 = vmatpush3.msra.mxu1 %v2966_v19 }
 0x43f   :  { %5071 = vmatprep.subr.mxu0 %v2948_v6  ;;  %5104 = vmatprep.subr.mxu1 %v2981_v1 }
 0x440   :  { %5072 = vmatpush3.msra.mxu0 %v2932_v43  ;;  %5105 = vmatpush3.msra.mxu1 %v2965_v15 }
 0x441   :  { %5073 = vmatprep.subr.mxu0 %v2947_v28  ;;  %5106 = vmatprep.subr.mxu1 %v2980_v41  ;;  %v4665_v0 = vpop.f32.mrf.mxu0 }
 0x442   :  { %5074 = vmatpush3.msra.mxu0 %v2931_v25  ;;  %5107 = vmatpush3.msra.mxu1 %v2964_v61 }
 0x443   :  { %5075 = vmatprep.subr.mxu0 %v2946_v21  ;;  %5108 = vmatprep.subr.mxu1 %v2979_v26  ;;  %v4666_v11 = vpop.f32.mrf.mxu0 }
 0x444   :  { %5076 = vmatpush3.msra.mxu0 %v2930_v33  ;;  %5109 = vmatpush3.msra.mxu1 %v2963_v36  ;;  %v4700_v10 = vpop.f32.mrf.mxu1  ;;  %v4667_v23 = vadd.f32 %v4666_v11, %v4665_v0 }
 0x445   :  { %5077 = vmatprep.subr.mxu0 %v2945_v39  ;;  %5110 = vmatprep.subr.mxu1 %v2978_v46 }
 0x446   :  { %5078 = vmatpush3.msra.mxu0 %v2929_v31  ;;  %5111 = vmatpush3.msra.mxu1 %v2962_v62  ;;  %v4701_v35 = vpop.f32.mrf.mxu1  ;;  %v3380_v6 = vadd.f32 %v4667_v23, %v3310_v59 }
 0x447   :  { %5079 = vmatprep.subr.mxu0 %v2944_v18  ;;  %5112 = vmatprep.subr.mxu1 %v2977_v49  ;;  %v4702_v1 = vadd.f32 %v4701_v35, %v4700_v10 }
 0x448   :  { %5080 = vmatpush3.msra.mxu0 %v2928_v63  ;;  %5113 = vmatpush3.msra.mxu1 %v2961_v56 }
 0x449   :  { %5081 = vmatprep.subr.mxu0 %v2943_v22  ;;  %5114 = vmatprep.subr.mxu1 %v2976_v40  ;;  %v3450_v41 = vadd.f32 %v4702_v1, %v3380_v6 }
 0x44a   :  { %5082 = vmatpush3.msra.mxu0 %v2927_v60  ;;  %5115 = vmatpush3.msra.mxu1 %v2960_v12 }
 0x44b   :  { %5083 = vmatprep.subr.mxu0 %v2942_v54  ;;  %5116 = vmatprep.subr.mxu1 %v2975_v7 }
 0x44c   :  { %5084 = vmatpush3.msra.mxu0 %v2926_v37  ;;  %5117 = vmatpush3.msra.mxu1 %v2959_v47 }
 0x44d   :  { %4218 = vmatmul.mubr.f32.vlgmr.msra.gmra.mxu0 %v7131_v29  ;;  %5118 = vmatprep.subr.mxu1 %v2974_v30  ;;  %v4305_v29 = vld [vmem:[#allocation14 + $0x58] sm:$0xff] }
 0x44e   :  { %5119 = vmatpush3.msra.mxu1 %v2958_v24  ;;  %5204 = vmatprep.subr.mxu0 %v7183_v27 }
 0x44f   :  { %4288 = vmatmul.mubr.f32.vlgmr.msra.gmra.mxu1 %v7134_v44  ;;  %5205 = vmatpush3.msra.mxu0 %v4309_v55  ;;  %v4303_v44 = vld [vmem:[#allocation14 + $0x48] sm:$0xff] }
 0x450   :  { %5206 = vmatprep.subr.mxu0 %v7183_v27  ;;  %5236 = vmatprep.mubr.msk.f32.mxu0 %vm5446_vm15, %v7183_v27 }
 0x451   :  { %5207 = vmatpush3.msra.mxu0 %v4308_v5 }
 0x452   :  { %5208 = vmatprep.subr.mxu0 %v7183_v27 }
 0x453   :  { %5209 = vmatpush3.msra.mxu0 %v4307_v53 }
 0x454   :  { %5210 = vmatprep.subr.mxu0 %v7183_v27 }
 0x455   :  { %5211 = vmatpush3.msra.mxu0 %v4306_v3 }
 0x456   :  { %5212 = vmatprep.subr.mxu0 %v7183_v27 }
 0x457   :  { %5213 = vmatpush3.msra.mxu0 %v4305_v29 }
 0x458   :  { %5214 = vmatprep.subr.mxu0 %v7183_v27 }
 0x459   :  { %5215 = vmatpush3.msra.mxu0 %v4304_v51 }
 0x45a   :  { %5216 = vmatprep.subr.mxu0 %v7183_v27 }
 0x45b   :  { %5217 = vmatpush3.msra.mxu0 %v4303_v44 }
 0x45c   :  { %5218 = vmatprep.subr.mxu0 %v7183_v27 }
 0x45d   :  { %5219 = vmatpush3.msra.mxu0 %v4302_v4 }
 0x45e   :  { %5220 = vmatprep.subr.mxu0 %v7183_v27 }
 0x45f   :  { %5221 = vmatpush3.msra.mxu0 %v4301_v32 }
 0x460   :  { %5222 = vmatprep.subr.mxu0 %v7183_v27 }
 0x461   :  { %5223 = vmatpush3.msra.mxu0 %v4300_v14 }
 0x462   :  { %5224 = vmatprep.subr.mxu0 %v7183_v27 }
 0x463   :  { %5225 = vmatpush3.msra.mxu0 %v4299_v58  ;;  %v4735_v9 = vpop.f32.mrf.mxu0 }
 0x464   :  { %5226 = vmatprep.subr.mxu0 %v7183_v27 }
 0x465   :  { %5227 = vmatpush3.msra.mxu0 %v4298_v52  ;;  %v4736_v20 = vpop.f32.mrf.mxu0 }
 0x466   :  { %5228 = vmatprep.subr.mxu0 %v7183_v27  ;;  %v4770_v19 = vpop.f32.mrf.mxu1  ;;  %v4737_v15 = vadd.f32 %v4736_v20, %v4735_v9 }
 0x467   :  { %5229 = vmatpush3.msra.mxu0 %v4297_v8 }
 0x468   :  { %5230 = vmatprep.subr.mxu0 %v7183_v27  ;;  %v4771_v28 = vpop.f32.mrf.mxu1  ;;  %v3520_v21 = vadd.f32 %v4737_v15, %v3450_v41 }
 0x469   :  { %5231 = vmatpush3.msra.mxu0 %v4296_v48  ;;  %v4772_v26 = vadd.f32 %v4771_v28, %v4770_v19 }
 0x46a   :  { %5232 = vmatprep.subr.mxu0 %v7183_v27 }
 0x46b   :  { %5233 = vmatpush3.msra.mxu0 %v4295_v45  ;;  %v3590_v46 = vadd.f32 %v4772_v26, %v3520_v21 }
 0x46c   :  { %5234 = vmatprep.subr.mxu0 %v7183_v27 }
 0x46d   :  { %5235 = vmatpush3.msra.mxu0 %v4294_v57 }
 0x485   :  { %v4805_v43 = vpop.f32.mrf.mxu0 }
 0x487   :  { %v4806_v25 = vpop.f32.mrf.mxu0 }
 0x488   :  { %v4840_v61 = vpop.f32.mrf.mxu1  ;;  %v4807_v36 = vadd.f32 %v4806_v25, %v4805_v43 }
 0x48a   :  { %v4841_v39 = vpop.f32.mrf.mxu1  ;;  %v3660_v18 = vadd.f32 %v4807_v36, %v3590_v46 }
 0x48b   :  { %v4842_v49 = vadd.f32 %v4841_v39, %v4840_v61 }
 0x48d   :  { %v3730_v40 = vadd.f32 %v4842_v49, %v3660_v18 }
 0x4a7   :  { %v4875_v33 = vpop.f32.mrf.mxu0 }
 0x4a9   :  { %v4876_v31 = vpop.f32.mrf.mxu0 }
 0x4aa   :  { %v4910_v62 = vpop.f32.mrf.mxu1  ;;  %v4877_v56 = vadd.f32 %v4876_v31, %v4875_v33 }
 0x4ac   :  { %v4911_v22 = vpop.f32.mrf.mxu1  ;;  %v3800_v54 = vadd.f32 %v4877_v56, %v3730_v40 }
 0x4ad   :  { %v4912_v7 = vadd.f32 %v4911_v22, %v4910_v62 }
 0x4af   :  { %v3870_v24 = vadd.f32 %v4912_v7, %v3800_v54 }
 0x4c9   :  { %v4945_v63 = vpop.f32.mrf.mxu0 }
 0x4cb   :  { %v4946_v60 = vpop.f32.mrf.mxu0 }
 0x4cc   :  { %v4980_v12 = vpop.f32.mrf.mxu1  ;;  %v4947_v47 = vadd.f32 %v4946_v60, %v4945_v63 }
 0x4ce   :  { %v4981_v30 = vpop.f32.mrf.mxu1  ;;  %v3940_v5 = vadd.f32 %v4947_v47, %v3870_v24 }
 0x4cf   :  { %v4982_v53 = vadd.f32 %v4981_v30, %v4980_v12 }
 0x4d1   :  { %v4010_v51 = vadd.f32 %v4982_v53, %v3940_v5 }
 0x4eb   :  { %v5015_v37 = vpop.f32.mrf.mxu0 }
 0x4ed   :  { %v5016_v27 = vpop.f32.mrf.mxu0 }
 0x4ee   :  { %v5050_v55 = vpop.f32.mrf.mxu1  ;;  %v5017_v3 = vadd.f32 %v5016_v27, %v5015_v37 }
 0x4f0   :  { %v5051_v29 = vpop.f32.mrf.mxu1  ;;  %v4080_v44 = vadd.f32 %v5017_v3, %v4010_v51 }
 0x4f1   :  { %v5052_v4 = vadd.f32 %v5051_v29, %v5050_v55 }
 0x4f3   :  { %v4150_v52 = vadd.f32 %v5052_v4, %v4080_v44 }
 0x50d   :  { %v5085_v32 = vpop.f32.mrf.mxu0 }
 0x50f   :  { %v5086_v14 = vpop.f32.mrf.mxu0  ;;  %v5120_v58 = vpop.f32.mrf.mxu1 }
 0x510   :  { %v5087_v8 = vadd.f32 %v5086_v14, %v5085_v32 }
 0x511   :  { %v5121_v48 = vpop.f32.mrf.mxu1 }
 0x512   :  { %v4220_v45 = vadd.f32 %v5087_v8, %v4150_v52  ;;  %v5122_v57 = vadd.f32 %v5121_v48, %v5120_v58 }
 0x514   :  { %v4290_v50 = vadd.f32 %v5122_v57, %v4220_v45 }
 0x516   :  { %v4293_v2 = vmax.f32 %v4290_v50, 0.0 }
 0x518   :  { %5237 = vmatmul.mubr.f32.vlgmr.msra.gmra.mxu0 %v4293_v2 }
 0x5d8   :  { %v4383_v0 = vpop.f32.mrf.mxu0 }
 0x5d9   :  { %v4384_v42 = vadd.f32 %v4442_v34, %v4383_v0 }
 0x5da   :  { %v5238_v16 = vpop.f32.mrf.mxu0 }
 0x5db   :  { %4387 = vst [vmem:[#allocation17] sm:$0x3] %v4384_v42 }
 0x5dc   :  { %5413 = shalt.err (!%p5410_p11)
}
 0x5dd   :  { %4397 = dma.vmem_to_hbm [thread:$0]  %s4395_s27, 32, %s7173_s9, [#allocation7]  }
 0x5de   :  { %5430 = dma.done.wait [#allocation7], 32  }
 0x5df   :  { %5431 = vsyncadd [#allocation7], 4294967264 }
 0x5e0   :  { %4401 = vsyncpa [#allocation6], 1 }
 0x5e1   :  { %4402 = vsyncpa [#allocation9], 1 }
 0x5e2   :  { %4403 = vsyncpa [#allocation12], 1 }
 0x5e3   :  { %4404 = vsyncpa [#allocation15], 1 }
 0x5e4   :  { %4405 = vsyncpa [#allocation7], 1 }

</bundles_post_ra>
